<compile_context>
chip_gen: v5e
topology: v5e:2x2
jax: 0.10.0
libtpu: 0.0.40
codegen_flags: <defaults>
</compile_context>

<pallas_src>
import jax
import jax.numpy as jnp
from jax.experimental import pallas as pl
from jax.experimental.pallas import tpu as pltpu

NEG_SLOPE = 0.01   # nn.LeakyReLU default
BN_EPS = 1e-5      # nn.BatchNorm2d default


def _leaky(x):
    return jnp.where(x >= 0, x, NEG_SLOPE * x)


def attn_bn_kernel(nfT_ref, wq_ref, wkT_ref, woT_ref, gamma_ref, beta_ref,
                   a_ref, out_ref):
    """One batch element of attention per grid step + fused BN/LeakyReLU finalize.

    nfT_ref  : (1, C, N)  node features, N (=H*W) in lanes
    wq_ref   : (C, A)     Wq with the 1/sqrt(A) softmax scale folded in
    wkT_ref  : (A, C)     Wk^T
    woT_ref  : (C, O)     to_out weight transposed (bias dropped; cancels in BN)
    gamma_ref: (O, 1)     BN weight
    beta_ref : (O, 1)     BN bias
    a_ref    : (1, N, N)  softmax attention output (per-step block)
    out_ref  : (B, O, N)  resident output block; holds pre-BN y until the last
                          step, then is overwritten in place with the final out.
    """
    b = pl.program_id(0)
    nfT = nfT_ref[0]                                                    # (C, N)
    nf = nfT.T                                                          # (N, C) tiny XLU transpose

    # Projections. All matmuls below are standard (M,K)@(K,N) orientation so
    # no large operand ever needs an XLU transpose.
    q = _leaky(jnp.dot(nf, wq_ref[...],
                       preferred_element_type=jnp.float32))             # (N, A), scale pre-folded
    kT = _leaky(jnp.dot(wkT_ref[...], nfT,
                        preferred_element_type=jnp.float32))            # (A, N)

    # Scores + softmax (f32; A is an exported probability matrix).
    s = jnp.dot(q, kT, preferred_element_type=jnp.float32)              # (Nq, Nk)
    s = s - jnp.max(s, axis=-1, keepdims=True)
    e = jnp.exp(s)
    # Exact reciprocal of the (N, 1) row sums: negligible cost, rows of the
    # returned A sum to 1 (no approx-reciprocal drift).
    a = e * (1.0 / jnp.sum(e, axis=-1, keepdims=True))
    a_ref[0] = a                                                        # lane-dense (N, N) store

    # Context + to_out with Wout applied to nf first (exact by associativity):
    #   y = (A @ nf) @ Wout^T == A @ (nf @ Wout^T)
    # so the big (N, N) `a` stays the LHS of a standard matmul.
    wnf = jnp.dot(nf, woT_ref[...], preferred_element_type=jnp.float32)  # (N, O)
    y_no = jnp.dot(a, wnf, preferred_element_type=jnp.float32)           # (N, O)
    out_ref[b] = y_no.T                  # stage pre-BN y, (O, N) lane-dense, stays in VMEM

    # Fused training-mode BatchNorm2d (stats over B and N per channel) +
    # LeakyReLU, applied once after the last batch element.
    @pl.when(b == pl.num_programs(0) - 1)
    def _():
        bsz, o_sz, n_sz = out_ref.shape
        inv_cnt = 1.0 / float(bsz * n_sz)

        s1 = jnp.zeros((o_sz, 1), jnp.float32)
        for bb in range(bsz):                       # static unroll (B is small)
            s1 = s1 + jnp.sum(out_ref[bb], axis=1, keepdims=True)
        mean = s1 * inv_cnt                                              # (O, 1)

        s2 = jnp.zeros((o_sz, 1), jnp.float32)
        for bb in range(bsz):
            d = out_ref[bb] - mean
            s2 = s2 + jnp.sum(d * d, axis=1, keepdims=True)
        var = s2 * inv_cnt                                               # biased var (training BN)

        # Single-pass apply: precompute per-channel scale/shift once.
        scale = gamma_ref[...] * jax.lax.rsqrt(var + BN_EPS)             # (O, 1)
        shift = beta_ref[...] - mean * scale                             # (O, 1)
        for bb in range(bsz):
            out_ref[bb] = _leaky(out_ref[bb] * scale + shift)


@jax.jit
def self_attention_adj_forward(x, params):
    B, C, H, W = x.shape
    N = H * W
    A_sz = params["wq"].shape[1]
    O = params["w_out"].shape[0]
    assert O == C, "output_size must equal feature_size for the .view() to be valid"
    scale = float(A_sz) ** (-0.5)

    # Free layout: NCHW -> (B, C, N); nodes go to the lane axis, no transpose.
    nfT = x.reshape(B, C, N).astype(jnp.float32)

    # Host-side weight prep (tiny, one-off): fold softmax scale into Wq
    # (exact: LeakyReLU is positively homogeneous), pre-transpose Wk and Wout.
    wq_s = (params["wq"] * scale).astype(jnp.float32)                    # (C, A)
    wkT = params["wk"].T.astype(jnp.float32)                             # (A, C)
    woT = params["w_out"].T.astype(jnp.float32)                          # (C, O); b_out dropped (cancels in train-mode BN)
    gamma = params["gamma"].reshape(O, 1).astype(jnp.float32)
    beta = params["beta"].reshape(O, 1).astype(jnp.float32)

    fused_call = pl.pallas_call(
        attn_bn_kernel,
        grid=(B,),
        in_specs=[
            pl.BlockSpec((1, C, N), lambda b: (b, 0, 0)),
            pl.BlockSpec((C, A_sz), lambda b: (0, 0)),
            pl.BlockSpec((A_sz, C), lambda b: (0, 0)),
            pl.BlockSpec((C, O), lambda b: (0, 0)),
            pl.BlockSpec((O, 1), lambda b: (0, 0)),
            pl.BlockSpec((O, 1), lambda b: (0, 0)),
        ],
        out_specs=[
            pl.BlockSpec((1, N, N), lambda b: (b, 0, 0)),        # streamed per batch
            pl.BlockSpec((B, O, N), lambda b: (0, 0, 0)),        # resident accumulator block
        ],
        out_shape=[
            jax.ShapeDtypeStruct((B, N, N), jnp.float32),
            jax.ShapeDtypeStruct((B, O, N), jnp.float32),
        ],
        # The B axis carries state (resident out block + last-step BN), so it
        # must be sequential ("arbitrary").  See header TODO for the v7x
        # large-problem variant that keeps B "parallel".
        compiler_params=pltpu.CompilerParams(dimension_semantics=("arbitrary",)),
    )
    A, out_bon = fused_call(nfT, wq_s, wkT, woT, gamma, beta)

    # (B, O, N) -> (B, C, H, W) is a pure reshape (O == C, N == H*W).
    out = out_bon.reshape(B, O, H, W)
    return out, A


@jax.jit
def reference_forward(x, params):
    """Pure-JAX reference mirroring the PyTorch module (training-mode BN)."""
    B, C, H, W = x.shape
    N = H * W
    nf = jnp.transpose(x.reshape(B, C, N), (0, 2, 1))
    scale = params["wq"].shape[1] ** (-0.5)
    Q = _leaky(nf @ params["wq"])
    K = _leaky(nf @ params["wk"])
    A = jax.nn.softmax(jnp.einsum("bnc,bmc->bnm", Q, K) * scale, axis=-1)
    y = (A @ nf) @ params["w_out"].T + params["b_out"]
    y = jnp.transpose(y, (0, 2, 1)).reshape(B, -1, H, W)
    mean = jnp.mean(y, axis=(0, 2, 3), keepdims=True)
    var = jnp.var(y, axis=(0, 2, 3), keepdims=True)
    yn = (y - mean) / jnp.sqrt(var + BN_EPS)
    yn = yn * params["gamma"].reshape(1, -1, 1, 1) + params["beta"].reshape(1, -1, 1, 1)
    return _leaky(yn), A


def init_params(key, feature_size, attention_size, output_size):
    k1, k2, k3, k4 = jax.random.split(key, 4)
    # kaiming_uniform_ (a=0, fan_in = dim 1): bound = sqrt(2) * sqrt(3 / fan_in)
    bqk = (2.0 ** 0.5) * (3.0 / attention_size) ** 0.5
    wq = jax.random.uniform(k1, (feature_size, attention_size), jnp.float32, -bqk, bqk)
    wk = jax.random.uniform(k2, (feature_size, attention_size), jnp.float32, -bqk, bqk)
    # nn.Linear default init: U(-1/sqrt(fan_in), 1/sqrt(fan_in))
    bl = 1.0 / (feature_size ** 0.5)
    w_out = jax.random.uniform(k3, (output_size, feature_size), jnp.float32, -bl, bl)
    b_out = jax.random.uniform(k4, (output_size,), jnp.float32, -bl, bl)
    gamma = jnp.ones((output_size,), jnp.float32)   # BatchNorm2d defaults
    beta = jnp.zeros((output_size,), jnp.float32)
    return dict(wq=wq, wk=wk, w_out=w_out, b_out=b_out, gamma=gamma, beta=beta)


if __name__ == "__main__":
    B, C, H, W = 2, 4, 16, 16            # x: (B, C, H, W), N = 256 nodes
    feature_size, attention_size, output_size = C, 32, C

    root = jax.random.PRNGKey(0)
    kp, kx = jax.random.split(root)
    params = init_params(kp, feature_size, attention_size, output_size)
    x = jax.random.normal(kx, (B, C, H, W), jnp.float32)

    out, A = jax.block_until_ready(self_attention_adj_forward(x, params))
    out_ref, A_ref = jax.block_until_ready(reference_forward(x, params))

    assert out.shape == (B, C, H, W) and A.shape == (B, H * W, H * W)
    # f32 end-to-end with exact softmax normalization: only matmul
    # re-association noise remains, so these tolerances have large margins.
    assert jnp.allclose(A, A_ref, rtol=2e-3, atol=1e-6), "attention mismatch"
    assert jnp.allclose(out, out_ref, rtol=2e-3, atol=2e-3), "output mismatch"
    print("KERNEL_OK")
</pallas_src>

<mosaic_0001>
module attributes {stable_mosaic.version = 11 : i64} {
  func.func @attn_bn_kernel(%arg0: i32, %arg1: memref<1x4x256xf32, #tpu.memory_space<vmem>>, %arg2: memref<4x32xf32, #tpu.memory_space<vmem>>, %arg3: memref<32x4xf32, #tpu.memory_space<vmem>>, %arg4: memref<4x4xf32, #tpu.memory_space<vmem>>, %arg5: memref<4x1xf32, #tpu.memory_space<vmem>>, %arg6: memref<4x1xf32, #tpu.memory_space<vmem>>, %arg7: memref<1x256x256xf32, #tpu.memory_space<vmem>>, %arg8: memref<2x4x256xf32, #tpu.memory_space<vmem>>) attributes {dimension_semantics = [#tpu.dimension_semantics<arbitrary>], iteration_bounds = array<i64: 2>, scalar_prefetch = 0 : i64, scratch_operands = 0 : i64, tpu.core_type = #tpu.core_type<tc>, window_params = [{transform_indices = @transform_0, window_bounds = array<i64: 1, 4, 256>}, {pipeline_mode = #tpu.pipeline_mode<synchronous>, transform_indices = @transform_1, window_bounds = array<i64: 4, 32>}, {pipeline_mode = #tpu.pipeline_mode<synchronous>, transform_indices = @transform_2, window_bounds = array<i64: 32, 4>}, {pipeline_mode = #tpu.pipeline_mode<synchronous>, transform_indices = @transform_3, window_bounds = array<i64: 4, 4>}, {pipeline_mode = #tpu.pipeline_mode<synchronous>, transform_indices = @transform_4, window_bounds = array<i64: 4, 1>}, {pipeline_mode = #tpu.pipeline_mode<synchronous>, transform_indices = @transform_5, window_bounds = array<i64: 4, 1>}, {transform_indices = @transform_6, window_bounds = array<i64: 1, 256, 256>}, {pipeline_mode = #tpu.pipeline_mode<synchronous>, transform_indices = @transform_7, window_bounds = array<i64: 2, 4, 256>}]} {
    %c0 = arith.constant 0 : index
    %c0_0 = arith.constant 0 : index
    %c0_1 = arith.constant 0 : index
    %0 = vector.load %arg1[%c0, %c0_0, %c0_1] : memref<1x4x256xf32, #tpu.memory_space<vmem>>, vector<1x4x256xf32>
    %1 = vector.shape_cast %0 : vector<1x4x256xf32> to vector<4x256xf32>
    %2 = tpu.transpose %1, [1, 0] : vector<4x256xf32> -> vector<256x4xf32>
    %c0_2 = arith.constant 0 : index
    %c0_3 = arith.constant 0 : index
    %3 = vector.load %arg2[%c0_2, %c0_3] : memref<4x32xf32, #tpu.memory_space<vmem>>, vector<4x32xf32>
    %cst = arith.constant dense<0.000000e+00> : vector<256x32xf32>
    %4 = tpu.matmul %2, %3, %cst {dimension_numbers = #tpu.dot_dimension_numbers<[1], [0], [0], [1], [0, 0, 1, 1], [], []>} : vector<256x4xf32>, vector<4x32xf32>, vector<256x32xf32> -> vector<256x32xf32>
    %cst_4 = arith.constant 0.000000e+00 : f32
    %5 = vector.broadcast %cst_4 : f32 to vector<256x32xf32>
    %6 = arith.cmpf oge, %4, %5 : vector<256x32xf32>
    %cst_5 = arith.constant 0.00999999977 : f32
    %7 = vector.broadcast %cst_5 : f32 to vector<256x32xf32>
    %8 = arith.mulf %7, %4 : vector<256x32xf32>
    %9 = arith.select %6, %4, %8 : vector<256x32xi1>, vector<256x32xf32>
    %c0_6 = arith.constant 0 : index
    %c0_7 = arith.constant 0 : index
    %10 = vector.load %arg3[%c0_6, %c0_7] : memref<32x4xf32, #tpu.memory_space<vmem>>, vector<32x4xf32>
    %cst_8 = arith.constant dense<0.000000e+00> : vector<32x256xf32>
    %11 = tpu.matmul %10, %1, %cst_8 {dimension_numbers = #tpu.dot_dimension_numbers<[1], [0], [0], [1], [0, 0, 1, 1], [], []>} : vector<32x4xf32>, vector<4x256xf32>, vector<32x256xf32> -> vector<32x256xf32>
    %cst_9 = arith.constant 0.000000e+00 : f32
    %12 = vector.broadcast %cst_9 : f32 to vector<32x256xf32>
    %13 = arith.cmpf oge, %11, %12 : vector<32x256xf32>
    %cst_10 = arith.constant 0.00999999977 : f32
    %14 = vector.broadcast %cst_10 : f32 to vector<32x256xf32>
    %15 = arith.mulf %14, %11 : vector<32x256xf32>
    %16 = arith.select %13, %11, %15 : vector<32x256xi1>, vector<32x256xf32>
    %cst_11 = arith.constant dense<0.000000e+00> : vector<256x256xf32>
    %17 = tpu.matmul %9, %16, %cst_11 {dimension_numbers = #tpu.dot_dimension_numbers<[1], [0], [0], [1], [0, 0, 1, 1], [], []>} : vector<256x32xf32>, vector<32x256xf32>, vector<256x256xf32> -> vector<256x256xf32>
    %cst_12 = arith.constant dense<0xFF800000> : vector<256xf32>
    %18 = vector.multi_reduction <maximumf>, %17, %cst_12 [1] : vector<256x256xf32> to vector<256xf32>
    %19 = vector.shape_cast %18 : vector<256xf32> to vector<256x1xf32>
    %20 = vector.broadcast %19 : vector<256x1xf32> to vector<256x256xf32>
    %21 = arith.subf %17, %20 : vector<256x256xf32>
    %22 = math.exp %21 : vector<256x256xf32>
    %cst_13 = arith.constant dense<0.000000e+00> : vector<256xf32>
    %23 = vector.multi_reduction <add>, %22, %cst_13 [1] : vector<256x256xf32> to vector<256xf32>
    %24 = vector.shape_cast %23 : vector<256xf32> to vector<256x1xf32>
    %cst_14 = arith.constant 1.000000e+00 : f32
    %25 = vector.broadcast %cst_14 : f32 to vector<256x1xf32>
    %26 = arith.divf %25, %24 : vector<256x1xf32>
    %27 = vector.broadcast %26 : vector<256x1xf32> to vector<256x256xf32>
    %28 = arith.mulf %22, %27 : vector<256x256xf32>
    %c0_15 = arith.constant 0 : index
    %c0_16 = arith.constant 0 : index
    %c0_17 = arith.constant 0 : index
    %29 = vector.load %arg7[%c0_15, %c0_16, %c0_17] : memref<1x256x256xf32, #tpu.memory_space<vmem>>, vector<1x256x256xf32>
    %30 = vector.shape_cast %29 : vector<1x256x256xf32> to vector<256x256xf32>
    %31 = vector.shape_cast %28 : vector<256x256xf32> to vector<1x256x256xf32>
    tpu.vector_store %arg7[%c0_15, %c0_16, %c0_17], %31 {strides = array<i32>} : memref<1x256x256xf32, #tpu.memory_space<vmem>>, vector<1x256x256xf32>,
    %c0_18 = arith.constant 0 : index
    %c0_19 = arith.constant 0 : index
    %32 = vector.load %arg4[%c0_18, %c0_19] : memref<4x4xf32, #tpu.memory_space<vmem>>, vector<4x4xf32>
    %cst_20 = arith.constant dense<0.000000e+00> : vector<256x4xf32>
    %33 = tpu.matmul %2, %32, %cst_20 {dimension_numbers = #tpu.dot_dimension_numbers<[1], [0], [0], [1], [0, 0, 1, 1], [], []>} : vector<256x4xf32>, vector<4x4xf32>, vector<256x4xf32> -> vector<256x4xf32>
    %cst_21 = arith.constant dense<0.000000e+00> : vector<256x4xf32>
    %34 = tpu.matmul %28, %33, %cst_21 {dimension_numbers = #tpu.dot_dimension_numbers<[1], [0], [0], [1], [0, 0, 1, 1], [], []>} : vector<256x256xf32>, vector<256x4xf32>, vector<256x4xf32> -> vector<256x4xf32>
    %35 = tpu.transpose %34, [1, 0] : vector<256x4xf32> -> vector<4x256xf32>
    %36 = arith.index_cast %arg0 : i32 to index
    %c0_22 = arith.constant 0 : index
    %c0_23 = arith.constant 0 : index
    %37 = vector.load %arg8[%36, %c0_22, %c0_23] : memref<2x4x256xf32, #tpu.memory_space<vmem>>, vector<1x4x256xf32>
    %38 = vector.shape_cast %37 : vector<1x4x256xf32> to vector<4x256xf32>
    %39 = vector.shape_cast %35 : vector<4x256xf32> to vector<1x4x256xf32>
    tpu.vector_store %arg8[%36, %c0_22, %c0_23], %39 {strides = array<i32>} : memref<2x4x256xf32, #tpu.memory_space<vmem>>, vector<1x4x256xf32>,
    %c1_i32 = arith.constant 1 : i32
    %40 = arith.cmpi eq, %arg0, %c1_i32 : i32
    %41 = arith.extui %40 : i1 to i32
    %c0_i32 = arith.constant 0 : i32
    %42 = arith.cmpi ne, %41, %c0_i32 : i32
    scf.if %42 {
      %cst_24 = arith.constant 0.000000e+00 : f32
      %43 = vector.broadcast %cst_24 : f32 to vector<4x1xf32>
      %c0_25 = arith.constant 0 : index
      %c0_26 = arith.constant 0 : index
      %c0_27 = arith.constant 0 : index
      %44 = vector.load %arg8[%c0_25, %c0_26, %c0_27] : memref<2x4x256xf32, #tpu.memory_space<vmem>>, vector<1x4x256xf32>
      %45 = vector.shape_cast %44 : vector<1x4x256xf32> to vector<4x256xf32>
      %cst_28 = arith.constant dense<0.000000e+00> : vector<4xf32>
      %46 = vector.multi_reduction <add>, %45, %cst_28 [1] : vector<4x256xf32> to vector<4xf32>
      %47 = vector.shape_cast %46 : vector<4xf32> to vector<4x1xf32>
      %48 = arith.addf %43, %47 : vector<4x1xf32>
      %c1 = arith.constant 1 : index
      %c0_29 = arith.constant 0 : index
      %c0_30 = arith.constant 0 : index
      %49 = vector.load %arg8[%c1, %c0_29, %c0_30] : memref<2x4x256xf32, #tpu.memory_space<vmem>>, vector<1x4x256xf32>
      %50 = vector.shape_cast %49 : vector<1x4x256xf32> to vector<4x256xf32>
      %cst_31 = arith.constant dense<0.000000e+00> : vector<4xf32>
      %51 = vector.multi_reduction <add>, %50, %cst_31 [1] : vector<4x256xf32> to vector<4xf32>
      %52 = vector.shape_cast %51 : vector<4xf32> to vector<4x1xf32>
      %53 = arith.addf %48, %52 : vector<4x1xf32>
      %cst_32 = arith.constant 0.001953125 : f32
      %54 = vector.broadcast %cst_32 : f32 to vector<4x1xf32>
      %55 = arith.mulf %53, %54 : vector<4x1xf32>
      %cst_33 = arith.constant 0.000000e+00 : f32
      %56 = vector.broadcast %cst_33 : f32 to vector<4x1xf32>
      %c0_34 = arith.constant 0 : index
      %c0_35 = arith.constant 0 : index
      %c0_36 = arith.constant 0 : index
      %57 = vector.load %arg8[%c0_34, %c0_35, %c0_36] : memref<2x4x256xf32, #tpu.memory_space<vmem>>, vector<1x4x256xf32>
      %58 = vector.shape_cast %57 : vector<1x4x256xf32> to vector<4x256xf32>
      %59 = vector.broadcast %55 : vector<4x1xf32> to vector<4x256xf32>
      %60 = arith.subf %58, %59 : vector<4x256xf32>
      %61 = arith.mulf %60, %60 : vector<4x256xf32>
      %cst_37 = arith.constant dense<0.000000e+00> : vector<4xf32>
      %62 = vector.multi_reduction <add>, %61, %cst_37 [1] : vector<4x256xf32> to vector<4xf32>
      %63 = vector.shape_cast %62 : vector<4xf32> to vector<4x1xf32>
      %64 = arith.addf %56, %63 : vector<4x1xf32>
      %c1_38 = arith.constant 1 : index
      %c0_39 = arith.constant 0 : index
      %c0_40 = arith.constant 0 : index
      %65 = vector.load %arg8[%c1_38, %c0_39, %c0_40] : memref<2x4x256xf32, #tpu.memory_space<vmem>>, vector<1x4x256xf32>
      %66 = vector.shape_cast %65 : vector<1x4x256xf32> to vector<4x256xf32>
      %67 = vector.broadcast %55 : vector<4x1xf32> to vector<4x256xf32>
      %68 = arith.subf %66, %67 : vector<4x256xf32>
      %69 = arith.mulf %68, %68 : vector<4x256xf32>
      %cst_41 = arith.constant dense<0.000000e+00> : vector<4xf32>
      %70 = vector.multi_reduction <add>, %69, %cst_41 [1] : vector<4x256xf32> to vector<4xf32>
      %71 = vector.shape_cast %70 : vector<4xf32> to vector<4x1xf32>
      %72 = arith.addf %64, %71 : vector<4x1xf32>
      %cst_42 = arith.constant 0.001953125 : f32
      %73 = vector.broadcast %cst_42 : f32 to vector<4x1xf32>
      %74 = arith.mulf %72, %73 : vector<4x1xf32>
      %c0_43 = arith.constant 0 : index
      %c0_44 = arith.constant 0 : index
      %75 = vector.load %arg5[%c0_43, %c0_44] : memref<4x1xf32, #tpu.memory_space<vmem>>, vector<4x1xf32>
      %cst_45 = arith.constant 9.99999974E-6 : f32
      %76 = vector.broadcast %cst_45 : f32 to vector<4x1xf32>
      %77 = arith.addf %74, %76 : vector<4x1xf32>
      %78 = math.rsqrt %77 : vector<4x1xf32>
      %79 = arith.mulf %75, %78 : vector<4x1xf32>
      %c0_46 = arith.constant 0 : index
      %c0_47 = arith.constant 0 : index
      %80 = vector.load %arg6[%c0_46, %c0_47] : memref<4x1xf32, #tpu.memory_space<vmem>>, vector<4x1xf32>
      %81 = arith.mulf %55, %79 : vector<4x1xf32>
      %82 = arith.subf %80, %81 : vector<4x1xf32>
      %c0_48 = arith.constant 0 : index
      %c0_49 = arith.constant 0 : index
      %c0_50 = arith.constant 0 : index
      %83 = vector.load %arg8[%c0_48, %c0_49, %c0_50] : memref<2x4x256xf32, #tpu.memory_space<vmem>>, vector<1x4x256xf32>
      %84 = vector.shape_cast %83 : vector<1x4x256xf32> to vector<4x256xf32>
      %85 = vector.broadcast %79 : vector<4x1xf32> to vector<4x256xf32>
      %86 = arith.mulf %84, %85 : vector<4x256xf32>
      %87 = vector.broadcast %82 : vector<4x1xf32> to vector<4x256xf32>
      %88 = arith.addf %86, %87 : vector<4x256xf32>
      %cst_51 = arith.constant 0.000000e+00 : f32
      %89 = vector.broadcast %cst_51 : f32 to vector<4x256xf32>
      %90 = arith.cmpf oge, %88, %89 : vector<4x256xf32>
      %cst_52 = arith.constant 0.00999999977 : f32
      %91 = vector.broadcast %cst_52 : f32 to vector<4x256xf32>
      %92 = arith.mulf %91, %88 : vector<4x256xf32>
      %93 = arith.select %90, %88, %92 : vector<4x256xi1>, vector<4x256xf32>
      %c0_53 = arith.constant 0 : index
      %c0_54 = arith.constant 0 : index
      %c0_55 = arith.constant 0 : index
      %94 = vector.load %arg8[%c0_53, %c0_54, %c0_55] : memref<2x4x256xf32, #tpu.memory_space<vmem>>, vector<1x4x256xf32>
      %95 = vector.shape_cast %94 : vector<1x4x256xf32> to vector<4x256xf32>
      %96 = vector.shape_cast %93 : vector<4x256xf32> to vector<1x4x256xf32>
      tpu.vector_store %arg8[%c0_53, %c0_54, %c0_55], %96 {strides = array<i32>} : memref<2x4x256xf32, #tpu.memory_space<vmem>>, vector<1x4x256xf32>,
      %c1_56 = arith.constant 1 : index
      %c0_57 = arith.constant 0 : index
      %c0_58 = arith.constant 0 : index
      %97 = vector.load %arg8[%c1_56, %c0_57, %c0_58] : memref<2x4x256xf32, #tpu.memory_space<vmem>>, vector<1x4x256xf32>
      %98 = vector.shape_cast %97 : vector<1x4x256xf32> to vector<4x256xf32>
      %99 = vector.broadcast %79 : vector<4x1xf32> to vector<4x256xf32>
      %100 = arith.mulf %98, %99 : vector<4x256xf32>
      %101 = vector.broadcast %82 : vector<4x1xf32> to vector<4x256xf32>
      %102 = arith.addf %100, %101 : vector<4x256xf32>
      %cst_59 = arith.constant 0.000000e+00 : f32
      %103 = vector.broadcast %cst_59 : f32 to vector<4x256xf32>
      %104 = arith.cmpf oge, %102, %103 : vector<4x256xf32>
      %cst_60 = arith.constant 0.00999999977 : f32
      %105 = vector.broadcast %cst_60 : f32 to vector<4x256xf32>
      %106 = arith.mulf %105, %102 : vector<4x256xf32>
      %107 = arith.select %104, %102, %106 : vector<4x256xi1>, vector<4x256xf32>
      %c1_61 = arith.constant 1 : index
      %c0_62 = arith.constant 0 : index
      %c0_63 = arith.constant 0 : index
      %108 = vector.load %arg8[%c1_61, %c0_62, %c0_63] : memref<2x4x256xf32, #tpu.memory_space<vmem>>, vector<1x4x256xf32>
      %109 = vector.shape_cast %108 : vector<1x4x256xf32> to vector<4x256xf32>
      %110 = vector.shape_cast %107 : vector<4x256xf32> to vector<1x4x256xf32>
      tpu.vector_store %arg8[%c1_61, %c0_62, %c0_63], %110 {strides = array<i32>} : memref<2x4x256xf32, #tpu.memory_space<vmem>>, vector<1x4x256xf32>,
    } else {
    }
    return
  }
  func.func @transform_0(%arg0: i32) -> (i32, i32, i32) {
    %c0_i32 = arith.constant 0 : i32
    %c0_i32_0 = arith.constant 0 : i32
    %c0_i32_1 = arith.constant 0 : i32
    return %arg0, %c0_i32, %c0_i32_0 : i32, i32, i32
  }
  func.func @transform_1(%arg0: i32) -> (i32, i32) {
    %c0_i32 = arith.constant 0 : i32
    %c0_i32_0 = arith.constant 0 : i32
    %c0_i32_1 = arith.constant 0 : i32
    return %c0_i32, %c0_i32_0 : i32, i32
  }
  func.func @transform_2(%arg0: i32) -> (i32, i32) {
    %c0_i32 = arith.constant 0 : i32
    %c0_i32_0 = arith.constant 0 : i32
    %c0_i32_1 = arith.constant 0 : i32
    return %c0_i32, %c0_i32_0 : i32, i32
  }
  func.func @transform_3(%arg0: i32) -> (i32, i32) {
    %c0_i32 = arith.constant 0 : i32
    %c0_i32_0 = arith.constant 0 : i32
    %c0_i32_1 = arith.constant 0 : i32
    return %c0_i32, %c0_i32_0 : i32, i32
  }
  func.func @transform_4(%arg0: i32) -> (i32, i32) {
    %c0_i32 = arith.constant 0 : i32
    %c0_i32_0 = arith.constant 0 : i32
    %c0_i32_1 = arith.constant 0 : i32
    return %c0_i32, %c0_i32_0 : i32, i32
  }
  func.func @transform_5(%arg0: i32) -> (i32, i32) {
    %c0_i32 = arith.constant 0 : i32
    %c0_i32_0 = arith.constant 0 : i32
    %c0_i32_1 = arith.constant 0 : i32
    return %c0_i32, %c0_i32_0 : i32, i32
  }
  func.func @transform_6(%arg0: i32) -> (i32, i32, i32) {
    %c0_i32 = arith.constant 0 : i32
    %c0_i32_0 = arith.constant 0 : i32
    %c0_i32_1 = arith.constant 0 : i32
    return %arg0, %c0_i32, %c0_i32_0 : i32, i32, i32
  }
  func.func @transform_7(%arg0: i32) -> (i32, i32, i32) {
    %c0_i32 = arith.constant 0 : i32
    %c0_i32_0 = arith.constant 0 : i32
    %c0_i32_1 = arith.constant 0 : i32
    %c0_i32_2 = arith.constant 0 : i32
    return %c0_i32, %c0_i32_0, %c0_i32_1 : i32, i32, i32
  }
}

</mosaic_0001>

<bundles_post_ra>
// kernel: self_attention_adj_forward.1
= control target key start
LH: loop header
LB: loop body
LE: loop exit
PB: predicated region body
PF: predicated region fallthrough
CT: control target
= control target key end

     0   :  { %13 = vsyncpa [#allocation3], 0  ;;  %s4531_s0 = inlined_call_operand.vmem [shape: f32[2,4,256], index: 0, kind: input, shape index: {}]   ;;  %s4532_s1 = inlined_call_operand.vmem [shape: f32[4,32], index: 1, kind: input, shape index: {}]   ;;  %s4533_s2 = inlined_call_operand.vmem [shape: f32[32,4], index: 2, kind: input, shape index: {}]   ;;  %s4534_s3 = inlined_call_operand.vmem [shape: f32[4,4], index: 3, kind: input, shape index: {}]   ;;  %s4535_s4 = inlined_call_operand.vmem [shape: f32[4,1], index: 4, kind: input, shape index: {}]   ;;  %s4536_s5 = inlined_call_operand.vmem [shape: f32[4,1], index: 5, kind: input, shape index: {}]   ;;  %s4537_s6 = inlined_call_operand.hbm [shape: f32[2,256,256], index: 6, kind: output, shape index: {0}]   ;;  %s4538_s7 = inlined_call_operand.vmem [shape: f32[2,4,256], index: 7, kind: output, shape index: {1}]  }
   0x1   :  { %15 = vsyncpa [#allocation3 + $0x1], 0  ;;  %s3207_s24 = smov 0   ;;  %s3209_s25 = smov 0  }
   0x2   :  { %s3211_s26 = smov 0   ;;  %s3213_s27 = smov 0  }
   0x3 LB: > { %s3228_s28 = sadd.s32 4294967295, %s3161_s27   ;;  %s2693_s29 = sadd.s32 4294967294, %s3161_s27   ;;  %s3161_s27 = sphi %s3213_s27, %s4556_s27   ;;  %s3157_s26 = sphi %s3211_s26, %s4555_s26   ;;  %s3153_s25 = sphi %s3209_s25, %s4554_s25   ;;  %s3149_s24 = sphi %s3207_s24, %s4553_s24  }
   0x4   : > { %s3232_s30 = sadd.s32 1, %s3161_s27   ;;  %s159_s8 = sadd.s32 1, %s3157_s26 }
   0x5   : > { %s156_s9 = ssub.s32 %s3161_s27, %s3232_s30  ;;  %p169_p0 = scmp.ne.s32.totalorder %s3157_s26, %s3153_s25 }
   0x6   : > { %p157_p1 = scmp.eq.s32.totalorder %s156_s9, 0  ;;  %p170_p2 = scmp.eq.s32.totalorder %s3228_s28, 1 }
   0x7   : > { %p175_p3 = scmp.ne.s32.totalorder %s3153_s25, %s3149_s24  ;;  %p176_p4 = scmp.eq.s32.totalorder %s2693_s29, 1 }
   0x8   : > { %s3243_s10 = scalar_select %p157_p1, %s3157_s26, %s159_s8  }
   0x9   : > { %p3245_p5 = por %p170_p2, %p169_p0  ;;  %p3249_p6 = por %p176_p4, %p175_p3 }
   0xa   : > { %p2696_p7 = scmp.ge.s32.totalorder %s3161_s27, 1  ;;  %p238_p8 = scmp.lt.s32.totalorder %s3161_s27, 3 }
   0xc   : > { %p239_p9 = pnand %p2696_p7, %p238_p8 }
   0xe   : > { %242 = sbr.rel (%p239_p9) target bundleno = 1904 (0x770), region = 44 }
  0x13   : > { %p270_p10 = scmp.lt.s32.totalorder %s3228_s28, 1  ;;  %v346_v3 = vld [vmem:[%s4532_s1] sm:$0xf]  ;;  %vm444_vm0 = vcmask 1043456   ;;  %vm347_vm1 = vcmask 31744   ;;  %v658_v12 = vld [vmem:[%s4533_s2 + $0x8] sm:$0xff] }
  0x14   : > { %2854 = vmatpush.msk.msra.mxu2 %vm444_vm0, %v346_v3  ;;  %2700 = vmatpush.msk.msra.mxu0 %vm444_vm0, %v346_v3  ;;  %v657_v10 = vld [vmem:[%s4533_s2] sm:$0xff]  ;;  %v659_v14 = vld [vmem:[%s4533_s2 + $0x10] sm:$0xff]  ;;  %v660_v16 = vld [vmem:[%s4533_s2 + $0x18] sm:$0xff]  ;;  %vm762_vm7 = vcmask 261120   ;;  %s265_s16 = sand.u32 1, %s3153_s25   ;;  %s2852_s19 = sshll.u32 %s3228_s28, 3 }
  0x15   : > { %s271_s13 = scalar_select %p270_p10, %s3228_s28, 1  ;;  %v2077_v26 = vld [vmem:[%s4534_s3] sm:$0xf] }
  0x16   : > { %s2491_s22 = scalar_lea.vmem %s4538_s7, %s2852_s19  ;;  %p2842_p11 = scmp.ne.s32.totalorder %s3228_s28, 1 }
  0x17   : > { %s2851_s14 = sshll.u32 %s271_s13, 3 }
  0x18   : > { %s274_s17 = scalar_lea.vmem %s4531_s0, %s2851_s14 }
  0x19   : > { %v275_v0 = vld [vmem:[%s274_s17] sm:$0xff]  ;;  %s2697_s17 = sshll.u32 %s265_s16, 9 }
  0x1a   : > { %277 = vst [vmem:[#allocation1] ss:$2 sm:$0xff] %v275_v0  ;;  %s4044_s18 = scalar_lea.vmem [#allocation2], %s2697_s17 }
  0x21   : > { %v279_v1 = vld.sshfl [vmem:[#allocation1 + $0x8] sm:$0xff pattern:$0x75316420]  ;;  %v278_v2 = vld.sshfl [vmem:[#allocation1] sm:$0xff pattern:$0x75316420] }
  0x22   : > { %314 = vxpose.xlu0.b32.start.end [1/1] (short) %v279_v1, 128  ;;  %661 = vst [vmem:[#allocation1] ss:$2 sm:$0xff] %v275_v0 }
  0x29   : > { %v662_v9 = vld.sshfl [vmem:[#allocation1] sm:$0xff pattern:$0x75316420]  ;;  %v663_v21 = vld.sshfl [vmem:[#allocation1 + $0x8] sm:$0xff pattern:$0x75316420] }
  0x2a   : > { %2733 = vmatpush.msk.msra.mxu1 %vm444_vm0, %v662_v9  ;;  %2738 = vmatpush.msk.msrb.mxu2 %vm444_vm0, %v663_v21 }
  0x2b   : > { %2734 = vmatmul.msk.f32.vlgmr.msra.gmra.mxu1 %vm347_vm1, %v657_v10 }
  0x33   : > { %2735 = vmatmul.msk.f32.gmra.mxu1 %vm347_vm1, %v658_v12 }
  0x3b   : > { %2736 = vmatmul.msk.f32.gmra.mxu1 %vm347_vm1, %v659_v14 }
  0x43   : > { %2737 = vmatmul.msk.f32.gmra.mxu1 %vm347_vm1, %v660_v16 }
  0xa2   : > { %282 = vxpose.xlu0.b32.start.end [1/1] (short) %v278_v2, 128 }
  0xa8   : > { %v697_v32 = vpop.f32.mrf.mxu1 }
  0xa9   : > { %v746_v50 = vmul.f32 0.01, %v697_v32  ;;  %vm738_vm5 = vcmp.ge.f32.partialorder %v697_v32, 0.0 }
  0xab   : > { %v754_v52 = vsel %vm738_vm5, %v697_v32, %v746_v50 }
  0xb0   : > { %v700_v35 = vpop.f32.mrf.mxu1 }
  0xb1   : > { %v748_v48 = vmul.f32 0.01, %v700_v35  ;;  %vm740_vm4 = vcmp.ge.f32.partialorder %v700_v35, 0.0 }
  0xb3   : > { %v756_v49 = vsel %vm740_vm4, %v700_v35, %v748_v48 }
  0xb8   : > { %v703_v38 = vpop.f32.mrf.mxu1 }
  0xb9   : > { %v750_v45 = vmul.f32 0.01, %v703_v38  ;;  %vm742_vm3 = vcmp.ge.f32.partialorder %v703_v38, 0.0 }
  0xbb   : > { %v758_v47 = vsel %vm742_vm3, %v703_v38, %v750_v45 }
  0xc0   : > { %v706_v41 = vpop.f32.mrf.mxu1 }
  0xc1   : > { %v752_v43 = vmul.f32 0.01, %v706_v41  ;;  %vm744_vm2 = vcmp.ge.f32.partialorder %v706_v41, 0.0 }
  0xc3   : > { %v760_v44 = vsel %vm744_vm2, %v706_v41, %v752_v43 }
  0xc4   : > { %871 = vmatpush.msrb.mxu1 %v760_v44  ;;  %2855 = vmatpush.msra.mxu3 %v760_v44 }
  0xc6   : > { %v3265_v4 = vpop.trf.xlu0  ;;  %872 = vmatpush.msrb.mxu1 %v758_v47  ;;  %2856 = vmatpush.msra.mxu3 %v758_v47 }
  0xc8   : > { %873 = vmatpush.msrb.mxu1 %v756_v49  ;;  %2857 = vmatpush.msra.mxu3 %v756_v49 }
  0xca   : > { %874 = vmatpush.msrb.mxu1 %v754_v52  ;;  %2858 = vmatpush.msra.mxu3 %v754_v52 }
  0xce   : > { %v3267_v5 = vpop.trf.xlu0 }
  0xd6   : > { %v3269_v6 = vpop.trf.xlu0 }
  0xde   : > { %v3271_v7 = vpop.trf.xlu0 }
  0xdf   : > { %2720 = vmatmul.msk.f32.vlgmr.msra.gmra.mxu2 %vm347_vm1, %v3271_v7 }
  0xe0   : > { %2807 = vmatpush.msk.msra.mxu2 %vm444_vm0, %v2077_v26 }
  0xe6   : > { %v3275_v8 = vpop.trf.xlu0 }
  0xe7   : > { %2721 = vmatmul.msk.f32.gmra.mxu2 %vm347_vm1, %v3275_v8 }
  0xee   : > { %v3284_v11 = vpop.trf.xlu0 }
  0xef   : > { %2722 = vmatmul.msk.f32.gmra.mxu2 %vm347_vm1, %v3284_v11 }
  0xf6   : > { %v3292_v13 = vpop.trf.xlu0 }
  0xf7   : > { %2723 = vmatmul.msk.f32.gmra.mxu2 %vm347_vm1, %v3292_v13 }
  0xfe   : > { %v3300_v15 = vpop.trf.xlu0 }
  0xff   : > { %2724 = vmatmul.msk.f32.gmra.mxu2 %vm347_vm1, %v3300_v15 }
 0x106   : > { %v3308_v17 = vpop.trf.xlu0 }
 0x107   : > { %2725 = vmatmul.msk.f32.gmra.mxu2 %vm347_vm1, %v3308_v17 }
 0x10e   : > { %v3312_v18 = vpop.trf.xlu0 }
 0x10f   : > { %2726 = vmatmul.msk.f32.gmra.mxu2 %vm347_vm1, %v3312_v18 }
 0x116   : > { %v3316_v19 = vpop.trf.xlu0 }
 0x117   : > { %2727 = vmatmul.msk.f32.gmra.mxu2 %vm347_vm1, %v3316_v19 }
 0x11e   : > { %v3320_v20 = vpop.trf.xlu0 }
 0x11f   : > { %2728 = vmatmul.msk.f32.gmra.mxu2 %vm347_vm1, %v3320_v20 }
 0x126   : > { %v3324_v22 = vpop.trf.xlu0 }
 0x127   : > { %2729 = vmatmul.msk.f32.gmra.mxu2 %vm347_vm1, %v3324_v22 }
 0x12e   : > { %v3329_v23 = vpop.trf.xlu0 }
 0x12f   : > { %2730 = vmatmul.msk.f32.gmra.mxu2 %vm347_vm1, %v3329_v23 }
 0x136   : > { %v3333_v24 = vpop.trf.xlu0 }
 0x137   : > { %2731 = vmatmul.msk.f32.gmra.mxu2 %vm347_vm1, %v3333_v24 }
 0x13e   : > { %v3337_v25 = vpop.trf.xlu0 }
 0x13f   : > { %2732 = vmatmul.msk.f32.gmra.mxu2 %vm347_vm1, %v3337_v25 }
 0x146   : > { %v298_v27 = vpop.trf.xlu0 }
 0x147   : > { %2701 = vmatmul.msk.f32.vlgmr.msra.gmra.mxu0 %vm347_vm1, %v298_v27  ;;  %2739 = vmatmul.msk.f32.vlgmr.msrb.gmra.mxu2 %vm347_vm1, %v657_v10 }
 0x14e   : > { %v299_v28 = vpop.trf.xlu0 }
 0x14f   : > { %2702 = vmatmul.msk.f32.gmra.mxu0 %vm347_vm1, %v299_v28  ;;  %2740 = vmatmul.msk.f32.gmra.mxu2 %vm347_vm1, %v658_v12 }
 0x156   : > { %v300_v29 = vpop.trf.xlu0 }
 0x157   : > { %2703 = vmatmul.msk.f32.gmra.mxu0 %vm347_vm1, %v300_v29  ;;  %2741 = vmatmul.msk.f32.gmra.mxu2 %vm347_vm1, %v659_v14 }
 0x15e   : > { %v301_v30 = vpop.trf.xlu0 }
 0x15f   : > { %2704 = vmatmul.msk.f32.gmra.mxu0 %vm347_vm1, %v301_v30  ;;  %2742 = vmatmul.msk.f32.gmra.mxu2 %vm347_vm1, %v660_v16 }
 0x162   : > { %v3353_v31 = vpop.f32.mrf.mxu2 }
 0x166   : > { %v302_v33 = vpop.trf.xlu0 }
 0x167   : > { %2705 = vmatmul.msk.f32.gmra.mxu0 %vm347_vm1, %v302_v33  ;;  %2808 = vmatmul.msk.f32.vlgmr.msra.gmra.mxu2 %vm347_vm1, %v298_v27 }
 0x16a   : > { %v3357_v34 = vpop.f32.mrf.mxu2 }
 0x16e   : > { %v303_v36 = vpop.trf.xlu0 }
 0x16f   : > { %2706 = vmatmul.msk.f32.gmra.mxu0 %vm347_vm1, %v303_v36  ;;  %2809 = vmatmul.msk.f32.gmra.mxu2 %vm347_vm1, %v299_v28 }
 0x172   : > { %v3361_v37 = vpop.f32.mrf.mxu2 }
 0x176   : > { %v304_v39 = vpop.trf.xlu0 }
 0x177   : > { %2707 = vmatmul.msk.f32.gmra.mxu0 %vm347_vm1, %v304_v39  ;;  %2810 = vmatmul.msk.f32.gmra.mxu2 %vm347_vm1, %v300_v29 }
 0x17a   : > { %v3365_v40 = vpop.f32.mrf.mxu2 }
 0x17e   : > { %v305_v42 = vpop.trf.xlu0 }
 0x17f   : > { %2708 = vmatmul.msk.f32.gmra.mxu0 %vm347_vm1, %v305_v42  ;;  %2811 = vmatmul.msk.f32.gmra.mxu2 %vm347_vm1, %v301_v30 }
 0x182   : > { %v3369_v46 = vpop.f32.mrf.mxu2 }
 0x186   : > { %v306_v51 = vpop.trf.xlu0 }
 0x187   : > { %2709 = vmatmul.msk.f32.gmra.mxu0 %vm347_vm1, %v306_v51  ;;  %2812 = vmatmul.msk.f32.gmra.mxu2 %vm347_vm1, %v302_v33 }
 0x18a   : > { %v3373_v53 = vpop.f32.mrf.mxu2 }
 0x18e   : > { %v307_v54 = vpop.trf.xlu0 }
 0x18f   : > { %2710 = vmatmul.msk.f32.gmra.mxu0 %vm347_vm1, %v307_v54  ;;  %2813 = vmatmul.msk.f32.gmra.mxu2 %vm347_vm1, %v303_v36 }
 0x192   : > { %v3377_v55 = vpop.f32.mrf.mxu2 }
 0x196   : > { %v308_v56 = vpop.trf.xlu0 }
 0x197   : > { %2711 = vmatmul.msk.f32.gmra.mxu0 %vm347_vm1, %v308_v56  ;;  %2814 = vmatmul.msk.f32.gmra.mxu2 %vm347_vm1, %v304_v39 }
 0x19a   : > { %v3381_v57 = vpop.f32.mrf.mxu2 }
 0x19e   : > { %v309_v58 = vpop.trf.xlu0 }
 0x19f   : > { %2712 = vmatmul.msk.f32.gmra.mxu0 %vm347_vm1, %v309_v58  ;;  %2815 = vmatmul.msk.f32.gmra.mxu2 %vm347_vm1, %v305_v42 }
 0x1a2   : > { %v3385_v59 = vpop.f32.mrf.mxu2 }
 0x1a6   : > { %v310_v60 = vpop.trf.xlu0 }
 0x1a7   : > { %2713 = vmatmul.msk.f32.gmra.mxu0 %vm347_vm1, %v310_v60  ;;  %2816 = vmatmul.msk.f32.gmra.mxu2 %vm347_vm1, %v306_v51 }
 0x1aa   : > { %v3389_v61 = vpop.f32.mrf.mxu2 }
 0x1ae   : > { %v311_v62 = vpop.trf.xlu0 }
 0x1af   : > { %2714 = vmatmul.msk.f32.gmra.mxu0 %vm347_vm1, %v311_v62  ;;  %2817 = vmatmul.msk.f32.gmra.mxu2 %vm347_vm1, %v307_v54 }
 0x1b2   : > { %v3393_v63 = vpop.f32.mrf.mxu2 }
 0x1b6   : > { %v312_v0 = vpop.trf.xlu0 }
 0x1b7   : > { %2715 = vmatmul.msk.f32.gmra.mxu0 %vm347_vm1, %v312_v0  ;;  %2818 = vmatmul.msk.f32.gmra.mxu2 %vm347_vm1, %v308_v56 }
 0x1ba   : > { %v3397_v1 = vpop.f32.mrf.mxu2 }
 0x1be   : > { %v313_v2 = vpop.trf.xlu0 }
 0x1bf   : > { %2716 = vmatmul.msk.f32.gmra.mxu0 %vm347_vm1, %v313_v2  ;;  %2819 = vmatmul.msk.f32.gmra.mxu2 %vm347_vm1, %v309_v58 }
 0x1c2   : > { %v3401_v3 = vpop.f32.mrf.mxu2 }
 0x1c4   : > { %v465_v9 = vpop.f32.mrf.mxu0 }
 0x1c5   : > { %v593_v10 = vmul.f32 0.01, %v465_v9  ;;  %vm561_vm6 = vcmp.ge.f32.partialorder %v465_v9, 0.0 }
 0x1c7   : > { %2717 = vmatmul.msk.f32.gmra.mxu0 %vm347_vm1, %v3265_v4  ;;  %2820 = vmatmul.msk.f32.gmra.mxu2 %vm347_vm1, %v310_v60  ;;  %v3406_v12 = vsel %vm561_vm6, %v465_v9, %v593_v10 }
 0x1c8   : > { %2743 = vmatmul.msk.f32.vlgmr.msrb.gmra.mxu1 %vm762_vm7, %v3406_v12 }
 0x1ca   : > { %v726_v14 = vpop.f32.mrf.mxu2 }
 0x1cb   : > { %v747_v47 = vmul.f32 0.01, %v726_v14  ;;  %vm739_vm15 = vcmp.ge.f32.partialorder %v726_v14, 0.0 }
 0x1cc   : > { %v468_v16 = vpop.f32.mrf.mxu0 }
 0x1cd   : > { %v594_v21 = vmul.f32 0.01, %v468_v16  ;;  %vm562_vm8 = vcmp.ge.f32.partialorder %v468_v16, 0.0  ;;  %v755_v52 = vsel %vm739_vm15, %v726_v14, %v747_v47 }
 0x1cf   : > { %2718 = vmatmul.msk.f32.gmra.mxu0 %vm347_vm1, %v3267_v5  ;;  %2821 = vmatmul.msk.f32.gmra.mxu2 %vm347_vm1, %v311_v62  ;;  %v3413_v26 = vsel %vm562_vm8, %v468_v16, %v594_v21 }
 0x1d0   : > { %2744 = vmatmul.msk.f32.gmra.mxu1 %vm762_vm7, %v3413_v26 }
 0x1d2   : > { %v729_v27 = vpop.f32.mrf.mxu2 }
 0x1d3   : > { %v749_v42 = vmul.f32 0.01, %v729_v27  ;;  %vm741_vm14 = vcmp.ge.f32.partialorder %v729_v27, 0.0 }
 0x1d4   : > { %v471_v28 = vpop.f32.mrf.mxu0 }
 0x1d5   : > { %v595_v29 = vmul.f32 0.01, %v471_v28  ;;  %vm563_vm9 = vcmp.ge.f32.partialorder %v471_v28, 0.0  ;;  %v757_v50 = vsel %vm741_vm14, %v729_v27, %v749_v42 }
 0x1d7   : > { %2719 = vmatmul.msk.f32.gmra.mxu0 %vm347_vm1, %v3269_v6  ;;  %2822 = vmatmul.msk.f32.gmra.mxu2 %vm347_vm1, %v312_v0  ;;  %v3420_v30 = vsel %vm563_vm9, %v471_v28, %v595_v29 }
 0x1d8   : > { %2745 = vmatmul.msk.f32.gmra.mxu1 %vm762_vm7, %v3420_v30 }
 0x1da   : > { %v732_v32 = vpop.f32.mrf.mxu2 }
 0x1db   : > { %v751_v38 = vmul.f32 0.01, %v732_v32  ;;  %vm743_vm12 = vcmp.ge.f32.partialorder %v732_v32, 0.0 }
 0x1dc   : > { %v474_v33 = vpop.f32.mrf.mxu0 }
 0x1dd   : > { %v596_v35 = vmul.f32 0.01, %v474_v33  ;;  %vm564_vm10 = vcmp.ge.f32.partialorder %v474_v33, 0.0  ;;  %v759_v48 = vsel %vm743_vm12, %v732_v32, %v751_v38 }
 0x1df   : > { %2823 = vmatmul.msk.f32.gmra.mxu2 %vm347_vm1, %v313_v2  ;;  %v3425_v36 = vsel %vm564_vm10, %v474_v33, %v596_v35 }
 0x1e0   : > { %2746 = vmatmul.msk.f32.gmra.mxu1 %vm762_vm7, %v3425_v36 }
 0x1e2   : > { %v735_v39 = vpop.f32.mrf.mxu2 }
 0x1e3   : > { %v753_v41 = vmul.f32 0.01, %v735_v39  ;;  %vm745_vm11 = vcmp.ge.f32.partialorder %v735_v39, 0.0 }
 0x1e4   : > { %v477_v43 = vpop.f32.mrf.mxu0 }
 0x1e5   : > { %v597_v44 = vmul.f32 0.01, %v477_v43  ;;  %v761_v45 = vsel %vm745_vm11, %v735_v39, %v753_v41  ;;  %vm565_vm13 = vcmp.ge.f32.partialorder %v477_v43, 0.0 }
 0x1e6   : > { %984 = vmatpush.msra.mxu1 %v761_v45 }
 0x1e7   : > { %2824 = vmatmul.msk.f32.gmra.mxu2 %vm347_vm1, %v3265_v4  ;;  %v3431_v49 = vsel %vm565_vm13, %v477_v43, %v597_v44 }
 0x1e8   : > { %2747 = vmatmul.msk.f32.gmra.mxu1 %vm762_vm7, %v3431_v49 }
 0x1e9   : > { %985 = vmatpush.msra.mxu1 %v759_v48 }
 0x1ea   : > { %v3435_v51 = vpop.f32.mrf.mxu2 }
 0x1eb   : > { %986 = vmatpush.msra.mxu1 %v757_v50 }
 0x1ec   : > { %v480_v54 = vpop.f32.mrf.mxu0 }
 0x1ed   : > { %v598_v56 = vmul.f32 0.01, %v480_v54  ;;  %987 = vmatpush.msra.mxu1 %v755_v52  ;;  %vm566_vm2 = vcmp.ge.f32.partialorder %v480_v54, 0.0 }
 0x1ef   : > { %2825 = vmatmul.msk.f32.gmra.mxu2 %vm347_vm1, %v3267_v5  ;;  %v3439_v4 = vsel %vm566_vm2, %v480_v54, %v598_v56 }
 0x1f0   : > { %2748 = vmatmul.msk.f32.gmra.mxu1 %vm762_vm7, %v3439_v4 }
 0x1f2   : > { %v3443_v58 = vpop.f32.mrf.mxu2 }
 0x1f4   : > { %v483_v60 = vpop.f32.mrf.mxu0 }
 0x1f5   : > { %v599_v62 = vmul.f32 0.01, %v483_v60  ;;  %vm567_vm3 = vcmp.ge.f32.partialorder %v483_v60, 0.0 }
 0x1f7   : > { %2826 = vmatmul.msk.f32.gmra.mxu2 %vm347_vm1, %v3269_v6  ;;  %v3447_v0 = vsel %vm567_vm3, %v483_v60, %v599_v62  ;;  %vm580_vm3 = vcmp.ge.f32.partialorder %v3353_v31, 0.0 }
 0x1f8   : > { %2749 = vmatmul.msk.f32.gmra.mxu1 %vm762_vm7, %v3447_v0 }
 0x1fa   : > { %v3451_v2 = vpop.f32.mrf.mxu2 }
 0x1fc   : > { %v486_v5 = vpop.f32.mrf.mxu0 }
 0x1fd   : > { %v600_v9 = vmul.f32 0.01, %v486_v5  ;;  %vm568_vm4 = vcmp.ge.f32.partialorder %v486_v5, 0.0 }
 0x1ff   : > { %2827 = vmatmul.msk.f32.gmra.mxu2 %vm347_vm1, %v3271_v7  ;;  %v3455_v10 = vsel %vm568_vm4, %v486_v5, %v600_v9  ;;  %vm581_vm4 = vcmp.ge.f32.partialorder %v3357_v34, 0.0 }
 0x200   : > { %2750 = vmatmul.msk.f32.gmra.mxu1 %vm762_vm7, %v3455_v10 }
 0x202   : > { %v3459_v14 = vpop.f32.mrf.mxu2 }
 0x204   : > { %v489_v6 = vpop.f32.mrf.mxu0 }
 0x205   : > { %v601_v16 = vmul.f32 0.01, %v489_v6  ;;  %vm569_vm5 = vcmp.ge.f32.partialorder %v489_v6, 0.0 }
 0x207   : > { %2828 = vmatmul.msk.f32.gmra.mxu2 %vm347_vm1, %v3275_v8  ;;  %v3463_v21 = vsel %vm569_vm5, %v489_v6, %v601_v16  ;;  %vm583_vm5 = vcmp.ge.f32.partialorder %v3365_v40, 0.0 }
 0x208   : > { %2751 = vmatmul.msk.f32.gmra.mxu1 %vm762_vm7, %v3463_v21 }
 0x20a   : > { %v3467_v27 = vpop.f32.mrf.mxu2 }
 0x20c   : > { %v492_v7 = vpop.f32.mrf.mxu0 }
 0x20d   : > { %v602_v28 = vmul.f32 0.01, %v492_v7  ;;  %vm570_vm6 = vcmp.ge.f32.partialorder %v492_v7, 0.0 }
 0x20f   : > { %2829 = vmatmul.msk.f32.gmra.mxu2 %vm347_vm1, %v3284_v11  ;;  %v3471_v29 = vsel %vm570_vm6, %v492_v7, %v602_v28  ;;  %vm584_vm6 = vcmp.ge.f32.partialorder %v3369_v46, 0.0 }
 0x210   : > { %2752 = vmatmul.msk.f32.gmra.mxu1 %vm762_vm7, %v3471_v29 }
 0x212   : > { %v3475_v32 = vpop.f32.mrf.mxu2 }
 0x214   : > { %v495_v8 = vpop.f32.mrf.mxu0 }
 0x215   : > { %v603_v33 = vmul.f32 0.01, %v495_v8  ;;  %vm571_vm8 = vcmp.ge.f32.partialorder %v495_v8, 0.0 }
 0x217   : > { %2830 = vmatmul.msk.f32.gmra.mxu2 %vm347_vm1, %v3292_v13  ;;  %v3479_v35 = vsel %vm571_vm8, %v495_v8, %v603_v33  ;;  %vm585_vm8 = vcmp.ge.f32.partialorder %v3373_v53, 0.0 }
 0x218   : > { %2753 = vmatmul.msk.f32.gmra.mxu1 %vm762_vm7, %v3479_v35 }
 0x21a   : > { %v3483_v38 = vpop.f32.mrf.mxu2 }
 0x21c   : > { %v498_v11 = vpop.f32.mrf.mxu0 }
 0x21d   : > { %v604_v39 = vmul.f32 0.01, %v498_v11  ;;  %vm572_vm9 = vcmp.ge.f32.partialorder %v498_v11, 0.0 }
 0x21f   : > { %2831 = vmatmul.msk.f32.gmra.mxu2 %vm347_vm1, %v3300_v15  ;;  %v3487_v41 = vsel %vm572_vm9, %v498_v11, %v604_v39  ;;  %vm586_vm9 = vcmp.ge.f32.partialorder %v3377_v55, 0.0 }
 0x220   : > { %2754 = vmatmul.msk.f32.gmra.mxu1 %vm762_vm7, %v3487_v41 }
 0x222   : > { %v3491_v42 = vpop.f32.mrf.mxu2 }
 0x224   : > { %v501_v13 = vpop.f32.mrf.mxu0 }
 0x225   : > { %v605_v43 = vmul.f32 0.01, %v501_v13  ;;  %vm573_vm10 = vcmp.ge.f32.partialorder %v501_v13, 0.0 }
 0x227   : > { %2832 = vmatmul.msk.f32.gmra.mxu2 %vm347_vm1, %v3308_v17  ;;  %v3495_v44 = vsel %vm573_vm10, %v501_v13, %v605_v43  ;;  %v613_v13 = vmul.f32 0.01, %v3357_v34  ;;  %vm587_vm10 = vcmp.ge.f32.partialorder %v3381_v57, 0.0 }
 0x228   : > { %2755 = vmatmul.msk.f32.gmra.mxu1 %vm762_vm7, %v3495_v44 }
 0x22a   : > { %v3499_v45 = vpop.f32.mrf.mxu2 }
 0x22c   : > { %v504_v15 = vpop.f32.mrf.mxu0 }
 0x22d   : > { %v606_v47 = vmul.f32 0.01, %v504_v15  ;;  %vm574_vm11 = vcmp.ge.f32.partialorder %v504_v15, 0.0 }
 0x22f   : > { %2833 = vmatmul.msk.f32.gmra.mxu2 %vm347_vm1, %v3312_v18  ;;  %v3503_v48 = vsel %vm574_vm11, %v504_v15, %v606_v47  ;;  %v615_v47 = vmul.f32 0.01, %v3365_v40  ;;  %vm588_vm11 = vcmp.ge.f32.partialorder %v3385_v59, 0.0 }
 0x230   : > { %2756 = vmatmul.msk.f32.gmra.mxu1 %vm762_vm7, %v3503_v48 }
 0x232   : > { %v3507_v50 = vpop.f32.mrf.mxu2 }
 0x234   : > { %v507_v17 = vpop.f32.mrf.mxu0 }
 0x235   : > { %v607_v52 = vmul.f32 0.01, %v507_v17  ;;  %vm575_vm12 = vcmp.ge.f32.partialorder %v507_v17, 0.0 }
 0x237   : > { %2834 = vmatmul.msk.f32.gmra.mxu2 %vm347_vm1, %v3316_v19  ;;  %v3511_v54 = vsel %vm575_vm12, %v507_v17, %v607_v52  ;;  %vm589_vm12 = vcmp.ge.f32.partialorder %v3389_v61, 0.0 }
 0x238   : > { %2757 = vmatmul.msk.f32.vlgmr.msra.gmra.mxu3 %vm762_vm7, %v3511_v54  ;;  %2775 = vmatmul.msk.f32.vlgmr.msra.gmra.mxu1 %vm762_vm7, %v3406_v12 }
 0x23a   : > { %v2128_v18 = vpop.f32.mrf.mxu2 }
 0x23c   : > { %v510_v56 = vpop.f32.mrf.mxu0 }
 0x23d   : > { %v608_v60 = vmul.f32 0.01, %v510_v56  ;;  %vm576_vm13 = vcmp.ge.f32.partialorder %v510_v56, 0.0 }
 0x23f   : > { %2835 = vmatmul.msk.f32.gmra.mxu2 %vm347_vm1, %v3320_v20  ;;  %v3519_v62 = vsel %vm576_vm13, %v510_v56, %v608_v60  ;;  %vm590_vm13 = vcmp.ge.f32.partialorder %v3393_v63, 0.0 }
 0x240   : > { %2758 = vmatmul.msk.f32.gmra.mxu3 %vm762_vm7, %v3519_v62  ;;  %2776 = vmatmul.msk.f32.gmra.mxu1 %vm762_vm7, %v3413_v26 }
 0x242   : > { %v2131_v19 = vpop.f32.mrf.mxu2 }
 0x244   : > { %v513_v5 = vpop.f32.mrf.mxu0 }
 0x245   : > { %v609_v9 = vmul.f32 0.01, %v513_v5  ;;  %v3525_v6 = vpop.f32.mrf.mxu1  ;;  %vm577_vm14 = vcmp.ge.f32.partialorder %v513_v5, 0.0 }
 0x247   : > { %2836 = vmatmul.msk.f32.gmra.mxu2 %vm347_vm1, %v3324_v22  ;;  %v3529_v12 = vsel %vm577_vm14, %v513_v5, %v609_v9  ;;  %v623_v5 = vmul.f32 0.01, %v3397_v1  ;;  %vm591_vm14 = vcmp.ge.f32.partialorder %v3397_v1, 0.0 }
 0x248   : > { %2759 = vmatmul.msk.f32.gmra.mxu3 %vm762_vm7, %v3529_v12  ;;  %2777 = vmatmul.msk.f32.gmra.mxu1 %vm762_vm7, %v3420_v30 }
 0x24a   : > { %v2134_v20 = vpop.f32.mrf.mxu2 }
 0x24c   : > { %v516_v16 = vpop.f32.mrf.mxu0 }
 0x24d   : > { %v610_v26 = vmul.f32 0.01, %v516_v16  ;;  %v3535_v7 = vpop.f32.mrf.mxu1  ;;  %vm578_vm15 = vcmp.ge.f32.partialorder %v516_v16, 0.0 }
 0x24f   : > { %2837 = vmatmul.msk.f32.gmra.mxu2 %vm347_vm1, %v3329_v23  ;;  %v3539_v28 = vsel %vm578_vm15, %v516_v16, %v610_v26  ;;  %vm592_vm15 = vcmp.ge.f32.partialorder %v3401_v3, 0.0 }
 0x250   : > { %2760 = vmatmul.msk.f32.gmra.mxu3 %vm762_vm7, %v3539_v28  ;;  %2778 = vmatmul.msk.f32.gmra.mxu1 %vm762_vm7, %v3425_v36  ;;  %v612_v36 = vmul.f32 0.01, %v3353_v31 }
 0x252   : > { %v2137_v22 = vpop.f32.mrf.mxu2 }
 0x254   : > { %v519_v8 = vpop.f32.mrf.mxu0 }
 0x255   : > { %v611_v30 = vmul.f32 0.01, %v519_v8  ;;  %v3545_v33 = vpop.f32.mrf.mxu1  ;;  %vm579_vm2 = vcmp.ge.f32.partialorder %v519_v8, 0.0 }
 0x257   : > { %2838 = vmatmul.msk.f32.gmra.mxu2 %vm347_vm1, %v3333_v24  ;;  %v3549_v11 = vsel %vm579_vm2, %v519_v8, %v611_v30  ;;  %v3562_v24 = vsel %vm580_vm3, %v3353_v31, %v612_v36 }
 0x258   : > { %2761 = vmatmul.msk.f32.gmra.mxu3 %vm762_vm7, %v3549_v11  ;;  %2779 = vmatmul.msk.f32.gmra.mxu1 %vm762_vm7, %v3431_v49 }
 0x25a   : > { %v2140_v23 = vpop.f32.mrf.mxu2 }
 0x25d   : > { %v3557_v39 = vpop.f32.mrf.mxu1 }
 0x25f   : > { %2839 = vmatmul.msk.f32.gmra.mxu2 %vm347_vm1, %v3337_v25  ;;  %v3573_v25 = vsel %vm581_vm4, %v3357_v34, %v613_v13  ;;  %vm582_vm1 = vcmp.ge.f32.partialorder %v3361_v37, 0.0 }
 0x260   : > { %2762 = vmatmul.msk.f32.gmra.mxu3 %vm762_vm7, %v3562_v24  ;;  %2780 = vmatmul.msk.f32.gmra.mxu1 %vm762_vm7, %v3439_v4  ;;  %v614_v4 = vmul.f32 0.01, %v3361_v37 }
 0x262   : > { %v2143_v49 = vpop.f32.mrf.mxu2  ;;  %v3587_v34 = vsel %vm582_vm1, %v3361_v37, %v614_v4  ;;  %v3604_v37 = vsel %vm583_vm5, %v3365_v40, %v615_v47 }
 0x263   : > { %2194 = vmatpush.msrb.mxu0 %v2143_v49 }
 0x265   : > { %v3570_v43 = vpop.f32.mrf.mxu1  ;;  %2195 = vmatpush.msrb.mxu0 %v2140_v23 }
 0x267   : > { %2196 = vmatpush.msrb.mxu0 %v2137_v22 }
 0x268   : > { %2763 = vmatmul.msk.f32.gmra.mxu3 %vm762_vm7, %v3573_v25  ;;  %2781 = vmatmul.msk.f32.gmra.mxu1 %vm762_vm7, %v3447_v0 }
 0x269   : > { %2197 = vmatpush.msrb.mxu0 %v2134_v20  ;;  %v3711_v20 = vsel %vm591_vm14, %v3397_v1, %v623_v5 }
 0x26a   : > { %v3579_v31 = vpop.f32.mrf.mxu2 }
 0x26b   : > { %2198 = vmatpush.msrb.mxu0 %v2131_v19 }
 0x26d   : > { %v3583_v15 = vpop.f32.mrf.mxu1  ;;  %2199 = vmatpush.msrb.mxu0 %v2128_v18 }
 0x26f   : > { %2200 = vmatpush.msrb.mxu0 %v3507_v50 }
 0x270   : > { %2764 = vmatmul.msk.f32.gmra.mxu3 %vm762_vm7, %v3587_v34  ;;  %2782 = vmatmul.msk.f32.gmra.mxu1 %vm762_vm7, %v3455_v10 }
 0x271   : > { %2201 = vmatpush.msrb.mxu0 %v3499_v45 }
 0x272   : > { %v3594_v0 = vpop.f32.mrf.mxu2 }
 0x273   : > { %2202 = vmatpush.msrb.mxu0 %v3491_v42  ;;  %v616_v42 = vmul.f32 0.01, %v3369_v46 }
 0x275   : > { %v3599_v50 = vpop.f32.mrf.mxu1  ;;  %2203 = vmatpush.msrb.mxu0 %v3483_v38  ;;  %v3621_v40 = vsel %vm584_vm6, %v3369_v46, %v616_v42 }
 0x277   : > { %2204 = vmatpush.msrb.mxu0 %v3475_v32 }
 0x278   : > { %2765 = vmatmul.msk.f32.gmra.mxu3 %vm762_vm7, %v3604_v37  ;;  %2783 = vmatmul.msk.f32.gmra.mxu1 %vm762_vm7, %v3463_v21  ;;  %v617_v21 = vmul.f32 0.01, %v3373_v53 }
 0x279   : > { %2205 = vmatpush.msrb.mxu0 %v3467_v27 }
 0x27a   : > { %v3611_v10 = vpop.f32.mrf.mxu2 }
 0x27b   : > { %2206 = vmatpush.msrb.mxu0 %v3459_v14 }
 0x27d   : > { %v3616_v32 = vpop.f32.mrf.mxu1  ;;  %2207 = vmatpush.msrb.mxu0 %v3451_v2 }
 0x27f   : > { %2208 = vmatpush.msrb.mxu0 %v3443_v58  ;;  %v3635_v58 = vsel %vm585_vm8, %v3373_v53, %v617_v21 }
 0x280   : > { %2766 = vmatmul.msk.f32.gmra.mxu3 %vm762_vm7, %v3621_v40  ;;  %2784 = vmatmul.msk.f32.gmra.mxu1 %vm762_vm7, %v3471_v29 }
 0x281   : > { %2209 = vmatpush.msrb.mxu0 %v3435_v51  ;;  %v618_v51 = vmul.f32 0.01, %v3377_v55 }
 0x282   : > { %v3628_v14 = vpop.f32.mrf.mxu2 }
 0x283   : > { %v3648_v29 = vsel %vm586_vm9, %v3377_v55, %v618_v51 }
 0x285   : > { %v3632_v2 = vpop.f32.mrf.mxu1 }
 0x288   : > { %2767 = vmatmul.msk.f32.gmra.mxu3 %vm762_vm7, %v3635_v58  ;;  %2785 = vmatmul.msk.f32.gmra.mxu1 %vm762_vm7, %v3479_v35  ;;  %v619_v35 = vmul.f32 0.01, %v3381_v57 }
 0x28a   : > { %v3641_v46 = vpop.f32.mrf.mxu2  ;;  %v3661_v45 = vsel %vm587_vm10, %v3381_v57, %v619_v35 }
 0x28d   : > { %v3645_v27 = vpop.f32.mrf.mxu1 }
 0x290   : > { %2768 = vmatmul.msk.f32.gmra.mxu3 %vm762_vm7, %v3648_v29  ;;  %2786 = vmatmul.msk.f32.gmra.mxu1 %vm762_vm7, %v3487_v41  ;;  %v620_v41 = vmul.f32 0.01, %v3385_v59 }
 0x292   : > { %v3654_v53 = vpop.f32.mrf.mxu2  ;;  %v3674_v52 = vsel %vm588_vm11, %v3385_v59, %v620_v41 }
 0x295   : > { %v3658_v38 = vpop.f32.mrf.mxu1 }
 0x298   : > { %2769 = vmatmul.msk.f32.gmra.mxu3 %vm762_vm7, %v3661_v45  ;;  %2787 = vmatmul.msk.f32.gmra.mxu1 %vm762_vm7, %v3495_v44  ;;  %v621_v44 = vmul.f32 0.01, %v3389_v61 }
 0x29a   : > { %v3667_v55 = vpop.f32.mrf.mxu2  ;;  %v3687_v56 = vsel %vm589_vm12, %v3389_v61, %v621_v44 }
 0x29d   : > { %v3671_v17 = vpop.f32.mrf.mxu1 }
 0x2a0   : > { %2770 = vmatmul.msk.f32.gmra.mxu3 %vm762_vm7, %v3674_v52  ;;  %2788 = vmatmul.msk.f32.gmra.mxu1 %vm762_vm7, %v3503_v48  ;;  %v622_v48 = vmul.f32 0.01, %v3393_v63 }
 0x2a2   : > { %v3680_v57 = vpop.f32.mrf.mxu2  ;;  %v3698_v19 = vsel %vm590_vm13, %v3393_v63, %v622_v48 }
 0x2a5   : > { %v3684_v18 = vpop.f32.mrf.mxu1 }
 0x2a8   : > { %2771 = vmatmul.msk.f32.gmra.mxu3 %vm762_vm7, %v3687_v56  ;;  %2789 = vmatmul.msk.f32.gmra.mxu1 %vm762_vm7, %v3511_v54 }
 0x2aa   : > { %v2170_v59 = vpop.f32.mrf.mxu2 }
 0x2ad   : > { %v3695_v60 = vpop.f32.mrf.mxu1 }
 0x2b0   : > { %2772 = vmatmul.msk.f32.gmra.mxu3 %vm762_vm7, %v3698_v19  ;;  %2790 = vmatmul.msk.f32.gmra.mxu1 %vm762_vm7, %v3519_v62  ;;  %v624_v62 = vmul.f32 0.01, %v3401_v3 }
 0x2b2   : > { %v2173_v61 = vpop.f32.mrf.mxu2  ;;  %v3724_v1 = vsel %vm592_vm15, %v3401_v3, %v624_v62 }
 0x2b5   : > { %v3706_v54 = vpop.f32.mrf.mxu1 }
 0x2b6   : > { %v1085_v9 = vmax.f32 %v3525_v6, %v3706_v54 }
 0x2b8   : > { %2773 = vmatmul.msk.f32.gmra.mxu3 %vm762_vm7, %v3711_v20  ;;  %2791 = vmatmul.msk.f32.gmra.mxu1 %vm762_vm7, %v3529_v12 }
 0x2b9   : > { %1086 = vmax.xlane.f32.xlu1 %v1085_v9 }
 0x2ba   : > { %v2176_v63 = vpop.f32.mrf.mxu2 }
 0x2bd   : > { %v3719_v16 = vpop.f32.mrf.mxu1 }
 0x2be   : > { %v1088_v26 = vmax.f32 %v3535_v7, %v3719_v16 }
 0x2c0   : > { %2774 = vmatmul.msk.f32.gmra.mxu3 %vm762_vm7, %v3724_v1  ;;  %2792 = vmatmul.msk.f32.gmra.mxu1 %vm762_vm7, %v3539_v28 }
 0x2c1   : > { %1089 = vmax.xlane.f32.xlu1 %v1088_v26 }
 0x2c2   : > { %v2179_v12 = vpop.f32.mrf.mxu2 }
 0x2c5   : > { %v3730_v22 = vpop.f32.mrf.mxu1 }
 0x2c6   : > { %v1091_v8 = vmax.f32 %v3545_v33, %v3730_v22 }
 0x2c8   : > { %2793 = vmatmul.msk.f32.gmra.mxu1 %vm762_vm7, %v3549_v11  ;;  %1092 = vmax.xlane.f32.xlu2 %v1091_v8 }
 0x2ca   : > { %v2182_v30 = vpop.f32.mrf.mxu2 }
 0x2cd   : > { %v3736_v3 = vpop.f32.mrf.mxu1 }
 0x2ce   : > { %v1094_v23 = vmax.f32 %v3557_v39, %v3736_v3 }
 0x2d0   : > { %2794 = vmatmul.msk.f32.gmra.mxu1 %vm762_vm7, %v3562_v24  ;;  %1095 = vmax.xlane.f32.xlu2 %v1094_v23 }
 0x2d2   : > { %v2185_v28 = vpop.f32.mrf.mxu2 }
 0x2d5   : > { %v3742_v36 = vpop.f32.mrf.mxu1 }
 0x2d6   : > { %v1097_v49 = vmax.f32 %v3570_v43, %v3742_v36 }
 0x2d8   : > { %2795 = vmatmul.msk.f32.gmra.mxu1 %vm762_vm7, %v3573_v25  ;;  %1098 = vmax.xlane.f32.xlu1 %v1097_v49 }
 0x2da   : > { %v2188_v11 = vpop.f32.mrf.mxu2 }
 0x2dd   : > { %v3748_v13 = vpop.f32.mrf.mxu1 }
 0x2de   : > { %v1100_v4 = vmax.f32 %v3583_v15, %v3748_v13 }
 0x2e0   : > { %2796 = vmatmul.msk.f32.gmra.mxu1 %vm762_vm7, %v3587_v34  ;;  %1101 = vmax.xlane.f32.xlu2 %v1100_v4 }
 0x2e2   : > { %v2191_v24 = vpop.f32.mrf.mxu2 }
 0x2e3   : > { %2307 = vmatpush.msrb.mxu3 %v2191_v24 }
 0x2e5   : > { %v3754_v47 = vpop.f32.mrf.mxu1  ;;  %2308 = vmatpush.msrb.mxu3 %v2188_v11 }
 0x2e6   : > { %v1103_v42 = vmax.f32 %v3599_v50, %v3754_v47 }
 0x2e7   : > { %2309 = vmatpush.msrb.mxu3 %v2185_v28 }
 0x2e8   : > { %2797 = vmatmul.msk.f32.gmra.mxu1 %vm762_vm7, %v3604_v37  ;;  %1104 = vmax.xlane.f32.xlu1 %v1103_v42 }
 0x2e9   : > { %2310 = vmatpush.msrb.mxu3 %v2182_v30 }
 0x2eb   : > { %2311 = vmatpush.msrb.mxu3 %v2179_v12 }
 0x2ed   : > { %v3760_v25 = vpop.f32.mrf.mxu1  ;;  %2312 = vmatpush.msrb.mxu3 %v2176_v63 }
 0x2ee   : > { %v1106_v34 = vmax.f32 %v3616_v32, %v3760_v25 }
 0x2ef   : > { %2313 = vmatpush.msrb.mxu3 %v2173_v61 }
 0x2f0   : > { %2798 = vmatmul.msk.f32.gmra.mxu1 %vm762_vm7, %v3621_v40  ;;  %1107 = vmax.xlane.f32.xlu1 %v1106_v34 }
 0x2f1   : > { %2314 = vmatpush.msrb.mxu3 %v2170_v59 }
 0x2f3   : > { %2315 = vmatpush.msrb.mxu3 %v3680_v57 }
 0x2f5   : > { %v3767_v21 = vpop.f32.mrf.mxu1  ;;  %2316 = vmatpush.msrb.mxu3 %v3667_v55 }
 0x2f6   : > { %v1109_v37 = vmax.f32 %v3632_v2, %v3767_v21 }
 0x2f7   : > { %2317 = vmatpush.msrb.mxu3 %v3654_v53 }
 0x2f8   : > { %2799 = vmatmul.msk.f32.gmra.mxu1 %vm762_vm7, %v3635_v58  ;;  %1110 = vmax.xlane.f32.xlu1 %v1109_v37 }
 0x2f9   : > { %2318 = vmatpush.msrb.mxu3 %v3641_v46 }
 0x2fb   : > { %2319 = vmatpush.msrb.mxu3 %v3628_v14 }
 0x2fd   : > { %v3777_v40 = vpop.f32.mrf.mxu1  ;;  %2320 = vmatpush.msrb.mxu3 %v3611_v10 }
 0x2fe   : > { %v1112_v51 = vmax.f32 %v3645_v27, %v3777_v40 }
 0x2ff   : > { %2321 = vmatpush.msrb.mxu3 %v3594_v0 }
 0x300   : > { %2800 = vmatmul.msk.f32.gmra.mxu1 %vm762_vm7, %v3648_v29  ;;  %1113 = vmax.xlane.f32.xlu1 %v1112_v51  ;;  %v3804_v29 = vpop.f32.mrf.mxu3 }
 0x301   : > { %2322 = vmatpush.msrb.mxu3 %v3579_v31 }
 0x305   : > { %v3786_v58 = vpop.f32.mrf.mxu1 }
 0x306   : > { %v1115_v14 = vmax.f32 %v3658_v38, %v3786_v58 }
 0x308   : > { %2801 = vmatmul.msk.f32.gmra.mxu1 %vm762_vm7, %v3661_v45  ;;  %1116 = vmax.xlane.f32.xlu1 %v1115_v14  ;;  %v3812_v45 = vpop.f32.mrf.mxu3 }
 0x30d   : > { %v3792_v10 = vpop.f32.mrf.mxu1 }
 0x30e   : > { %v1118_v0 = vmax.f32 %v3671_v17, %v3792_v10 }
 0x310   : > { %2802 = vmatmul.msk.f32.gmra.mxu1 %vm762_vm7, %v3674_v52  ;;  %1119 = vmax.xlane.f32.xlu1 %v1118_v0  ;;  %v3820_v57 = vpop.f32.mrf.mxu3 }
 0x315   : > { %v3798_v46 = vpop.f32.mrf.mxu1 }
 0x316   : > { %v1121_v31 = vmax.f32 %v3684_v18, %v3798_v46 }
 0x318   : > { %2803 = vmatmul.msk.f32.gmra.mxu1 %vm762_vm7, %v3687_v56  ;;  %1122 = vmax.xlane.f32.xlu1 %v1121_v31  ;;  %v3838_v62 = vpop.f32.mrf.mxu3 }
 0x31d   : > { %v3806_v53 = vpop.f32.mrf.mxu1 }
 0x31e   : > { %v1124_v35 = vmax.f32 %v3695_v60, %v3806_v53 }
 0x320   : > { %2804 = vmatmul.msk.f32.gmra.mxu1 %vm762_vm7, %v3698_v19  ;;  %1125 = vmax.xlane.f32.xlu1 %v1124_v35  ;;  %v3854_v42 = vpop.f32.mrf.mxu3 }
 0x325   : > { %v3814_v55 = vpop.f32.mrf.mxu1 }
 0x326   : > { %v1127_v41 = vmax.f32 %v3804_v29, %v3814_v55 }
 0x328   : > { %2805 = vmatmul.msk.f32.gmra.mxu1 %vm762_vm7, %v3711_v20  ;;  %1128 = vmax.xlane.f32.xlu1 %v1127_v41 }
 0x32c   : > { %v1087_v52 = vpop.xlane.xlu1 %1086 }
 0x32d   : > { %v1181_v44 = vsub.f32 %v3525_v6, %v1087_v52  ;;  %v1182_v56 = vsub.f32 %v3706_v54, %v1087_v52  ;;  %v3824_v59 = vpop.f32.mrf.mxu1 }
 0x32e   : > { %v1130_v48 = vmax.f32 %v3812_v45, %v3824_v59 }
 0x32f   : > { %v1245_v19 = vmul.f32 1.442695, %v1181_v44  ;;  %v1247_v61 = vmul.f32 1.442695, %v1182_v56 }
 0x330   : > { %2806 = vmatmul.msk.f32.gmra.mxu1 %vm762_vm7, %v3724_v1  ;;  %1131 = vmax.xlane.f32.xlu1 %v1130_v48 }
 0x331   : > { %2903 = vpow2.f32 %v1245_v19 }
 0x332   : > { %2905 = vpow2.f32 %v1247_v61 }
 0x334   : > { %v1090_v5 = vpop.xlane.xlu1 %1089 }
 0x335   : > { %v1183_v9 = vsub.f32 %v3535_v7, %v1090_v5  ;;  %v1184_v6 = vsub.f32 %v3719_v16, %v1090_v5  ;;  %v3832_v20 = vpop.f32.mrf.mxu1 }
 0x336   : > { %v1133_v54 = vmax.f32 %v3820_v57, %v3832_v20 }
 0x337   : > { %v3836_v63 = vpop.eup %2903  ;;  %v1249_v26 = vmul.f32 1.442695, %v1183_v9  ;;  %v1251_v12 = vmul.f32 1.442695, %v1184_v6 }
 0x338   : > { %v3840_v1 = vpop.eup %2905  ;;  %1134 = vmax.xlane.f32.xlu1 %v1133_v54 }
 0x339   : > { %2907 = vpow2.f32 %v1249_v26  ;;  %v1373_v7 = vadd.f32 %v3840_v1, %v3836_v63 }
 0x33a   : > { %2909 = vpow2.f32 %v1251_v12 }
 0x33b   : > { %1374 = vadd.xlane.f32.xlu2 %v1373_v7  ;;  %v1093_v16 = vpop.xlane.xlu2 %1092 }
 0x33c   : > { %v1185_v8 = vsub.f32 %v3545_v33, %v1093_v16  ;;  %v1186_v30 = vsub.f32 %v3730_v22, %v1093_v16 }
 0x33d   : > { %v3846_v23 = vpop.f32.mrf.mxu1 }
 0x33e   : > { %v1253_v28 = vmul.f32 1.442695, %v1185_v8  ;;  %v1255_v49 = vmul.f32 1.442695, %v1186_v30  ;;  %v1136_v11 = vmax.f32 %v3838_v62, %v3846_v23 }
 0x33f   : > { %v3850_v4 = vpop.eup %2907 }
 0x340   : > { %v3852_v24 = vpop.eup %2909  ;;  %2911 = vpow2.f32 %v1253_v28  ;;  %1137 = vmax.xlane.f32.xlu1 %v1136_v11 }
 0x341   : > { %2913 = vpow2.f32 %v1255_v49  ;;  %v1376_v33 = vadd.f32 %v3852_v24, %v3850_v4 }
 0x343   : > { %1377 = vadd.xlane.f32.xlu2 %v1376_v33  ;;  %v1096_v22 = vpop.xlane.xlu2 %1095 }
 0x344   : > { %v1187_v34 = vsub.f32 %v3557_v39, %v1096_v22  ;;  %v1188_v37 = vsub.f32 %v3736_v3, %v1096_v22  ;;  %v3870_v39 = vpop.f32.mrf.mxu3 }
 0x345   : > { %v3860_v51 = vpop.f32.mrf.mxu1 }
 0x346   : > { %v3862_v14 = vpop.eup %2911  ;;  %v1257_v0 = vmul.f32 1.442695, %v1187_v34  ;;  %v1259_v31 = vmul.f32 1.442695, %v1188_v37  ;;  %v1139_v35 = vmax.f32 %v3854_v42, %v3860_v51 }
 0x347   : > { %v3866_v41 = vpop.eup %2913 }
 0x348   : > { %2915 = vpow2.f32 %v1257_v0  ;;  %1140 = vmax.xlane.f32.xlu1 %v1139_v35  ;;  %v1379_v52 = vadd.f32 %v3866_v41, %v3862_v14 }
 0x349   : > { %2917 = vpow2.f32 %v1259_v31 }
 0x34b   : > { %1380 = vadd.xlane.f32.xlu2 %v1379_v52  ;;  %v1099_v3 = vpop.xlane.xlu1 %1098 }
 0x34c   : > { %v1189_v44 = vsub.f32 %v3570_v43, %v1099_v3  ;;  %v1190_v56 = vsub.f32 %v3742_v36, %v1099_v3  ;;  %v3886_v12 = vpop.f32.mrf.mxu3 }
 0x34d   : > { %v3874_v48 = vpop.f32.mrf.mxu1 }
 0x34e   : > { %v3876_v19 = vpop.eup %2915  ;;  %v1261_v61 = vmul.f32 1.442695, %v1189_v44  ;;  %v1263_v5 = vmul.f32 1.442695, %v1190_v56  ;;  %v1142_v9 = vmax.f32 %v3870_v39, %v3874_v48 }
 0x34f   : > { %v3880_v6 = vpop.eup %2917 }
 0x350   : > { %2919 = vpow2.f32 %v1261_v61  ;;  %1143 = vmax.xlane.f32.xlu1 %v1142_v9  ;;  %v1382_v54 = vadd.f32 %v3880_v6, %v3876_v19 }
 0x351   : > { %2921 = vpow2.f32 %v1263_v5 }
 0x353   : > { %1383 = vadd.xlane.f32.xlu2 %v1382_v54  ;;  %v1102_v43 = vpop.xlane.xlu2 %1101 }
 0x354   : > { %v1191_v36 = vsub.f32 %v3583_v15, %v1102_v43  ;;  %v1192_v26 = vsub.f32 %v3748_v13, %v1102_v43 }
 0x355   : > { %v3888_v7 = vpop.f32.mrf.mxu1 }
 0x356   : > { %v3890_v16 = vpop.eup %2919  ;;  %v1265_v8 = vmul.f32 1.442695, %v1191_v36  ;;  %v1267_v30 = vmul.f32 1.442695, %v1192_v26  ;;  %v1145_v28 = vmax.f32 %v3886_v12, %v3888_v7 }
 0x357   : > { %v3894_v49 = vpop.eup %2921 }
 0x358   : > { %2923 = vpow2.f32 %v1265_v8  ;;  %1146 = vmax.xlane.f32.xlu0 %v1145_v28  ;;  %v1385_v15 = vadd.f32 %v3894_v49, %v3890_v16 }
 0x359   : > { %2925 = vpow2.f32 %v1267_v30 }
 0x35b   : > { %1386 = vadd.xlane.f32.xlu2 %v1385_v15  ;;  %v1105_v13 = vpop.xlane.xlu1 %1104 }
 0x35c   : > { %v1193_v11 = vsub.f32 %v3599_v50, %v1105_v13  ;;  %v1194_v33 = vsub.f32 %v3754_v47, %v1105_v13 }
 0x35e   : > { %v3900_v22 = vpop.eup %2923  ;;  %v1269_v34 = vmul.f32 1.442695, %v1193_v11  ;;  %v1271_v37 = vmul.f32 1.442695, %v1194_v33 }
 0x35f   : > { %v3902_v0 = vpop.eup %2925 }
 0x360   : > { %2927 = vpow2.f32 %v1269_v34  ;;  %v1388_v31 = vadd.f32 %v3902_v0, %v3900_v22 }
 0x361   : > { %2929 = vpow2.f32 %v1271_v37 }
 0x363   : > { %1389 = vadd.xlane.f32.xlu2 %v1388_v31  ;;  %v1108_v35 = vpop.xlane.xlu1 %1107 }
 0x364   : > { %v1195_v52 = vsub.f32 %v3616_v32, %v1108_v35  ;;  %v1196_v3 = vsub.f32 %v3760_v25, %v1108_v35 }
 0x366   : > { %v3908_v50 = vpop.eup %2927  ;;  %v1273_v47 = vmul.f32 1.442695, %v1195_v52  ;;  %v1275_v44 = vmul.f32 1.442695, %v1196_v3 }
 0x367   : > { %v3910_v56 = vpop.eup %2929 }
 0x368   : > { %2931 = vpow2.f32 %v1273_v47  ;;  %v1391_v61 = vadd.f32 %v3910_v56, %v3908_v50 }
 0x369   : > { %2933 = vpow2.f32 %v1275_v44 }
 0x36b   : > { %1392 = vadd.xlane.f32.xlu2 %v1391_v61  ;;  %v1111_v5 = vpop.xlane.xlu1 %1110 }
 0x36c   : > { %v1197_v9 = vsub.f32 %v3632_v2, %v1111_v5  ;;  %v1198_v54 = vsub.f32 %v3767_v21, %v1111_v5 }
 0x36e   : > { %v3916_v32 = vpop.eup %2931  ;;  %v1277_v25 = vmul.f32 1.442695, %v1197_v9  ;;  %v1279_v43 = vmul.f32 1.442695, %v1198_v54 }
 0x36f   : > { %v3918_v36 = vpop.eup %2933 }
 0x370   : > { %2935 = vpow2.f32 %v1277_v25  ;;  %v1394_v26 = vadd.f32 %v3918_v36, %v3916_v32 }
 0x371   : > { %2937 = vpow2.f32 %v1279_v43 }
 0x373   : > { %1395 = vadd.xlane.f32.xlu2 %v1394_v26  ;;  %v1114_v8 = vpop.xlane.xlu1 %1113 }
 0x374   : > { %v1199_v30 = vsub.f32 %v3645_v27, %v1114_v8  ;;  %v1200_v28 = vsub.f32 %v3777_v40, %v1114_v8 }
 0x376   : > { %v3924_v2 = vpop.eup %2935  ;;  %v1281_v21 = vmul.f32 1.442695, %v1199_v30  ;;  %v1283_v15 = vmul.f32 1.442695, %v1200_v28  ;;  %v3954_v28 = vpop.f32.mrf.mxu1 }
 0x377   : > { %v3926_v13 = vpop.eup %2937 }
 0x378   : > { %2939 = vpow2.f32 %v1281_v21  ;;  %v1397_v11 = vadd.f32 %v3926_v13, %v3924_v2 }
 0x379   : > { %2941 = vpow2.f32 %v1283_v15  ;;  %v3956_v15 = vpop.f32.mrf.mxu3 }
 0x37b   : > { %1398 = vadd.xlane.f32.xlu2 %v1397_v11  ;;  %v1117_v33 = vpop.xlane.xlu1 %1116 }
 0x37c   : > { %v1201_v34 = vsub.f32 %v3658_v38, %v1117_v33  ;;  %v1202_v37 = vsub.f32 %v3786_v58, %v1117_v33 }
 0x37e   : > { %v3932_v27 = vpop.eup %2939  ;;  %v1285_v40 = vmul.f32 1.442695, %v1201_v34  ;;  %v1287_v31 = vmul.f32 1.442695, %v1202_v37 }
 0x37f   : > { %v3934_v35 = vpop.eup %2941 }
 0x380   : > { %2943 = vpow2.f32 %v1285_v40  ;;  %v1400_v52 = vadd.f32 %v3934_v35, %v3932_v27 }
 0x381   : > { %2945 = vpow2.f32 %v1287_v31 }
 0x383   : > { %1401 = vadd.xlane.f32.xlu2 %v1400_v52  ;;  %v1120_v3 = vpop.xlane.xlu1 %1119  ;;  %v3966_v52 = vpop.f32.mrf.mxu1 }
 0x384   : > { %v1203_v47 = vsub.f32 %v3671_v17, %v1120_v3  ;;  %v1204_v44 = vsub.f32 %v3792_v10, %v1120_v3 }
 0x386   : > { %v3940_v38 = vpop.eup %2943  ;;  %v1289_v58 = vmul.f32 1.442695, %v1203_v47  ;;  %v1291_v61 = vmul.f32 1.442695, %v1204_v44  ;;  %v3972_v47 = vpop.f32.mrf.mxu3 }
 0x387   : > { %v3942_v5 = vpop.eup %2945 }
 0x388   : > { %2947 = vpow2.f32 %v1289_v58  ;;  %v1403_v9 = vadd.f32 %v3942_v5, %v3940_v38 }
 0x389   : > { %2949 = vpow2.f32 %v1291_v61 }
 0x38b   : > { %1404 = vadd.xlane.f32.xlu2 %v1403_v9  ;;  %v1123_v54 = vpop.xlane.xlu1 %1122 }
 0x38c   : > { %v1205_v25 = vsub.f32 %v3684_v18, %v1123_v54  ;;  %v1206_v43 = vsub.f32 %v3798_v46, %v1123_v54 }
 0x38e   : > { %v3948_v17 = vpop.eup %2947  ;;  %v1293_v10 = vmul.f32 1.442695, %v1205_v25  ;;  %v1295_v26 = vmul.f32 1.442695, %v1206_v43  ;;  %v3982_v43 = vpop.f32.mrf.mxu1 }
 0x38f   : > { %v3950_v8 = vpop.eup %2949 }
 0x390   : > { %2951 = vpow2.f32 %v1293_v10  ;;  %v1406_v30 = vadd.f32 %v3950_v8, %v3948_v17 }
 0x391   : > { %2953 = vpow2.f32 %v1295_v26 }
 0x393   : > { %1407 = vadd.xlane.f32.xlu2 %v1406_v30  ;;  %v1126_v21 = vpop.xlane.xlu1 %1125 }
 0x394   : > { %v1207_v18 = vsub.f32 %v3695_v60, %v1126_v21  ;;  %v1208_v46 = vsub.f32 %v3806_v53, %v1126_v21  ;;  %v3986_v21 = vpop.f32.mrf.mxu3 }
 0x396   : > { %v3960_v11 = vpop.eup %2951  ;;  %v1297_v33 = vmul.f32 1.442695, %v1207_v18  ;;  %v1299_v34 = vmul.f32 1.442695, %v1208_v46 }
 0x397   : > { %v3962_v37 = vpop.eup %2953 }
 0x398   : > { %2955 = vpow2.f32 %v1297_v33  ;;  %v1409_v40 = vadd.f32 %v3962_v37, %v3960_v11 }
 0x399   : > { %2957 = vpow2.f32 %v1299_v34 }
 0x39b   : > { %1410 = vadd.xlane.f32.xlu2 %v1409_v40  ;;  %v1129_v31 = vpop.xlane.xlu1 %1128 }
 0x39c   : > { %v1209_v3 = vsub.f32 %v3804_v29, %v1129_v31  ;;  %v1210_v60 = vsub.f32 %v3814_v55, %v1129_v31 }
 0x39e   : > { %v3970_v53 = vpop.eup %2955  ;;  %v1301_v44 = vmul.f32 1.442695, %v1209_v3  ;;  %v1303_v58 = vmul.f32 1.442695, %v1210_v60 }
 0x39f   : > { %v3974_v61 = vpop.eup %2957 }
 0x3a0   : > { %2959 = vpow2.f32 %v1301_v44  ;;  %v1412_v9 = vadd.f32 %v3974_v61, %v3970_v53  ;;  %v3998_v44 = vpop.f32.mrf.mxu1 }
 0x3a1   : > { %2961 = vpow2.f32 %v1303_v58 }
 0x3a3   : > { %1413 = vadd.xlane.f32.xlu2 %v1412_v9  ;;  %v1132_v54 = vpop.xlane.xlu1 %1131  ;;  %v4004_v9 = vpop.f32.mrf.mxu3 }
 0x3a4   : > { %v1211_v25 = vsub.f32 %v3812_v45, %v1132_v54  ;;  %v1212_v29 = vsub.f32 %v3824_v59, %v1132_v54  ;;  %v1148_v45 = vmax.f32 %v3956_v15, %v3954_v28 }
 0x3a6   : > { %v3980_v55 = vpop.eup %2959  ;;  %v1305_v10 = vmul.f32 1.442695, %v1211_v25  ;;  %v1307_v26 = vmul.f32 1.442695, %v1212_v29 }
 0x3a7   : > { %v3984_v30 = vpop.eup %2961 }
 0x3a8   : > { %2963 = vpow2.f32 %v1305_v10  ;;  %v1415_v18 = vadd.f32 %v3984_v30, %v3980_v55 }
 0x3a9   : > { %2965 = vpow2.f32 %v1307_v26 }
 0x3aa   : > { %1416 = vadd.xlane.f32.xlu1 %v1415_v18 }
 0x3ab   : > { %1149 = vmax.xlane.f32.xlu2 %v1148_v45  ;;  %v1135_v59 = vpop.xlane.xlu1 %1134 }
 0x3ac   : > { %v1213_v46 = vsub.f32 %v3820_v57, %v1135_v59  ;;  %v1214_v33 = vsub.f32 %v3832_v20, %v1135_v59  ;;  %v1151_v57 = vmax.f32 %v3972_v47, %v3966_v52 }
 0x3ae   : > { %v3994_v34 = vpop.eup %2963  ;;  %v1309_v40 = vmul.f32 1.442695, %v1213_v46  ;;  %v1311_v31 = vmul.f32 1.442695, %v1214_v33  ;;  %v1375_v3 = vpop.xlane.xlu2 %1374 }
 0x3af   : > { %4545 = vst [vmem:[#allocation5_spill] sm:$0xff] %v3994_v34  ;;  %v3996_v60 = vpop.eup %2965  ;;  %2967 = vrcp.f32 %v1375_v3  ;;  %vm1474_vm2 = vweird.f32 %v1375_v3 }
 0x3b0   : > { %4546 = vst [vmem:[#allocation6_spill] sm:$0xff] %v3996_v60  ;;  %2969 = vpow2.f32 %v1309_v40  ;;  %v1418_v58 = vadd.f32 %v3996_v60, %v3994_v34  ;;  %v1480_v40 = vand.u32 2147483648, %v1375_v3 }
 0x3b1   : > { %2971 = vpow2.f32 %v1311_v31  ;;  %v1478_v31 = vand.u32 2147483647, %v1375_v3 }
 0x3b2   : > { %1419 = vadd.xlane.f32.xlu1 %v1418_v58  ;;  %v4020_v58 = vpop.f32.mrf.mxu1 }
 0x3b3   : > { %1152 = vmax.xlane.f32.xlu2 %v1151_v57  ;;  %v1138_v20 = vpop.xlane.xlu1 %1137  ;;  %vm1479_vm4 = vcmp.eq.f32.partialorder %v1478_v31, 8.507059e+37 }
 0x3b4   : > { %v1215_v54 = vsub.f32 %v3838_v62, %v1138_v20  ;;  %v1216_v25 = vsub.f32 %v3846_v23, %v1138_v20  ;;  %v1154_v23 = vmax.f32 %v3986_v21, %v3982_v43 }
 0x3b5   : > { %v2968_v29 = vpop.eup %2967 }
 0x3b6   : > { %v4008_v10 = vpop.eup %2969  ;;  %v1470_v26 = vmul.f32 %v2968_v29, %v1375_v3  ;;  %v1313_v18 = vmul.f32 1.442695, %v1215_v54  ;;  %v1315_v45 = vmul.f32 1.442695, %v1216_v25  ;;  %v4010_v59 = vpop.xlane.xlu2 %1377  ;;  %vm1475_vm7 = vweird.f32 %v2968_v29 }
 0x3b7   : > { %4547 = vst [vmem:[#allocation7_spill] sm:$0xff] %v4008_v10  ;;  %v4012_v46 = vpop.eup %2971  ;;  %2973 = vrcp.f32 %v4010_v59  ;;  %v4022_v54 = vpop.f32.mrf.mxu3  ;;  %vm1476_vm3 = vmor %vm1474_vm2, %vm1475_vm7  ;;  %vm1489_vm5 = vweird.f32 %v4010_v59 }
 0x3b8   : > { %4548 = vst [vmem:[#allocation8_spill] sm:$0xff] %v4012_v46  ;;  %v1471_v33 = vsub.f32 1.0, %v1470_v26  ;;  %2975 = vpow2.f32 %v1313_v18  ;;  %v1421_v62 = vadd.f32 %v4012_v46, %v4008_v10  ;;  %v1481_v46 = vor.u32 1.1754944e-38, %v1480_v40 }
 0x3b9   : > { %2977 = vpow2.f32 %v1315_v45 }
 0x3ba   : > { %v1472_v57 = vmul.f32 %v2968_v29, %v1471_v33  ;;  %1422 = vadd.xlane.f32.xlu1 %v1421_v62 }
 0x3bb   : > { %1155 = vmax.xlane.f32.xlu2 %v1154_v23  ;;  %v1141_v20 = vpop.xlane.xlu1 %1140 }
 0x3bc   : > { %v1217_v25 = vsub.f32 %v3854_v42, %v1141_v20  ;;  %v1218_v26 = vsub.f32 %v3860_v51, %v1141_v20  ;;  %v1473_v18 = vadd.f32 %v2968_v29, %v1472_v57  ;;  %v1157_v51 = vmax.f32 %v4004_v9, %v3998_v44 }
 0x3bd   : > { %v2974_v45 = vpop.eup %2973 }
 0x3be   : > { %v4028_v10 = vpop.eup %2975  ;;  %v1485_v33 = vmul.f32 %v2974_v45, %v4010_v59  ;;  %v1317_v62 = vmul.f32 1.442695, %v1217_v25  ;;  %v1319_v23 = vmul.f32 1.442695, %v1218_v26  ;;  %v4031_v60 = vpop.xlane.xlu2 %1380  ;;  %v1477_v3 = vsel %vm1476_vm3, %v2968_v29, %v1473_v18 }
 0x3bf   : > { %v4033_v34 = vpop.eup %2977  ;;  %2979 = vrcp.f32 %v4031_v60  ;;  %v1482_v42 = vsel %vm1479_vm4, %v1481_v46, %v1477_v3  ;;  %v1493_v29 = vand.u32 2147483647, %v4010_v59  ;;  %v1495_v25 = vand.u32 2147483648, %v4010_v59 }
 0x3c0   : > { %v1486_v40 = vsub.f32 1.0, %v1485_v33  ;;  %2981 = vpow2.f32 %v1317_v62  ;;  %v1949_v31 = vmul.f32 %v3836_v63, %v1482_v42  ;;  %v1950_v57 = vmul.f32 %v3840_v1, %v1482_v42  ;;  %v4048_v1 = vpop.f32.mrf.mxu1  ;;  %v4055_v42 = vpop.f32.mrf.mxu3 }
 0x3c1   : > { %2983 = vpow2.f32 %v1319_v23  ;;  %v1424_v20 = vadd.f32 %v4033_v34, %v4028_v10  ;;  %vm1490_vm1 = vweird.f32 %v2974_v45  ;;  %vm1494_vm8 = vcmp.eq.f32.partialorder %v1493_v29, 8.507059e+37 }
 0x3c2   : > { %v1487_v26 = vmul.f32 %v2974_v45, %v1486_v40  ;;  %2013 = vst [vmem:[%s4044_s18] sm:$0xff] %v1949_v31  ;;  %2210 = vmatmul.f32.vlgmr.msrb.gmra.mxu0 %v1949_v31  ;;  %2323 = vmatmul.f32.vlgmr.msrb.gmra.mxu3 %v1950_v57  ;;  %vm1491_vm6 = vmor %vm1489_vm5, %vm1490_vm1  ;;  %v1496_v23 = vor.u32 1.1754944e-38, %v1495_v25  ;;  %vm1504_vm10 = vweird.f32 %v4031_v60 }
 0x3c3   : > { %2014 = vst [vmem:[%s4044_s18 + $0x8] sm:$0xff] %v1950_v57  ;;  %1425 = vadd.xlane.f32.xlu1 %v1424_v20  ;;  %1158 = vmax.xlane.f32.xlu2 %v1157_v51  ;;  %v1144_v63 = vpop.xlane.xlu1 %1143  ;;  %v1160_v20 = vmax.f32 %v4022_v54, %v4020_v58 }
 0x3c4   : > { %v1219_v46 = vsub.f32 %v3870_v39, %v1144_v63  ;;  %v1220_v18 = vsub.f32 %v3874_v48, %v1144_v63  ;;  %v1488_v33 = vadd.f32 %v2974_v45, %v1487_v26 }
 0x3c5   : > { %v2980_v62 = vpop.eup %2979 }
 0x3c6   : > { %v4053_v3 = vpop.eup %2981  ;;  %v1500_v51 = vmul.f32 %v2980_v62, %v4031_v60  ;;  %v1321_v40 = vmul.f32 1.442695, %v1219_v46  ;;  %v1323_v31 = vmul.f32 1.442695, %v1220_v18  ;;  %v4058_v57 = vpop.xlane.xlu2 %1383  ;;  %v1492_v39 = vsel %vm1491_vm6, %v2974_v45, %v1488_v33 }
 0x3c7   : > { %v4060_v48 = vpop.eup %2983  ;;  %2985 = vrcp.f32 %v4058_v57  ;;  %v1497_v59 = vsel %vm1494_vm8, %v1496_v23, %v1492_v39  ;;  %v1508_v45 = vand.u32 2147483647, %v4031_v60  ;;  %v1510_v46 = vand.u32 2147483648, %v4031_v60 }
 0x3c8   : > { %v1501_v29 = vsub.f32 1.0, %v1500_v51  ;;  %2987 = vpow2.f32 %v1321_v40  ;;  %v1951_v25 = vmul.f32 %v3850_v4, %v1497_v59  ;;  %v1952_v26 = vmul.f32 %v3852_v24, %v1497_v59  ;;  %v4078_v39 = vpop.f32.mrf.mxu1  ;;  %v4083_v60 = vpop.f32.mrf.mxu3 }
 0x3c9   : > { %2989 = vpow2.f32 %v1323_v31  ;;  %v1427_v63 = vadd.f32 %v4060_v48, %v4053_v3  ;;  %vm1505_vm9 = vweird.f32 %v2980_v62  ;;  %vm1509_vm12 = vcmp.eq.f32.partialorder %v1508_v45, 8.507059e+37 }
 0x3ca   : > { %v1502_v18 = vmul.f32 %v2980_v62, %v1501_v29  ;;  %2015 = vst [vmem:[%s4044_s18 + $0x10] sm:$0xff] %v1951_v25  ;;  %2213 = vmatmul.f32.gmra.mxu0 %v1951_v25  ;;  %2326 = vmatmul.f32.gmra.mxu3 %v1952_v26  ;;  %vm1506_vm11 = vmor %vm1504_vm10, %vm1505_vm9  ;;  %v1511_v40 = vor.u32 1.1754944e-38, %v1510_v46  ;;  %vm1519_vm14 = vweird.f32 %v4058_v57 }
 0x3cb   : > { %2016 = vst [vmem:[%s4044_s18 + $0x18] sm:$0xff] %v1952_v26  ;;  %1428 = vadd.xlane.f32.xlu1 %v1427_v63  ;;  %1161 = vmax.xlane.f32.xlu2 %v1160_v20  ;;  %v1147_v33 = vpop.xlane.xlu0 %1146 }
 0x3cc   : > { %v1221_v4 = vsub.f32 %v3886_v12, %v1147_v33  ;;  %v1222_v24 = vsub.f32 %v3888_v7, %v1147_v33  ;;  %v1503_v23 = vadd.f32 %v2980_v62, %v1502_v18  ;;  %v1525_v33 = vand.u32 2147483648, %v4058_v57 }
 0x3cd   : > { %v2986_v51 = vpop.eup %2985 }
 0x3ce   : > { %v4076_v31 = vpop.eup %2987  ;;  %v1515_v59 = vmul.f32 %v2986_v51, %v4058_v57  ;;  %v1325_v29 = vmul.f32 1.442695, %v1221_v4  ;;  %v1327_v20 = vmul.f32 1.442695, %v1222_v24  ;;  %v1387_v25 = vpop.xlane.xlu2 %1386  ;;  %v1507_v12 = vsel %vm1506_vm11, %v2980_v62, %v1503_v23 }
 0x3cf   : > { %v4081_v26 = vpop.eup %2989  ;;  %2991 = vrcp.f32 %v1387_v25  ;;  %v1512_v7 = vsel %vm1509_vm12, %v1511_v40, %v1507_v12  ;;  %v1163_v62 = vmax.f32 %v4055_v42, %v4048_v1  ;;  %vm1520_vm13 = vweird.f32 %v2986_v51 }
 0x3d0   : > { %v1516_v63 = vsub.f32 1.0, %v1515_v59  ;;  %2993 = vpow2.f32 %v1325_v29  ;;  %v1953_v45 = vmul.f32 %v3862_v14, %v1512_v7  ;;  %v1954_v46 = vmul.f32 %v3866_v41, %v1512_v7  ;;  %vm1521_vm15 = vmor %vm1519_vm14, %vm1520_vm13 }
 0x3d1   : > { %2995 = vpow2.f32 %v1327_v20  ;;  %v1430_v18 = vadd.f32 %v4081_v26, %v4076_v31  ;;  %v1523_v24 = vand.u32 2147483647, %v4058_v57  ;;  %v1526_v23 = vor.u32 1.1754944e-38, %v1525_v33  ;;  %v4108_v33 = vpop.f32.mrf.mxu3 }
 0x3d2   : > { %v1517_v4 = vmul.f32 %v2986_v51, %v1516_v63  ;;  %2017 = vst [vmem:[%s4044_s18 + $0x20] sm:$0xff] %v1953_v45  ;;  %2216 = vmatmul.f32.gmra.mxu0 %v1953_v45  ;;  %2329 = vmatmul.f32.gmra.mxu3 %v1954_v46  ;;  %v4100_v63 = vpop.f32.mrf.mxu1  ;;  %vm1534_vm3 = vweird.f32 %v1387_v25 }
 0x3d3   : > { %2018 = vst [vmem:[%s4044_s18 + $0x28] sm:$0xff] %v1954_v46  ;;  %1431 = vadd.xlane.f32.xlu1 %v1430_v18  ;;  %1164 = vmax.xlane.f32.xlu2 %v1163_v62  ;;  %vm1524_vm7 = vcmp.eq.f32.partialorder %v1523_v24, 8.507059e+37  ;;  %v1166_v62 = vmax.f32 %v4083_v60, %v4078_v39  ;;  %v1538_v24 = vand.u32 2147483647, %v1387_v25 }
 0x3d4   : > { %v1518_v14 = vadd.f32 %v2986_v51, %v1517_v4 }
 0x3d5   : > { %v2992_v41 = vpop.eup %2991  ;;  %vm1539_vm1 = vcmp.eq.f32.partialorder %v1538_v24, 8.507059e+37 }
 0x3d6   : > { %v4096_v40 = vpop.eup %2993  ;;  %v1530_v59 = vmul.f32 %v2992_v41, %v1387_v25  ;;  %v1390_v29 = vpop.xlane.xlu2 %1389  ;;  %v1522_v20 = vsel %vm1521_vm15, %v2986_v51, %v1518_v14  ;;  %v1540_v51 = vand.u32 2147483648, %v1387_v25  ;;  %vm1535_vm2 = vweird.f32 %v2992_v41 }
 0x3d7   : > { %v4098_v12 = vpop.eup %2995  ;;  %2997 = vrcp.f32 %v1390_v29  ;;  %v1527_v7 = vsel %vm1524_vm7, %v1526_v23, %v1522_v20  ;;  %vm1536_vm4 = vmor %vm1534_vm3, %vm1535_vm2  ;;  %v1169_v25 = vmax.f32 %v4108_v33, %v4100_v63  ;;  %vm1549_vm6 = vweird.f32 %v1390_v29 }
 0x3d8   : > { %v1531_v45 = vsub.f32 1.0, %v1530_v59  ;;  %v1955_v57 = vmul.f32 %v3876_v19, %v1527_v7  ;;  %v1956_v46 = vmul.f32 %v3880_v6, %v1527_v7  ;;  %v1433_v18 = vadd.f32 %v4098_v12, %v4096_v40 }
 0x3d9   : > { %v1541_v14 = vor.u32 1.1754944e-38, %v1540_v51  ;;  %v4120_v51 = vpop.f32.mrf.mxu3 }
 0x3da   : > { %v1532_v4 = vmul.f32 %v2992_v41, %v1531_v45  ;;  %2019 = vst [vmem:[%s4044_s18 + $0x30] sm:$0xff] %v1955_v57  ;;  %2219 = vmatmul.f32.gmra.mxu0 %v1955_v57  ;;  %2332 = vmatmul.f32.gmra.mxu3 %v1956_v46 }
 0x3db   : > { %2020 = vst [vmem:[%s4044_s18 + $0x38] sm:$0xff] %v1956_v46  ;;  %1434 = vadd.xlane.f32.xlu1 %v1433_v18  ;;  %1167 = vmax.xlane.f32.xlu2 %v1166_v62  ;;  %v1555_v18 = vand.u32 2147483648, %v1390_v29  ;;  %v4116_v62 = vpop.f32.mrf.mxu1 }
 0x3dc   : > { %v1533_v19 = vadd.f32 %v2992_v41, %v1532_v4 }
 0x3dd   : > { %v2998_v6 = vpop.eup %2997  ;;  %v1556_v24 = vor.u32 1.1754944e-38, %v1555_v18 }
 0x3de   : > { %v1545_v23 = vmul.f32 %v2998_v6, %v1390_v29  ;;  %v1393_v59 = vpop.xlane.xlu2 %1392  ;;  %v1537_v20 = vsel %vm1536_vm4, %v2992_v41, %v1533_v19  ;;  %vm1550_vm5 = vweird.f32 %v2998_v6  ;;  %v1553_v41 = vand.u32 2147483647, %v1390_v29 }
 0x3df   : > { %2999 = vrcp.f32 %v1393_v59  ;;  %v1542_v7 = vsel %vm1539_vm1, %v1541_v14, %v1537_v20  ;;  %vm1551_vm8 = vmor %vm1549_vm6, %vm1550_vm5  ;;  %v1172_v29 = vmax.f32 %v4120_v51, %v4116_v62  ;;  %v1568_v18 = vand.u32 2147483647, %v1393_v59 }
 0x3e0   : > { %v1546_v45 = vsub.f32 1.0, %v1545_v23  ;;  %v1957_v57 = vmul.f32 %v3890_v16, %v1542_v7  ;;  %v1958_v46 = vmul.f32 %v3894_v49, %v1542_v7  ;;  %vm1554_vm9 = vcmp.eq.f32.partialorder %v1553_v41, 8.507059e+37 }
 0x3e1   : > { %vm1564_vm11 = vweird.f32 %v1393_v59  ;;  %vm1569_vm13 = vcmp.eq.f32.partialorder %v1568_v18, 8.507059e+37 }
 0x3e2   : > { %v1547_v4 = vmul.f32 %v2998_v6, %v1546_v45  ;;  %2021 = vst [vmem:[%s4044_s18 + $0x40] sm:$0xff] %v1957_v57  ;;  %2222 = vmatmul.f32.gmra.mxu0 %v1957_v57  ;;  %2335 = vmatmul.f32.gmra.mxu3 %v1958_v46 }
 0x3e3   : > { %2022 = vst [vmem:[%s4044_s18 + $0x48] sm:$0xff] %v1958_v46  ;;  %1170 = vmax.xlane.f32.xlu2 %v1169_v25  ;;  %v1570_v46 = vand.u32 2147483648, %v1393_v59 }
 0x3e4   : > { %v1548_v16 = vadd.f32 %v2998_v6, %v1547_v4 }
 0x3e5   : > { %v3000_v49 = vpop.eup %2999 }
 0x3e6   : > { %v1560_v19 = vmul.f32 %v3000_v49, %v1393_v59  ;;  %v1396_v14 = vpop.xlane.xlu2 %1395  ;;  %v1552_v23 = vsel %vm1551_vm8, %v2998_v6, %v1548_v16  ;;  %vm1565_vm10 = vweird.f32 %v3000_v49  ;;  %v4128_v6 = vpop.f32.mrf.mxu1 }
 0x3e7   : > { %3001 = vrcp.f32 %v1396_v14  ;;  %v1557_v20 = vsel %vm1554_vm9, %v1556_v24, %v1552_v23  ;;  %vm1566_vm12 = vmor %vm1564_vm11, %vm1565_vm10  ;;  %v1585_v59 = vand.u32 2147483648, %v1396_v14  ;;  %vm1579_vm15 = vweird.f32 %v1396_v14 }
 0x3e8   : > { %v1561_v7 = vsub.f32 1.0, %v1560_v19  ;;  %v1959_v45 = vmul.f32 %v3900_v22, %v1557_v20  ;;  %v1960_v57 = vmul.f32 %v3902_v0, %v1557_v20  ;;  %v1571_v22 = vor.u32 1.1754944e-38, %v1570_v46  ;;  %v4130_v0 = vpop.f32.mrf.mxu3 }
 0x3e9   : > { %v1586_v18 = vor.u32 1.1754944e-38, %v1585_v59 }
 0x3ea   : > { %v1562_v25 = vmul.f32 %v3000_v49, %v1561_v7  ;;  %2023 = vst [vmem:[%s4044_s18 + $0x50] sm:$0xff] %v1959_v45  ;;  %2225 = vmatmul.f32.gmra.mxu0 %v1959_v45  ;;  %2338 = vmatmul.f32.gmra.mxu3 %v1960_v57 }
 0x3eb   : > { %2024 = vst [vmem:[%s4044_s18 + $0x58] sm:$0xff] %v1960_v57  ;;  %1173 = vmax.xlane.f32.xlu2 %v1172_v29  ;;  %v1175_v57 = vmax.f32 %v4130_v0, %v4128_v6  ;;  %v1583_v29 = vand.u32 2147483647, %v1396_v14 }
 0x3ec   : > { %v1563_v4 = vadd.f32 %v3000_v49, %v1562_v25 }
 0x3ed   : > { %v3002_v41 = vpop.eup %3001  ;;  %vm1584_vm2 = vcmp.eq.f32.partialorder %v1583_v29, 8.507059e+37 }
 0x3ee   : > { %v1575_v16 = vmul.f32 %v3002_v41, %v1396_v14  ;;  %v1399_v24 = vpop.xlane.xlu2 %1398  ;;  %v1567_v19 = vsel %vm1566_vm12, %v3000_v49, %v1563_v4  ;;  %vm1580_vm14 = vweird.f32 %v3002_v41 }
 0x3ef   : > { %3003 = vrcp.f32 %v1399_v24  ;;  %v1572_v23 = vsel %vm1569_vm13, %v1571_v22, %v1567_v19  ;;  %vm1581_vm7 = vmor %vm1579_vm15, %vm1580_vm14  ;;  %vm1594_vm4 = vweird.f32 %v1399_v24 }
 0x3f0   : > { %v1576_v20 = vsub.f32 1.0, %v1575_v16  ;;  %v1961_v7 = vmul.f32 %v3908_v50, %v1572_v23  ;;  %v1962_v45 = vmul.f32 %v3910_v56, %v1572_v23  ;;  %v4138_v50 = vpop.f32.mrf.mxu1  ;;  %v4140_v19 = vpop.f32.mrf.mxu3 }
 0x3f2   : > { %v1577_v46 = vmul.f32 %v3002_v41, %v1576_v20  ;;  %2025 = vst [vmem:[%s4044_s18 + $0x60] sm:$0xff] %v1961_v7  ;;  %2228 = vmatmul.f32.gmra.mxu0 %v1961_v7  ;;  %2341 = vmatmul.f32.gmra.mxu3 %v1962_v45  ;;  %v1178_v7 = vmax.f32 %v4140_v19, %v4138_v50 }
 0x3f3   : > { %2026 = vst [vmem:[%s4044_s18 + $0x68] sm:$0xff] %v1962_v45  ;;  %1176 = vmax.xlane.f32.xlu2 %v1175_v57  ;;  %v1600_v45 = vand.u32 2147483648, %v1399_v24 }
 0x3f4   : > { %v1578_v49 = vadd.f32 %v3002_v41, %v1577_v46 }
 0x3f5   : > { %v3004_v25 = vpop.eup %3003  ;;  %v1601_v29 = vor.u32 1.1754944e-38, %v1600_v45 }
 0x3f6   : > { %v1590_v56 = vmul.f32 %v3004_v25, %v1399_v24  ;;  %v1402_v4 = vpop.xlane.xlu2 %1401  ;;  %v1582_v22 = vsel %vm1581_vm7, %v3002_v41, %v1578_v49  ;;  %vm1595_vm3 = vweird.f32 %v3004_v25  ;;  %v1598_v41 = vand.u32 2147483647, %v1399_v24 }
 0x3f7   : > { %3005 = vrcp.f32 %v1402_v4  ;;  %v1587_v16 = vsel %vm1584_vm2, %v1586_v18, %v1582_v22  ;;  %vm1596_vm1 = vmor %vm1594_vm4, %vm1595_vm3  ;;  %v1613_v24 = vand.u32 2147483647, %v1402_v4  ;;  %vm1609_vm8 = vweird.f32 %v1402_v4 }
 0x3f8   : > { %v1591_v23 = vsub.f32 1.0, %v1590_v56  ;;  %v1963_v20 = vmul.f32 %v3916_v32, %v1587_v16  ;;  %v1964_v14 = vmul.f32 %v3918_v36, %v1587_v16  ;;  %vm1599_vm5 = vcmp.eq.f32.partialorder %v1598_v41, 8.507059e+37 }
 0x3f9   : > { %vm1614_vm10 = vcmp.eq.f32.partialorder %v1613_v24, 8.507059e+37 }
 0x3fa   : > { %v1592_v59 = vmul.f32 %v3004_v25, %v1591_v23  ;;  %2027 = vst [vmem:[%s4044_s18 + $0x70] sm:$0xff] %v1963_v20  ;;  %2231 = vmatmul.f32.gmra.mxu0 %v1963_v20  ;;  %2344 = vmatmul.f32.gmra.mxu3 %v1964_v14  ;;  %v1615_v23 = vand.u32 2147483648, %v1402_v4 }
 0x3fb   : > { %2028 = vst [vmem:[%s4044_s18 + $0x78] sm:$0xff] %v1964_v14  ;;  %1179 = vmax.xlane.f32.xlu2 %v1178_v7 }
 0x3fc   : > { %v1593_v57 = vadd.f32 %v3004_v25, %v1592_v59  ;;  %v1616_v7 = vor.u32 1.1754944e-38, %v1615_v23 }
 0x3fd   : > { %v3006_v46 = vpop.eup %3005 }
 0x3fe   : > { %v1605_v32 = vmul.f32 %v3006_v46, %v1402_v4  ;;  %v1405_v36 = vpop.xlane.xlu2 %1404  ;;  %v1597_v49 = vsel %vm1596_vm1, %v3004_v25, %v1593_v57  ;;  %vm1610_vm6 = vweird.f32 %v3006_v46 }
 0x3ff   : > { %3007 = vrcp.f32 %v1405_v36  ;;  %v1602_v18 = vsel %vm1599_vm5, %v1601_v29, %v1597_v49  ;;  %vm1611_vm9 = vmor %vm1609_vm8, %vm1610_vm6  ;;  %v1628_v4 = vand.u32 2147483647, %v1405_v36  ;;  %vm1624_vm12 = vweird.f32 %v1405_v36 }
 0x400   : > { %v1606_v56 = vsub.f32 1.0, %v1605_v32  ;;  %v1965_v22 = vmul.f32 %v3924_v2, %v1602_v18  ;;  %v1966_v16 = vmul.f32 %v3926_v13, %v1602_v18  ;;  %v1630_v32 = vand.u32 2147483648, %v1405_v36 }
 0x401   : > { %vm1629_vm14 = vcmp.eq.f32.partialorder %v1628_v4, 8.507059e+37 }
 0x402   : > { %v1607_v20 = vmul.f32 %v3006_v46, %v1606_v56  ;;  %2029 = vst [vmem:[%s4044_s18 + $0x80] sm:$0xff] %v1965_v22  ;;  %2234 = vmatmul.f32.gmra.mxu0 %v1965_v22  ;;  %2347 = vmatmul.f32.gmra.mxu3 %v1966_v16  ;;  %v1631_v56 = vor.u32 1.1754944e-38, %v1630_v32 }
 0x403   : > { %2030 = vst [vmem:[%s4044_s18 + $0x88] sm:$0xff] %v1966_v16 }
 0x404   : > { %v1608_v14 = vadd.f32 %v3006_v46, %v1607_v20 }
 0x405   : > { %v3008_v25 = vpop.eup %3007 }
 0x406   : > { %v1620_v45 = vmul.f32 %v3008_v25, %v1405_v36  ;;  %v1408_v59 = vpop.xlane.xlu2 %1407  ;;  %v1612_v2 = vsel %vm1611_vm9, %v3006_v46, %v1608_v14  ;;  %vm1625_vm11 = vweird.f32 %v3008_v25 }
 0x407   : > { %3009 = vrcp.f32 %v1408_v59  ;;  %v1617_v13 = vsel %vm1614_vm10, %v1616_v7, %v1612_v2  ;;  %vm1626_vm13 = vmor %vm1624_vm12, %vm1625_vm11  ;;  %v1645_v14 = vand.u32 2147483648, %v1408_v59  ;;  %v1643_v36 = vand.u32 2147483647, %v1408_v59 }
 0x408   : > { %v1621_v41 = vsub.f32 1.0, %v1620_v45  ;;  %v1967_v57 = vmul.f32 %v3932_v27, %v1617_v13  ;;  %v1968_v29 = vmul.f32 %v3934_v35, %v1617_v13  ;;  %vm1639_vm7 = vweird.f32 %v1408_v59 }
 0x409   : > { %v1646_v2 = vor.u32 1.1754944e-38, %v1645_v14  ;;  %vm1644_vm3 = vcmp.eq.f32.partialorder %v1643_v36, 8.507059e+37 }
 0x40a   : > { %v1622_v49 = vmul.f32 %v3008_v25, %v1621_v41  ;;  %2031 = vst [vmem:[%s4044_s18 + $0x90] sm:$0xff] %v1967_v57  ;;  %2237 = vmatmul.f32.gmra.mxu0 %v1967_v57  ;;  %2350 = vmatmul.f32.gmra.mxu3 %v1968_v29 }
 0x40b   : > { %2032 = vst [vmem:[%s4044_s18 + $0x98] sm:$0xff] %v1968_v29 }
 0x40c   : > { %v1623_v18 = vadd.f32 %v3008_v25, %v1622_v49 }
 0x40d   : > { %v3010_v46 = vpop.eup %3009 }
 0x40e   : > { %v1635_v22 = vmul.f32 %v3010_v46, %v1408_v59  ;;  %v1411_v16 = vpop.xlane.xlu2 %1410  ;;  %v1627_v27 = vsel %vm1626_vm13, %v3008_v25, %v1623_v18  ;;  %vm1640_vm15 = vweird.f32 %v3010_v46 }
 0x40f   : > { %3011 = vrcp.f32 %v1411_v16  ;;  %v1632_v35 = vsel %vm1629_vm14, %v1631_v56, %v1627_v27  ;;  %vm1641_vm2 = vmor %vm1639_vm7, %vm1640_vm15  ;;  %v1660_v4 = vand.u32 2147483648, %v1411_v16  ;;  %v1658_v59 = vand.u32 2147483647, %v1411_v16 }
 0x410   : > { %v1636_v23 = vsub.f32 1.0, %v1635_v22  ;;  %v1969_v20 = vmul.f32 %v3940_v38, %v1632_v35  ;;  %v1970_v24 = vmul.f32 %v3942_v5, %v1632_v35  ;;  %vm1654_vm1 = vweird.f32 %v1411_v16 }
 0x411   : > { %v1661_v22 = vor.u32 1.1754944e-38, %v1660_v4  ;;  %vm1659_vm6 = vcmp.eq.f32.partialorder %v1658_v59, 8.507059e+37 }
 0x412   : > { %v1637_v7 = vmul.f32 %v3010_v46, %v1636_v23  ;;  %2033 = vst [vmem:[%s4044_s18 + $0xa0] sm:$0xff] %v1969_v20  ;;  %2240 = vmatmul.f32.gmra.mxu0 %v1969_v20  ;;  %2353 = vmatmul.f32.gmra.mxu3 %v1970_v24 }
 0x413   : > { %2034 = vst [vmem:[%s4044_s18 + $0xa8] sm:$0xff] %v1970_v24 }
 0x414   : > { %v1638_v45 = vadd.f32 %v3010_v46, %v1637_v7 }
 0x415   : > { %v3012_v25 = vpop.eup %3011 }
 0x416   : > { %v1650_v13 = vmul.f32 %v3012_v25, %v1411_v16  ;;  %v1414_v41 = vpop.xlane.xlu2 %1413  ;;  %v1642_v38 = vsel %vm1641_vm2, %v3010_v46, %v1638_v45  ;;  %vm1655_vm4 = vweird.f32 %v3012_v25 }
 0x417   : > { %3013 = vrcp.f32 %v1414_v41  ;;  %v1647_v5 = vsel %vm1644_vm3, %v1646_v2, %v1642_v38  ;;  %vm1656_vm5 = vmor %vm1654_vm1, %vm1655_vm4  ;;  %v1675_v24 = vand.u32 2147483648, %v1414_v41  ;;  %vm1669_vm9 = vweird.f32 %v1414_v41 }
 0x418   : > { %v1651_v57 = vsub.f32 1.0, %v1650_v13  ;;  %v1971_v29 = vmul.f32 %v3948_v17, %v1647_v5  ;;  %v1972_v32 = vmul.f32 %v3950_v8, %v1647_v5  ;;  %v1673_v13 = vand.u32 2147483647, %v1414_v41 }
 0x41a   : > { %v1652_v49 = vmul.f32 %v3012_v25, %v1651_v57  ;;  %2035 = vst [vmem:[%s4044_s18 + $0xb0] sm:$0xff] %v1971_v29  ;;  %2243 = vmatmul.f32.gmra.mxu0 %v1971_v29  ;;  %2356 = vmatmul.f32.gmra.mxu3 %v1972_v32  ;;  %vm1674_vm11 = vcmp.eq.f32.partialorder %v1673_v13, 8.507059e+37 }
 0x41b   : > { %2036 = vst [vmem:[%s4044_s18 + $0xb8] sm:$0xff] %v1972_v32 }
 0x41c   : > { %v1653_v18 = vadd.f32 %v3012_v25, %v1652_v49 }
 0x41d   : > { %v3014_v56 = vpop.eup %3013  ;;  %v4164_v46 = vpop.xlane.xlu1 %1416 }
 0x41e   : > { %v1665_v27 = vmul.f32 %v3014_v56, %v1414_v41  ;;  %3015 = vrcp.f32 %v4164_v46  ;;  %v1150_v17 = vpop.xlane.xlu2 %1149  ;;  %v1657_v23 = vsel %vm1656_vm5, %v3012_v25, %v1653_v18  ;;  %vm1670_vm8 = vweird.f32 %v3014_v56 }
 0x41f   : > { %v1223_v8 = vsub.f32 %v3956_v15, %v1150_v17  ;;  %v1224_v35 = vsub.f32 %v3954_v28, %v1150_v17  ;;  %v1662_v14 = vsel %vm1659_vm6, %v1661_v22, %v1657_v23  ;;  %v1676_v25 = vor.u32 1.1754944e-38, %v1675_v24  ;;  %vm1671_vm10 = vmor %vm1669_vm9, %vm1670_vm8 }
 0x420   : > { %v1666_v20 = vsub.f32 1.0, %v1665_v27  ;;  %v1973_v36 = vmul.f32 %v3960_v11, %v1662_v14  ;;  %v1974_v45 = vmul.f32 %v3962_v37, %v1662_v14  ;;  %v1690_v49 = vand.u32 2147483648, %v4164_v46 }
 0x421   : > { %v1329_v16 = vmul.f32 1.442695, %v1223_v8  ;;  %v1331_v7 = vmul.f32 1.442695, %v1224_v35  ;;  %v1688_v18 = vand.u32 2147483647, %v4164_v46  ;;  %vm1684_vm13 = vweird.f32 %v4164_v46 }
 0x422   : > { %v1667_v2 = vmul.f32 %v3014_v56, %v1666_v20  ;;  %2037 = vst [vmem:[%s4044_s18 + $0xc0] sm:$0xff] %v1973_v36  ;;  %2246 = vmatmul.f32.gmra.mxu0 %v1973_v36  ;;  %2359 = vmatmul.f32.gmra.mxu3 %v1974_v45 }
 0x423   : > { %3017 = vpow2.f32 %v1329_v16  ;;  %2038 = vst [vmem:[%s4044_s18 + $0xc8] sm:$0xff] %v1974_v45  ;;  %vm1689_vm15 = vcmp.eq.f32.partialorder %v1688_v18, 8.507059e+37  ;;  %v4549_v18 = vld [vmem:[#allocation5_spill] sm:$0xff] }
 0x424   : > { %v3016_v28 = vpop.eup %3015  ;;  %3019 = vpow2.f32 %v1331_v7  ;;  %v1668_v15 = vadd.f32 %v3014_v56, %v1667_v2 }
 0x425   : > { %v1680_v38 = vmul.f32 %v3016_v28, %v4164_v46  ;;  %v4174_v5 = vpop.xlane.xlu1 %1419  ;;  %vm1685_vm12 = vweird.f32 %v3016_v28 }
 0x426   : > { %3021 = vrcp.f32 %v4174_v5  ;;  %v1153_v11 = vpop.xlane.xlu2 %1152  ;;  %v1672_v37 = vsel %vm1671_vm10, %v3014_v56, %v1668_v15  ;;  %vm1686_vm14 = vmor %vm1684_vm13, %vm1685_vm12  ;;  %v1705_v45 = vand.u32 2147483648, %v4174_v5  ;;  %v1703_v13 = vand.u32 2147483647, %v4174_v5 }
 0x427   : > { %v1681_v57 = vsub.f32 1.0, %v1680_v38  ;;  %v1225_v29 = vsub.f32 %v3972_v47, %v1153_v11  ;;  %v1226_v41 = vsub.f32 %v3966_v52, %v1153_v11  ;;  %v1677_v32 = vsel %vm1674_vm11, %v1676_v25, %v1672_v37 }
 0x428   : > { %v1975_v4 = vmul.f32 %v3970_v53, %v1677_v32  ;;  %v1976_v59 = vmul.f32 %v3974_v61, %v1677_v32  ;;  %v1691_v61 = vor.u32 1.1754944e-38, %v1690_v49  ;;  %vm1699_vm2 = vweird.f32 %v4174_v5 }
 0x429   : > { %v4183_v22 = vpop.eup %3017  ;;  %v1682_v56 = vmul.f32 %v3016_v28, %v1681_v57  ;;  %v1333_v27 = vmul.f32 1.442695, %v1225_v29  ;;  %v1335_v17 = vmul.f32 1.442695, %v1226_v41  ;;  %vm1704_vm4 = vcmp.eq.f32.partialorder %v1703_v13, 8.507059e+37 }
 0x42a   : > { %v4185_v8 = vpop.eup %3019  ;;  %2039 = vst [vmem:[%s4044_s18 + $0xd0] sm:$0xff] %v1975_v4  ;;  %2249 = vmatmul.f32.gmra.mxu0 %v1975_v4  ;;  %2362 = vmatmul.f32.gmra.mxu3 %v1976_v59 }
 0x42b   : > { %3023 = vpow2.f32 %v1333_v27  ;;  %2040 = vst [vmem:[%s4044_s18 + $0xd8] sm:$0xff] %v1976_v59  ;;  %v1436_v52 = vadd.f32 %v4185_v8, %v4183_v22  ;;  %v1683_v53 = vadd.f32 %v3016_v28, %v1682_v56  ;;  %v4550_v27 = vld [vmem:[#allocation6_spill] sm:$0xff] }
 0x42c   : > { %v3022_v47 = vpop.eup %3021  ;;  %3025 = vpow2.f32 %v1335_v17 }
 0x42d   : > { %v1695_v35 = vmul.f32 %v3022_v47, %v4174_v5  ;;  %1437 = vadd.xlane.f32.xlu1 %v1436_v52  ;;  %v4193_v23 = vpop.xlane.xlu1 %1422  ;;  %v1687_v20 = vsel %vm1686_vm14, %v3016_v28, %v1683_v53  ;;  %vm1700_vm7 = vweird.f32 %v3022_v47 }
 0x42e   : > { %3027 = vrcp.f32 %v4193_v23  ;;  %v1156_v46 = vpop.xlane.xlu2 %1155  ;;  %v1692_v24 = vsel %vm1689_vm15, %v1691_v61, %v1687_v20  ;;  %vm1701_vm3 = vmor %vm1699_vm2, %vm1700_vm7  ;;  %v1720_v49 = vand.u32 2147483648, %v4193_v23  ;;  %vm1714_vm5 = vweird.f32 %v4193_v23 }
 0x42f   : > { %v1696_v14 = vsub.f32 1.0, %v1695_v35  ;;  %v1227_v16 = vsub.f32 %v3986_v21, %v1156_v46  ;;  %v1228_v7 = vsub.f32 %v3982_v43, %v1156_v46  ;;  %v1977_v36 = vmul.f32 %v3980_v55, %v1692_v24 }
 0x430   : > { %v1978_v2 = vmul.f32 %v3984_v30, %v1692_v24  ;;  %v1706_v21 = vor.u32 1.1754944e-38, %v1705_v45  ;;  %v1721_v46 = vor.u32 1.1754944e-38, %v1720_v49 }
 0x431   : > { %v4202_v28 = vpop.eup %3023  ;;  %v1697_v15 = vmul.f32 %v3022_v47, %v1696_v14  ;;  %v1337_v25 = vmul.f32 1.442695, %v1227_v16  ;;  %v1339_v38 = vmul.f32 1.442695, %v1228_v7  ;;  %2041 = vst [vmem:[%s4044_s18 + $0xe0] sm:$0xff] %v1977_v36 }
 0x432   : > { %v4205_v11 = vpop.eup %3025  ;;  %2042 = vst [vmem:[%s4044_s18 + $0xe8] sm:$0xff] %v1978_v2  ;;  %2252 = vmatmul.f32.gmra.mxu0 %v1977_v36  ;;  %2365 = vmatmul.f32.gmra.mxu3 %v1978_v2 }
 0x433   : > { %3029 = vpow2.f32 %v1337_v25  ;;  %v1439_v55 = vadd.f32 %v4205_v11, %v4202_v28  ;;  %v1698_v43 = vadd.f32 %v3022_v47, %v1697_v15  ;;  %v4551_v25 = vld [vmem:[#allocation7_spill] sm:$0xff] }
 0x434   : > { %v3028_v30 = vpop.eup %3027  ;;  %3031 = vpow2.f32 %v1339_v38 }
 0x435   : > { %v1710_v37 = vmul.f32 %v3028_v30, %v4193_v23  ;;  %1440 = vadd.xlane.f32.xlu1 %v1439_v55  ;;  %v1702_v57 = vsel %vm1701_vm3, %v3022_v47, %v1698_v43  ;;  %vm1715_vm1 = vweird.f32 %v3028_v30  ;;  %v1718_v47 = vand.u32 2147483647, %v4193_v23  ;;  %v4552_v55 = vld [vmem:[#allocation8_spill] sm:$0xff] }
 0x436   : > { %v4212_v29 = vpop.xlane.xlu1 %1425  ;;  %v1159_v41 = vpop.xlane.xlu2 %1158  ;;  %v1707_v5 = vsel %vm1704_vm4, %v1706_v21, %v1702_v57  ;;  %vm1716_vm6 = vmor %vm1714_vm5, %vm1715_vm1 }
 0x437   : > { %v1711_v32 = vsub.f32 1.0, %v1710_v37  ;;  %3033 = vrcp.f32 %v4212_v29  ;;  %v1229_v4 = vsub.f32 %v4004_v9, %v1159_v41  ;;  %v1230_v59 = vsub.f32 %v3998_v44, %v1159_v41 }
 0x438   : > { %v1979_v56 = vmul.f32 %v4549_v18, %v1707_v5  ;;  %v1980_v17 = vmul.f32 %v4550_v27, %v1707_v5  ;;  %vm1719_vm8 = vcmp.eq.f32.partialorder %v1718_v47, 8.507059e+37  ;;  %v1735_v57 = vand.u32 2147483648, %v4212_v29 }
 0x439   : > { %v4220_v52 = vpop.eup %3029  ;;  %v1712_v53 = vmul.f32 %v3028_v30, %v1711_v32  ;;  %v1341_v35 = vmul.f32 1.442695, %v1229_v4  ;;  %v1343_v20 = vmul.f32 1.442695, %v1230_v59  ;;  %vm1729_vm10 = vweird.f32 %v4212_v29 }
 0x43a   : > { %v4223_v61 = vpop.eup %3031  ;;  %2043 = vst [vmem:[%s4044_s18 + $0xf0] sm:$0xff] %v1979_v56  ;;  %2255 = vmatmul.f32.gmra.mxu0 %v1979_v56  ;;  %2368 = vmatmul.f32.gmra.mxu3 %v1980_v17  ;;  %v1736_v59 = vor.u32 1.1754944e-38, %v1735_v57 }
 0x43b   : > { %2044 = vst [vmem:[%s4044_s18 + $0xf8] sm:$0xff] %v1980_v17  ;;  %v1442_v44 = vadd.f32 %v4223_v61, %v4220_v52  ;;  %v1713_v9 = vadd.f32 %v3028_v30, %v1712_v53  ;;  %3035 = vpow2.f32 %v1341_v35 }
 0x43c   : > { %3037 = vpow2.f32 %v1343_v20 }
 0x43d   : > { %v3034_v24 = vpop.eup %3033  ;;  %1443 = vadd.xlane.f32.xlu1 %v1442_v44  ;;  %v1717_v14 = vsel %vm1716_vm6, %v3028_v30, %v1713_v9 }
 0x43e   : > { %v1725_v16 = vmul.f32 %v3034_v24, %v4212_v29  ;;  %v4231_v7 = vpop.xlane.xlu1 %1428  ;;  %v1162_v23 = vpop.xlane.xlu2 %1161  ;;  %v1722_v36 = vsel %vm1719_vm8, %v1721_v46, %v1717_v14  ;;  %vm1730_vm9 = vweird.f32 %v3034_v24 }
 0x43f   : > { %3039 = vrcp.f32 %v4231_v7  ;;  %v1231_v45 = vsub.f32 %v4022_v54, %v1162_v23  ;;  %v4235_v2 = vpop.f32.mrf.mxu0  ;;  %v1232_v15 = vsub.f32 %v4020_v58, %v1162_v23  ;;  %v1981_v38 = vmul.f32 %v4551_v25, %v1722_v36  ;;  %vm1731_vm11 = vmor %vm1729_vm10, %vm1730_vm9 }
 0x440   : > { %v1726_v13 = vsub.f32 1.0, %v1725_v16  ;;  %v1982_v43 = vmul.f32 %v4552_v55, %v1722_v36  ;;  %v1733_v58 = vand.u32 2147483647, %v4212_v29  ;;  %v1748_v36 = vand.u32 2147483647, %v4231_v7 }
 0x441   : > { %v1345_v30 = vmul.f32 1.442695, %v1231_v45  ;;  %v4240_v21 = vpop.eup %3035  ;;  %v1347_v41 = vmul.f32 1.442695, %v1232_v15  ;;  %2045 = vst [vmem:[%s4044_s18 + $0x100] sm:$0xff] %v1981_v38  ;;  %vm1744_vm14 = vweird.f32 %v4231_v7 }
 0x442   : > { %v1727_v37 = vmul.f32 %v3034_v24, %v1726_v13  ;;  %v4244_v54 = vpop.eup %3037  ;;  %2258 = vmatmul.f32.gmra.mxu0 %v1981_v38  ;;  %2046 = vst [vmem:[%s4044_s18 + $0x108] sm:$0xff] %v1982_v43  ;;  %2371 = vmatmul.f32.gmra.mxu3 %v1982_v43  ;;  %vm1734_vm12 = vcmp.eq.f32.partialorder %v1733_v58, 8.507059e+37  ;;  %vm1749_vm7 = vcmp.eq.f32.partialorder %v1748_v36, 8.507059e+37 }
 0x443   : > { %3041 = vpow2.f32 %v1345_v30  ;;  %v1445_v5 = vadd.f32 %v4244_v54, %v4240_v21 }
 0x444   : > { %3043 = vpow2.f32 %v1347_v41  ;;  %v1728_v32 = vadd.f32 %v3034_v24, %v1727_v37 }
 0x445   : > { %v3040_v49 = vpop.eup %3039  ;;  %v4251_v4 = vpop.f32.mrf.mxu3  ;;  %1446 = vadd.xlane.f32.xlu1 %v1445_v5 }
 0x446   : > { %v1740_v18 = vmul.f32 %v3040_v49, %v4231_v7  ;;  %v4254_v56 = vpop.xlane.xlu1 %1431  ;;  %v1165_v27 = vpop.xlane.xlu2 %1164  ;;  %v1732_v17 = vsel %vm1731_vm11, %v3034_v24, %v1728_v32  ;;  %vm1745_vm13 = vweird.f32 %v3040_v49 }
 0x447   : > { %3045 = vrcp.f32 %v4254_v56  ;;  %v1233_v29 = vsub.f32 %v4055_v42, %v1165_v27  ;;  %v4258_v53 = vpop.f32.mrf.mxu0  ;;  %v1234_v35 = vsub.f32 %v4048_v1, %v1165_v27  ;;  %v1737_v20 = vsel %vm1734_vm12, %v1736_v59, %v1732_v17  ;;  %vm1746_vm15 = vmor %vm1744_vm14, %vm1745_vm13 }
 0x448   : > { %v1741_v47 = vsub.f32 1.0, %v1740_v18  ;;  %v1983_v46 = vmul.f32 %v4028_v10, %v1737_v20  ;;  %v1984_v24 = vmul.f32 %v4033_v34, %v1737_v20  ;;  %v1750_v42 = vand.u32 2147483648, %v4231_v7 }
 0x449   : > { %v4261_v44 = vpop.eup %3041  ;;  %v1349_v9 = vmul.f32 1.442695, %v1233_v29  ;;  %v1351_v23 = vmul.f32 1.442695, %v1234_v35  ;;  %v1765_v58 = vand.u32 2147483648, %v4254_v56  ;;  %vm1759_vm3 = vweird.f32 %v4254_v56 }
 0x44a   : > { %v4265_v14 = vpop.eup %3043  ;;  %v1742_v16 = vmul.f32 %v3040_v49, %v1741_v47  ;;  %2047 = vst [vmem:[%s4044_s18 + $0x110] sm:$0xff] %v1983_v46  ;;  %2261 = vmatmul.f32.gmra.mxu0 %v1983_v46  ;;  %2374 = vmatmul.f32.gmra.mxu3 %v1984_v24  ;;  %v1751_v13 = vor.u32 1.1754944e-38, %v1750_v42  ;;  %v1763_v27 = vand.u32 2147483647, %v4254_v56 }
 0x44b   : > { %3047 = vpow2.f32 %v1349_v9  ;;  %v1448_v1 = vadd.f32 %v4265_v14, %v4261_v44  ;;  %2048 = vst [vmem:[%s4044_s18 + $0x118] sm:$0xff] %v1984_v24  ;;  %v1766_v17 = vor.u32 1.1754944e-38, %v1765_v58 }
 0x44c   : > { %3049 = vpow2.f32 %v1351_v23  ;;  %v1743_v34 = vadd.f32 %v3040_v49, %v1742_v16  ;;  %vm1764_vm1 = vcmp.eq.f32.partialorder %v1763_v27, 8.507059e+37 }
 0x44d   : > { %v3046_v10 = vpop.eup %3045  ;;  %v4274_v45 = vpop.f32.mrf.mxu3  ;;  %1449 = vadd.xlane.f32.xlu1 %v1448_v1 }
 0x44e   : > { %v1755_v15 = vmul.f32 %v3046_v10, %v4254_v56  ;;  %v4277_v25 = vpop.xlane.xlu1 %1434  ;;  %v1168_v38 = vpop.xlane.xlu2 %1167  ;;  %v1747_v55 = vsel %vm1746_vm15, %v3040_v49, %v1743_v34  ;;  %vm1760_vm2 = vweird.f32 %v3046_v10 }
 0x44f   : > { %3051 = vrcp.f32 %v4277_v25  ;;  %v1235_v43 = vsub.f32 %v4083_v60, %v1168_v38  ;;  %v4281_v7 = vpop.f32.mrf.mxu0  ;;  %v1236_v37 = vsub.f32 %v4078_v39, %v1168_v38  ;;  %v1752_v57 = vsel %vm1749_vm7, %v1751_v13, %v1747_v55  ;;  %vm1761_vm4 = vmor %vm1759_vm3, %vm1760_vm2 }
 0x450   : > { %v1756_v30 = vsub.f32 1.0, %v1755_v15  ;;  %v1985_v32 = vmul.f32 %v4053_v3, %v1752_v57  ;;  %v1986_v49 = vmul.f32 %v4060_v48, %v1752_v57  ;;  %v1780_v36 = vand.u32 2147483648, %v4277_v25 }
 0x451   : > { %v4284_v41 = vpop.eup %3047  ;;  %v1353_v5 = vmul.f32 1.442695, %v1235_v43  ;;  %v1355_v18 = vmul.f32 1.442695, %v1236_v37  ;;  %vm1774_vm6 = vweird.f32 %v4277_v25 }
 0x452   : > { %v4289_v59 = vpop.eup %3049  ;;  %v1757_v60 = vmul.f32 %v3046_v10, %v1756_v30  ;;  %2049 = vst [vmem:[%s4044_s18 + $0x120] sm:$0xff] %v1985_v32  ;;  %2264 = vmatmul.f32.gmra.mxu0 %v1985_v32  ;;  %2377 = vmatmul.f32.gmra.mxu3 %v1986_v49  ;;  %v1781_v15 = vor.u32 1.1754944e-38, %v1780_v36 }
 0x453   : > { %3053 = vpow2.f32 %v1353_v5  ;;  %v1451_v39 = vadd.f32 %v4289_v59, %v4284_v41  ;;  %2050 = vst [vmem:[%s4044_s18 + $0x128] sm:$0xff] %v1986_v49 }
 0x454   : > { %3055 = vpow2.f32 %v1355_v18  ;;  %v1758_v3 = vadd.f32 %v3046_v10, %v1757_v60 }
 0x455   : > { %v3052_v48 = vpop.eup %3051  ;;  %1452 = vadd.xlane.f32.xlu2 %v1451_v39  ;;  %v4297_v29 = vpop.f32.mrf.mxu3 }
 0x456   : > { %v1770_v47 = vmul.f32 %v3052_v48, %v4277_v25  ;;  %v1171_v35 = vpop.xlane.xlu2 %1170  ;;  %v1762_v20 = vsel %vm1761_vm4, %v3046_v10, %v1758_v3  ;;  %vm1775_vm5 = vweird.f32 %v3052_v48 }
 0x457   : > { %v1237_v9 = vsub.f32 %v4108_v33, %v1171_v35  ;;  %v1238_v56 = vsub.f32 %v4100_v63, %v1171_v35  ;;  %v4303_v46 = vpop.f32.mrf.mxu0  ;;  %v1767_v24 = vsel %vm1764_vm1, %v1766_v17, %v1762_v20  ;;  %v1778_v63 = vand.u32 2147483647, %v4277_v25  ;;  %vm1776_vm8 = vmor %vm1774_vm6, %vm1775_vm5 }
 0x458   : > { %v1771_v16 = vsub.f32 1.0, %v1770_v47  ;;  %v1987_v42 = vmul.f32 %v4076_v31, %v1767_v24  ;;  %v1988_v23 = vmul.f32 %v4081_v26, %v1767_v24 }
 0x459   : > { %v4307_v1 = vpop.eup %3053  ;;  %v1357_v34 = vmul.f32 1.442695, %v1237_v9  ;;  %v1359_v10 = vmul.f32 1.442695, %v1238_v56  ;;  %vm1779_vm9 = vcmp.eq.f32.partialorder %v1778_v63, 8.507059e+37 }
 0x45a   : > { %v4310_v13 = vpop.eup %3055  ;;  %v1772_v33 = vmul.f32 %v3052_v48, %v1771_v16  ;;  %2051 = vst [vmem:[%s4044_s18 + $0x130] sm:$0xff] %v1987_v42  ;;  %2267 = vmatmul.f32.gmra.mxu0 %v1987_v42  ;;  %2380 = vmatmul.f32.gmra.mxu3 %v1988_v23 }
 0x45b   : > { %3057 = vpow2.f32 %v1357_v34  ;;  %2052 = vst [vmem:[%s4044_s18 + $0x138] sm:$0xff] %v1988_v23  ;;  %v1454_v31 = vadd.f32 %v4310_v13, %v4307_v1 }
 0x45c   : > { %3059 = vpow2.f32 %v1359_v10  ;;  %v1773_v26 = vadd.f32 %v3052_v48, %v1772_v33 }
 0x45d   : > { %1455 = vadd.xlane.f32.xlu1 %v1454_v31  ;;  %v4318_v38 = vpop.f32.mrf.mxu3 }
 0x45e   : > { %v1174_v55 = vpop.xlane.xlu2 %1173  ;;  %v1777_v43 = vsel %vm1776_vm8, %v3052_v48, %v1773_v26 }
 0x45f   : > { %v1239_v30 = vsub.f32 %v4120_v51, %v1174_v55  ;;  %v1240_v37 = vsub.f32 %v4116_v62, %v1174_v55  ;;  %v4322_v57 = vpop.f32.mrf.mxu0  ;;  %v1782_v58 = vsel %vm1779_vm9, %v1781_v15, %v1777_v43 }
 0x460   : > { %v1989_v25 = vmul.f32 %v4096_v40, %v1782_v58  ;;  %v1990_v5 = vmul.f32 %v4098_v12, %v1782_v58 }
 0x461   : > { %v4326_v32 = vpop.eup %3057  ;;  %v1361_v49 = vmul.f32 1.442695, %v1239_v30  ;;  %v1363_v60 = vmul.f32 1.442695, %v1240_v37 }
 0x462   : > { %v4328_v18 = vpop.eup %3059  ;;  %2053 = vst [vmem:[%s4044_s18 + $0x140] sm:$0xff] %v1989_v25  ;;  %2270 = vmatmul.f32.gmra.mxu0 %v1989_v25  ;;  %2383 = vmatmul.f32.gmra.mxu3 %v1990_v5 }
 0x463   : > { %3061 = vpow2.f32 %v1361_v49  ;;  %2054 = vst [vmem:[%s4044_s18 + $0x148] sm:$0xff] %v1990_v5  ;;  %v1457_v62 = vadd.f32 %v4328_v18, %v4326_v32  ;;  %v2325_v49 = vadd.f32 %v4251_v4, %v4235_v2 }
 0x464   : > { %3063 = vpow2.f32 %v1363_v60 }
 0x465   : > { %1458 = vadd.xlane.f32.xlu2 %v1457_v62  ;;  %v4334_v51 = vpop.f32.mrf.mxu3 }
 0x466   : > { %v1177_v40 = vpop.xlane.xlu2 %1176 }
 0x467   : > { %v1241_v12 = vsub.f32 %v4130_v0, %v1177_v40  ;;  %v1242_v27 = vsub.f32 %v4128_v6, %v1177_v40  ;;  %v4338_v39 = vpop.f32.mrf.mxu0 }
 0x469   : > { %v4340_v3 = vpop.eup %3061  ;;  %v1365_v48 = vmul.f32 1.442695, %v1241_v12  ;;  %v1367_v17 = vmul.f32 1.442695, %v1242_v27  ;;  %v2328_v27 = vadd.f32 %v4274_v45, %v4258_v53 }
 0x46a   : > { %v4342_v47 = vpop.eup %3063 }
 0x46b   : > { %3065 = vpow2.f32 %v1365_v48  ;;  %v1460_v35 = vadd.f32 %v4342_v47, %v4340_v3 }
 0x46c   : > { %3067 = vpow2.f32 %v1367_v17 }
 0x46d   : > { %1461 = vadd.xlane.f32.xlu1 %v1460_v35  ;;  %v4346_v20 = vpop.f32.mrf.mxu3 }
 0x46e   : > { %v1180_v9 = vpop.xlane.xlu2 %1179 }
 0x46f   : > { %v1243_v0 = vsub.f32 %v4140_v19, %v1180_v9  ;;  %v1244_v6 = vsub.f32 %v4138_v50, %v1180_v9  ;;  %v4350_v56 = vpop.f32.mrf.mxu0 }
 0x471   : > { %v4352_v24 = vpop.eup %3065  ;;  %v1369_v16 = vmul.f32 1.442695, %v1243_v0  ;;  %v1371_v42 = vmul.f32 1.442695, %v1244_v6 }
 0x472   : > { %v4354_v23 = vpop.eup %3067 }
 0x473   : > { %3069 = vpow2.f32 %v1369_v16  ;;  %v1463_v36 = vadd.f32 %v4354_v23, %v4352_v24  ;;  %v2331_v16 = vadd.f32 %v4297_v29, %v4281_v7 }
 0x474   : > { %3071 = vpow2.f32 %v1371_v42 }
 0x475   : > { %1464 = vadd.xlane.f32.xlu2 %v1463_v36  ;;  %v4358_v34 = vpop.f32.mrf.mxu3 }
 0x477   : > { %v4360_v10 = vpop.f32.mrf.mxu0 }
 0x479   : > { %v4362_v19 = vpop.eup %3069 }
 0x47a   : > { %v4364_v50 = vpop.eup %3071 }
 0x47b   : > { %v1466_v33 = vadd.f32 %v4364_v50, %v4362_v19 }
 0x47d   : > { %1467 = vadd.xlane.f32.xlu1 %v1466_v33  ;;  %v4368_v63 = vpop.f32.mrf.mxu3 }
 0x47f   : > { %v2235_v31 = vpop.f32.mrf.mxu0 }
 0x485   : > { %v2348_v26 = vpop.f32.mrf.mxu3 }
 0x486   : > { %v4370_v15 = vadd.f32 %v2348_v26, %v2235_v31 }
 0x487   : > { %v2238_v55 = vpop.f32.mrf.mxu0 }
 0x48d   : > { %v2351_v43 = vpop.f32.mrf.mxu3 }
 0x48e   : > { %v4372_v30 = vadd.f32 %v2351_v43, %v2238_v55 }
 0x48f   : > { %v2241_v37 = vpop.f32.mrf.mxu0 }
 0x495   : > { %v2354_v58 = vpop.f32.mrf.mxu3 }
 0x496   : > { %v4374_v25 = vadd.f32 %v2354_v58, %v2241_v37 }
 0x497   : > { %v2244_v5 = vpop.f32.mrf.mxu0 }
 0x49d   : > { %v2357_v60 = vpop.f32.mrf.mxu3 }
 0x49e   : > { %v4378_v62 = vadd.f32 %v2357_v60, %v2244_v5  ;;  %2420 = vxpose.xlu2.b32.start [1/16] (narrow) %v2325_v49, 8 }
 0x49f   : > { %v2247_v40 = vpop.f32.mrf.mxu0 }
 0x4a0   : > { %v1438_v12 = vpop.xlane.xlu1 %1437 }
 0x4a1   : > { %3073 = vrcp.f32 %v1438_v12  ;;  %v1795_v4 = vand.u32 2147483648, %v1438_v12  ;;  %v1793_v36 = vand.u32 2147483647, %v1438_v12  ;;  %vm1789_vm11 = vweird.f32 %v1438_v12 }
 0x4a3   : > { %v1796_v31 = vor.u32 1.1754944e-38, %v1795_v4  ;;  %vm1794_vm13 = vcmp.eq.f32.partialorder %v1793_v36, 8.507059e+37 }
 0x4a5   : > { %v2360_v48 = vpop.f32.mrf.mxu3 }
 0x4a6   : > { %2421 = vxpose.xlu2.b32.cont [2/16] (narrow) %v2328_v27, 8  ;;  %v4382_v35 = vadd.f32 %v2360_v48, %v2247_v40  ;;  %v2334_v40 = vadd.f32 %v4318_v38, %v4303_v46 }
 0x4a7   : > { %v3074_v17 = vpop.eup %3073  ;;  %v2250_v0 = vpop.f32.mrf.mxu0 }
 0x4a8   : > { %v1785_v9 = vmul.f32 %v3074_v17, %v1438_v12  ;;  %v1441_v6 = vpop.xlane.xlu1 %1440  ;;  %vm1790_vm10 = vweird.f32 %v3074_v17 }
 0x4a9   : > { %3075 = vrcp.f32 %v1441_v6  ;;  %vm1791_vm12 = vmor %vm1789_vm11, %vm1790_vm10  ;;  %v1810_v60 = vand.u32 2147483648, %v1441_v6  ;;  %v1808_v27 = vand.u32 2147483647, %v1441_v6  ;;  %vm1804_vm15 = vweird.f32 %v1441_v6 }
 0x4aa   : > { %v1786_v2 = vsub.f32 1.0, %v1785_v9 }
 0x4ab   : > { %vm1809_vm2 = vcmp.eq.f32.partialorder %v1808_v27, 8.507059e+37 }
 0x4ac   : > { %v1787_v42 = vmul.f32 %v3074_v17, %v1786_v2 }
 0x4ad   : > { %v2363_v33 = vpop.f32.mrf.mxu3 }
 0x4ae   : > { %2422 = vxpose.xlu2.b32.cont [3/16] (narrow) %v2331_v16, 8  ;;  %v1788_v53 = vadd.f32 %v3074_v17, %v1787_v42  ;;  %v4386_v26 = vadd.f32 %v2363_v33, %v2250_v0  ;;  %v1811_v0 = vor.u32 1.1754944e-38, %v1810_v60  ;;  %v2337_v33 = vadd.f32 %v4334_v51, %v4322_v57 }
 0x4af   : > { %v3076_v45 = vpop.eup %3075  ;;  %v2253_v43 = vpop.f32.mrf.mxu0  ;;  %v2340_v60 = vadd.f32 %v4346_v20, %v4338_v39 }
 0x4b0   : > { %v1800_v55 = vmul.f32 %v3076_v45, %v1441_v6  ;;  %v1444_v37 = vpop.xlane.xlu1 %1443  ;;  %v1792_v58 = vsel %vm1791_vm12, %v3074_v17, %v1788_v53  ;;  %vm1805_vm14 = vweird.f32 %v3076_v45 }
 0x4b1   : > { %3077 = vrcp.f32 %v1444_v37  ;;  %v1797_v7 = vsel %vm1794_vm13, %v1796_v31, %v1792_v58  ;;  %vm1806_vm7 = vmor %vm1804_vm15, %vm1805_vm14  ;;  %v1825_v42 = vand.u32 2147483648, %v1444_v37  ;;  %v1823_v31 = vand.u32 2147483647, %v1444_v37 }
 0x4b2   : > { %v1801_v29 = vsub.f32 1.0, %v1800_v55  ;;  %v1991_v5 = vmul.f32 %v4183_v22, %v1797_v7  ;;  %v1992_v49 = vmul.f32 %v4185_v8, %v1797_v7  ;;  %vm1819_vm4 = vweird.f32 %v1444_v37 }
 0x4b3   : > { %vm1824_vm5 = vcmp.eq.f32.partialorder %v1823_v31, 8.507059e+37 }
 0x4b4   : > { %v1802_v12 = vmul.f32 %v3076_v45, %v1801_v29  ;;  %2055 = vst [vmem:[%s4044_s18 + $0x150] sm:$0xff] %v1991_v5  ;;  %2273 = vmatmul.f32.gmra.mxu0 %v1991_v5  ;;  %2386 = vmatmul.f32.gmra.mxu3 %v1992_v49 }
 0x4b5   : > { %2056 = vst [vmem:[%s4044_s18 + $0x158] sm:$0xff] %v1992_v49  ;;  %v2366_v48 = vpop.f32.mrf.mxu3 }
 0x4b6   : > { %2423 = vxpose.xlu2.b32.cont [4/16] (narrow) %v2334_v40, 8  ;;  %v1803_v17 = vadd.f32 %v3076_v45, %v1802_v12  ;;  %v4394_v22 = vadd.f32 %v2366_v48, %v2253_v43  ;;  %v1826_v43 = vor.u32 1.1754944e-38, %v1825_v42 }
 0x4b7   : > { %v3078_v9 = vpop.eup %3077  ;;  %v2256_v2 = vpop.f32.mrf.mxu0 }
 0x4b8   : > { %v1815_v8 = vmul.f32 %v3078_v9, %v1444_v37  ;;  %v1807_v46 = vsel %vm1806_vm7, %v3076_v45, %v1803_v17  ;;  %v1447_v38 = vpop.xlane.xlu1 %1446  ;;  %vm1820_vm3 = vweird.f32 %v3078_v9 }
 0x4b9   : > { %v1812_v4 = vsel %vm1809_vm2, %v1811_v0, %v1807_v46  ;;  %3079 = vrcp.f32 %v1447_v38  ;;  %vm1821_vm1 = vmor %vm1819_vm4, %vm1820_vm3  ;;  %v1840_v12 = vand.u32 2147483648, %v1447_v38  ;;  %v1838_v48 = vand.u32 2147483647, %v1447_v38 }
 0x4ba   : > { %v1816_v16 = vsub.f32 1.0, %v1815_v8  ;;  %v1993_v6 = vmul.f32 %v4202_v28, %v1812_v4  ;;  %v1994_v36 = vmul.f32 %v4205_v11, %v1812_v4  ;;  %vm1834_vm8 = vweird.f32 %v1447_v38 }
 0x4bb   : > { %vm1839_vm10 = vcmp.eq.f32.partialorder %v1838_v48, 8.507059e+37 }
 0x4bc   : > { %v1817_v53 = vmul.f32 %v3078_v9, %v1816_v16  ;;  %2057 = vst [vmem:[%s4044_s18 + $0x160] sm:$0xff] %v1993_v6  ;;  %2276 = vmatmul.f32.gmra.mxu0 %v1993_v6  ;;  %2389 = vmatmul.f32.gmra.mxu3 %v1994_v36 }
 0x4bd   : > { %2058 = vst [vmem:[%s4044_s18 + $0x168] sm:$0xff] %v1994_v36  ;;  %v2369_v45 = vpop.f32.mrf.mxu3 }
 0x4be   : > { %2424 = vxpose.xlu2.b32.cont [5/16] (narrow) %v2337_v33, 8  ;;  %v1818_v55 = vadd.f32 %v3078_v9, %v1817_v53  ;;  %v4402_v58 = vadd.f32 %v2369_v45, %v2256_v2 }
 0x4bf   : > { %v3080_v28 = vpop.eup %3079  ;;  %v2259_v11 = vpop.f32.mrf.mxu0 }
 0x4c0   : > { %v1822_v57 = vsel %vm1821_vm1, %v3078_v9, %v1818_v55  ;;  %v1830_v51 = vmul.f32 %v3080_v28, %v1447_v38  ;;  %v1450_v7 = vpop.xlane.xlu1 %1449  ;;  %vm1835_vm6 = vweird.f32 %v3080_v28  ;;  %v2343_v38 = vadd.f32 %v4358_v34, %v4350_v56 }
 0x4c1   : > { %v1827_v29 = vsel %vm1824_vm5, %v1826_v43, %v1822_v57  ;;  %3081 = vrcp.f32 %v1450_v7  ;;  %vm1836_vm9 = vmor %vm1834_vm8, %vm1835_vm6  ;;  %v1855_v4 = vand.u32 2147483648, %v1450_v7  ;;  %v1853_v36 = vand.u32 2147483647, %v1450_v7 }
 0x4c2   : > { %v1995_v37 = vmul.f32 %v4220_v52, %v1827_v29  ;;  %v1831_v5 = vsub.f32 1.0, %v1830_v51  ;;  %v1996_v49 = vmul.f32 %v4223_v61, %v1827_v29  ;;  %v1841_v61 = vor.u32 1.1754944e-38, %v1840_v12 }
 0x4c3   : > { %vm1849_vm12 = vweird.f32 %v1450_v7  ;;  %v1856_v55 = vor.u32 1.1754944e-38, %v1855_v4  ;;  %vm1854_vm14 = vcmp.eq.f32.partialorder %v1853_v36, 8.507059e+37 }
 0x4c4   : > { %2059 = vst [vmem:[%s4044_s18 + $0x170] sm:$0xff] %v1995_v37  ;;  %v1832_v40 = vmul.f32 %v3080_v28, %v1831_v5  ;;  %2279 = vmatmul.f32.gmra.mxu0 %v1995_v37  ;;  %2392 = vmatmul.f32.gmra.mxu3 %v1996_v49  ;;  %v2346_v37 = vadd.f32 %v4368_v63, %v4360_v10 }
 0x4c5   : > { %2060 = vst [vmem:[%s4044_s18 + $0x178] sm:$0xff] %v1996_v49  ;;  %v2372_v27 = vpop.f32.mrf.mxu3 }
 0x4c6   : > { %2425 = vxpose.xlu2.b32.cont [6/16] (narrow) %v2340_v60, 8  ;;  %v2373_v17 = vadd.f32 %v2372_v27, %v2259_v11  ;;  %v1833_v9 = vadd.f32 %v3080_v28, %v1832_v40 }
 0x4c7   : > { %v3082_v0 = vpop.eup %3081  ;;  %v2262_v52 = vpop.f32.mrf.mxu0 }
 0x4c8   : > { %v1453_v8 = vpop.xlane.xlu2 %1452  ;;  %v1845_v2 = vmul.f32 %v3082_v0, %v1450_v7  ;;  %2452 = vxpose.xlu1.b32.start [1/16] (narrow) %v2373_v17, 8  ;;  %v1837_v39 = vsel %vm1836_vm9, %v3080_v28, %v1833_v9  ;;  %vm1850_vm11 = vweird.f32 %v3082_v0 }
 0x4c9   : > { %3083 = vrcp.f32 %v1453_v8  ;;  %v1842_v46 = vsel %vm1839_vm10, %v1841_v61, %v1837_v39  ;;  %vm1851_vm13 = vmor %vm1849_vm12, %vm1850_vm11  ;;  %v1870_v11 = vand.u32 2147483648, %v1453_v8  ;;  %v1868_v29 = vand.u32 2147483647, %v1453_v8 }
 0x4ca   : > { %v1846_v20 = vsub.f32 1.0, %v1845_v2  ;;  %v1997_v16 = vmul.f32 %v4240_v21, %v1842_v46  ;;  %v1998_v42 = vmul.f32 %v4244_v54, %v1842_v46  ;;  %vm1864_vm7 = vweird.f32 %v1453_v8 }
 0x4cb   : > { %v1871_v40 = vor.u32 1.1754944e-38, %v1870_v11  ;;  %vm1869_vm3 = vcmp.eq.f32.partialorder %v1868_v29, 8.507059e+37 }
 0x4cc   : > { %v1847_v6 = vmul.f32 %v3082_v0, %v1846_v20  ;;  %2061 = vst [vmem:[%s4044_s18 + $0x180] sm:$0xff] %v1997_v16  ;;  %2282 = vmatmul.f32.gmra.mxu0 %v1997_v16  ;;  %2395 = vmatmul.f32.gmra.mxu3 %v1998_v42 }
 0x4cd   : > { %v2375_v33 = vpop.f32.mrf.mxu3  ;;  %2062 = vst [vmem:[%s4044_s18 + $0x188] sm:$0xff] %v1998_v42 }
 0x4ce   : > { %v2376_v31 = vadd.f32 %v2375_v33, %v2262_v52  ;;  %2426 = vxpose.xlu2.b32.cont [7/16] (narrow) %v2343_v38, 8  ;;  %v1848_v45 = vadd.f32 %v3082_v0, %v1847_v6 }
 0x4cf   : > { %v3084_v53 = vpop.eup %3083  ;;  %v2265_v34 = vpop.f32.mrf.mxu0 }
 0x4d0   : > { %v1860_v21 = vmul.f32 %v3084_v53, %v1453_v8  ;;  %v1456_v43 = vpop.xlane.xlu1 %1455  ;;  %2453 = vxpose.xlu1.b32.cont [2/16] (narrow) %v2376_v31, 8  ;;  %v1852_v54 = vsel %vm1851_vm13, %v3082_v0, %v1848_v45  ;;  %vm1865_vm15 = vweird.f32 %v3084_v53 }
 0x4d1   : > { %3085 = vrcp.f32 %v1456_v43  ;;  %v1857_v28 = vsel %vm1854_vm14, %v1856_v55, %v1852_v54  ;;  %vm1866_vm2 = vmor %vm1864_vm7, %vm1865_vm15  ;;  %v1885_v9 = vand.u32 2147483648, %v1456_v43  ;;  %v1883_v8 = vand.u32 2147483647, %v1456_v43 }
 0x4d2   : > { %v1861_v56 = vsub.f32 1.0, %v1860_v21  ;;  %v1999_v57 = vmul.f32 %v4261_v44, %v1857_v28  ;;  %v2000_v51 = vmul.f32 %v4265_v14, %v1857_v28  ;;  %vm1879_vm1 = vweird.f32 %v1456_v43 }
 0x4d3   : > { %v1886_v20 = vor.u32 1.1754944e-38, %v1885_v9  ;;  %vm1884_vm6 = vcmp.eq.f32.partialorder %v1883_v8, 8.507059e+37 }
 0x4d4   : > { %v1862_v7 = vmul.f32 %v3084_v53, %v1861_v56  ;;  %2063 = vst [vmem:[%s4044_s18 + $0x190] sm:$0xff] %v1999_v57  ;;  %2285 = vmatmul.f32.gmra.mxu0 %v1999_v57  ;;  %2398 = vmatmul.f32.gmra.mxu3 %v2000_v51 }
 0x4d5   : > { %2064 = vst [vmem:[%s4044_s18 + $0x198] sm:$0xff] %v2000_v51  ;;  %v2378_v5 = vpop.f32.mrf.mxu3 }
 0x4d6   : > { %v1863_v49 = vadd.f32 %v3084_v53, %v1862_v7  ;;  %v2379_v12 = vadd.f32 %v2378_v5, %v2265_v34  ;;  %2427 = vxpose.xlu2.b32.cont [8/16] (narrow) %v2346_v37, 8 }
 0x4d7   : > { %v3086_v60 = vpop.eup %3085  ;;  %v2268_v52 = vpop.f32.mrf.mxu0 }
 0x4d8   : > { %v1875_v44 = vmul.f32 %v3086_v60, %v1456_v43  ;;  %v1459_v14 = vpop.xlane.xlu2 %1458  ;;  %v1867_v27 = vsel %vm1866_vm2, %v3084_v53, %v1863_v49  ;;  %2454 = vxpose.xlu1.b32.cont [3/16] (narrow) %v2379_v12, 8  ;;  %vm1880_vm4 = vweird.f32 %v3086_v60 }
 0x4d9   : > { %3087 = vrcp.f32 %v1459_v14  ;;  %v1872_v10 = vsel %vm1869_vm3, %v1871_v40, %v1867_v27  ;;  %vm1881_vm5 = vmor %vm1879_vm1, %vm1880_vm4  ;;  %v1900_v36 = vand.u32 2147483648, %v1459_v14  ;;  %v1898_v53 = vand.u32 2147483647, %v1459_v14 }
 0x4da   : > { %v1876_v63 = vsub.f32 1.0, %v1875_v44  ;;  %v2001_v48 = vmul.f32 %v4284_v41, %v1872_v10  ;;  %v2002_v17 = vmul.f32 %v4289_v59, %v1872_v10  ;;  %vm1894_vm9 = vweird.f32 %v1459_v14 }
 0x4db   : > { %v1901_v21 = vor.u32 1.1754944e-38, %v1900_v36  ;;  %vm1899_vm11 = vcmp.eq.f32.partialorder %v1898_v53, 8.507059e+37 }
 0x4dc   : > { %v1877_v0 = vmul.f32 %v3086_v60, %v1876_v63  ;;  %2065 = vst [vmem:[%s4044_s18 + $0x1a0] sm:$0xff] %v2001_v48  ;;  %2288 = vmatmul.f32.gmra.mxu0 %v2001_v48  ;;  %2401 = vmatmul.f32.gmra.mxu3 %v2002_v17 }
 0x4dd   : > { %2066 = vst [vmem:[%s4044_s18 + $0x1a8] sm:$0xff] %v2002_v17  ;;  %v2381_v61 = vpop.f32.mrf.mxu3 }
 0x4de   : > { %v1878_v2 = vadd.f32 %v3086_v60, %v1877_v0  ;;  %v2382_v46 = vadd.f32 %v2381_v61, %v2268_v52  ;;  %2428 = vxpose.xlu2.b32.cont [9/16] (narrow) %v4370_v15, 8 }
 0x4df   : > { %v3088_v39 = vpop.eup %3087  ;;  %v2271_v15 = vpop.f32.mrf.mxu0 }
 0x4e0   : > { %v1890_v41 = vmul.f32 %v3088_v39, %v1459_v14  ;;  %v1462_v59 = vpop.xlane.xlu1 %1461  ;;  %v1882_v4 = vsel %vm1881_vm5, %v3086_v60, %v1878_v2  ;;  %2455 = vxpose.xlu1.b32.cont [4/16] (narrow) %v2382_v46, 8  ;;  %vm1895_vm8 = vweird.f32 %v3088_v39 }
 0x4e1   : > { %3089 = vrcp.f32 %v1462_v59  ;;  %v1887_v16 = vsel %vm1884_vm6, %v1886_v20, %v1882_v4  ;;  %vm1896_vm10 = vmor %vm1894_vm9, %vm1895_vm8  ;;  %v1915_v57 = vand.u32 2147483648, %v1462_v59  ;;  %v1913_v7 = vand.u32 2147483647, %v1462_v59 }
 0x4e2   : > { %v1891_v42 = vsub.f32 1.0, %v1890_v41  ;;  %v2003_v38 = vmul.f32 %v4307_v1, %v1887_v16  ;;  %v2004_v6 = vmul.f32 %v4310_v13, %v1887_v16  ;;  %vm1909_vm13 = vweird.f32 %v1462_v59 }
 0x4e3   : > { %v1916_v37 = vor.u32 1.1754944e-38, %v1915_v57  ;;  %vm1914_vm15 = vcmp.eq.f32.partialorder %v1913_v7, 8.507059e+37 }
 0x4e4   : > { %v1892_v33 = vmul.f32 %v3088_v39, %v1891_v42  ;;  %2067 = vst [vmem:[%s4044_s18 + $0x1b0] sm:$0xff] %v2003_v38  ;;  %2291 = vmatmul.f32.gmra.mxu0 %v2003_v38  ;;  %2404 = vmatmul.f32.gmra.mxu3 %v2004_v6 }
 0x4e5   : > { %2068 = vst [vmem:[%s4044_s18 + $0x1b8] sm:$0xff] %v2004_v6  ;;  %v2384_v31 = vpop.f32.mrf.mxu3 }
 0x4e6   : > { %v1893_v45 = vadd.f32 %v3088_v39, %v1892_v33  ;;  %v2385_v43 = vadd.f32 %v2384_v31, %v2271_v15  ;;  %2429 = vxpose.xlu2.b32.cont [10/16] (narrow) %v4372_v30, 8 }
 0x4e7   : > { %v3090_v55 = vpop.eup %3089 }
 0x4e8   : > { %v1905_v1 = vmul.f32 %v3090_v55, %v1462_v59  ;;  %v1465_v13 = vpop.xlane.xlu2 %1464  ;;  %v1897_v54 = vsel %vm1896_vm10, %v3088_v39, %v1893_v45  ;;  %2456 = vxpose.xlu1.b32.cont [5/16] (narrow) %v2385_v43, 8  ;;  %vm1910_vm12 = vweird.f32 %v3090_v55 }
 0x4e9   : > { %3091 = vrcp.f32 %v1465_v13  ;;  %v1902_v56 = vsel %vm1899_vm11, %v1901_v21, %v1897_v54  ;;  %vm1911_vm14 = vmor %vm1909_vm13, %vm1910_vm12  ;;  %v1930_v44 = vand.u32 2147483648, %v1465_v13  ;;  %v1928_v27 = vand.u32 2147483647, %v1465_v13 }
 0x4ea   : > { %v1906_v34 = vsub.f32 1.0, %v1905_v1  ;;  %v2005_v28 = vmul.f32 %v4326_v32, %v1902_v56  ;;  %v2006_v11 = vmul.f32 %v4328_v18, %v1902_v56  ;;  %vm1924_vm2 = vweird.f32 %v1465_v13 }
 0x4eb   : > { %v1931_v63 = vor.u32 1.1754944e-38, %v1930_v44  ;;  %vm1929_vm4 = vcmp.eq.f32.partialorder %v1928_v27, 8.507059e+37 }
 0x4ec   : > { %v1907_v51 = vmul.f32 %v3090_v55, %v1906_v34  ;;  %2069 = vst [vmem:[%s4044_s18 + $0x1c0] sm:$0xff] %v2005_v28  ;;  %2294 = vmatmul.f32.gmra.mxu0 %v2005_v28  ;;  %2407 = vmatmul.f32.gmra.mxu3 %v2006_v11 }
 0x4ed   : > { %2070 = vst [vmem:[%s4044_s18 + $0x1c8] sm:$0xff] %v2006_v11 }
 0x4ee   : > { %v1908_v30 = vadd.f32 %v3090_v55, %v1907_v51  ;;  %2430 = vxpose.xlu2.b32.cont [11/16] (narrow) %v4374_v25, 8 }
 0x4ef   : > { %v3092_v29 = vpop.eup %3091 }
 0x4f0   : > { %v1920_v32 = vmul.f32 %v3092_v29, %v1465_v13  ;;  %v1468_v5 = vpop.xlane.xlu1 %1467  ;;  %v1912_v18 = vsel %vm1911_vm14, %v3090_v55, %v1908_v30  ;;  %vm1925_vm7 = vweird.f32 %v3092_v29 }
 0x4f1   : > { %3093 = vrcp.f32 %v1468_v5  ;;  %v1917_v49 = vsel %vm1914_vm15, %v1916_v37, %v1912_v18  ;;  %vm1926_vm3 = vmor %vm1924_vm2, %vm1925_vm7  ;;  %v1945_v52 = vand.u32 2147483648, %v1468_v5  ;;  %v1943_v61 = vand.u32 2147483647, %v1468_v5 }
 0x4f2   : > { %v1921_v60 = vsub.f32 1.0, %v1920_v32  ;;  %v2007_v40 = vmul.f32 %v4340_v3, %v1917_v49  ;;  %v2008_v12 = vmul.f32 %v4342_v47, %v1917_v49  ;;  %vm1939_vm5 = vweird.f32 %v1468_v5 }
 0x4f3   : > { %v1946_v2 = vor.u32 1.1754944e-38, %v1945_v52  ;;  %vm1944_vm8 = vcmp.eq.f32.partialorder %v1943_v61, 8.507059e+37 }
 0x4f4   : > { %v1922_v14 = vmul.f32 %v3092_v29, %v1921_v60  ;;  %2071 = vst [vmem:[%s4044_s18 + $0x1d0] sm:$0xff] %v2007_v40  ;;  %2297 = vmatmul.f32.gmra.mxu0 %v2007_v40  ;;  %2410 = vmatmul.f32.gmra.mxu3 %v2008_v12 }
 0x4f5   : > { %2072 = vst [vmem:[%s4044_s18 + $0x1d8] sm:$0xff] %v2008_v12 }
 0x4f6   : > { %v1923_v25 = vadd.f32 %v3092_v29, %v1922_v14  ;;  %2431 = vxpose.xlu2.b32.cont [12/16] (narrow) %v4378_v62, 8 }
 0x4f7   : > { %v3094_v10 = vpop.eup %3093 }
 0x4f8   : > { %v1935_v3 = vmul.f32 %v3094_v10, %v1468_v5  ;;  %v1927_v48 = vsel %vm1926_vm3, %v3092_v29, %v1923_v25  ;;  %vm1940_vm1 = vweird.f32 %v3094_v10 }
 0x4f9   : > { %v1932_v47 = vsel %vm1929_vm4, %v1931_v63, %v1927_v48  ;;  %vm1941_vm6 = vmor %vm1939_vm5, %vm1940_vm1 }
 0x4fa   : > { %v1936_v17 = vsub.f32 1.0, %v1935_v3  ;;  %v2009_v9 = vmul.f32 %v4352_v24, %v1932_v47  ;;  %v2010_v0 = vmul.f32 %v4354_v23, %v1932_v47 }
 0x4fc   : > { %v1937_v8 = vmul.f32 %v3094_v10, %v1936_v17  ;;  %2073 = vst [vmem:[%s4044_s18 + $0x1e0] sm:$0xff] %v2009_v9  ;;  %2300 = vmatmul.f32.gmra.mxu0 %v2009_v9  ;;  %2413 = vmatmul.f32.gmra.mxu3 %v2010_v0 }
 0x4fd   : > { %2074 = vst [vmem:[%s4044_s18 + $0x1e8] sm:$0xff] %v2010_v0 }
 0x4fe   : > { %v1938_v62 = vadd.f32 %v3094_v10, %v1937_v8  ;;  %2432 = vxpose.xlu2.b32.cont [13/16] (narrow) %v4382_v35, 8 }
 0x500   : > { %v1942_v39 = vsel %vm1941_vm6, %v3094_v10, %v1938_v62 }
 0x501   : > { %v1947_v24 = vsel %vm1944_vm8, %v1946_v2, %v1942_v39 }
 0x502   : > { %v2011_v23 = vmul.f32 %v4362_v19, %v1947_v24  ;;  %v2012_v20 = vmul.f32 %v4364_v50, %v1947_v24 }
 0x504   : > { %2075 = vst [vmem:[%s4044_s18 + $0x1f0] sm:$0xff] %v2011_v23  ;;  %2303 = vmatmul.f32.gmra.mxu0 %v2011_v23  ;;  %2416 = vmatmul.f32.gmra.mxu3 %v2012_v20 }
 0x505   : > { %2076 = vst [vmem:[%s4044_s18 + $0x1f8] sm:$0xff] %v2012_v20 }
 0x506   : > { %2433 = vxpose.xlu2.b32.cont [14/16] (narrow) %v4386_v26, 8 }
 0x50e   : > { %2434 = vxpose.xlu2.b32.cont [15/16] (narrow) %v4394_v22, 8 }
 0x516   : > { %2435 = vxpose.xlu2.b32.end [16/16] (narrow) %v4402_v58, 8 }
 0x531   : > { %v2274_v46 = vpop.f32.mrf.mxu0 }
 0x537   : > { %v2387_v35 = vpop.f32.mrf.mxu3  ;;  %v2436_v29 = vpop.trf.xlu2 }
 0x538   : > { %v2388_v41 = vadd.f32 %v2387_v35, %v2274_v46 }
 0x539   : > { %v2277_v59 = vpop.f32.mrf.mxu0 }
 0x53a   : > { %2457 = vxpose.xlu1.b32.cont [6/16] (narrow) %v2388_v41, 8 }
 0x53f   : > { %v2390_v4 = vpop.f32.mrf.mxu3 }
 0x540   : > { %v2391_v16 = vadd.f32 %v2390_v4, %v2277_v59 }
 0x541   : > { %v2280_v19 = vpop.f32.mrf.mxu0 }
 0x542   : > { %2458 = vxpose.xlu1.b32.cont [7/16] (narrow) %v2391_v16, 8 }
 0x547   : > { %v2393_v50 = vpop.f32.mrf.mxu3 }
 0x548   : > { %v2394_v42 = vadd.f32 %v2393_v50, %v2280_v19 }
 0x549   : > { %v2283_v38 = vpop.f32.mrf.mxu0 }
 0x54a   : > { %2459 = vxpose.xlu1.b32.cont [8/16] (narrow) %v2394_v42, 8 }
 0x54f   : > { %v2396_v6 = vpop.f32.mrf.mxu3 }
 0x550   : > { %v2397_v36 = vadd.f32 %v2396_v6, %v2283_v38 }
 0x551   : > { %v2286_v26 = vpop.f32.mrf.mxu0 }
 0x552   : > { %2460 = vxpose.xlu1.b32.cont [9/16] (narrow) %v2397_v36, 8 }
 0x557   : > { %v2399_v22 = vpop.f32.mrf.mxu3 }
 0x558   : > { %v2400_v33 = vadd.f32 %v2399_v22, %v2286_v26 }
 0x559   : > { %v2289_v58 = vpop.f32.mrf.mxu0 }
 0x55a   : > { %2461 = vxpose.xlu1.b32.cont [10/16] (narrow) %v2400_v33, 8 }
 0x55f   : > { %v2402_v53 = vpop.f32.mrf.mxu3 }
 0x560   : > { %v2403_v15 = vadd.f32 %v2402_v53, %v2289_v58 }
 0x561   : > { %v2292_v31 = vpop.f32.mrf.mxu0 }
 0x562   : > { %2462 = vxpose.xlu1.b32.cont [11/16] (narrow) %v2403_v15, 8 }
 0x567   : > { %v2405_v45 = vpop.f32.mrf.mxu3 }
 0x568   : > { %v2406_v55 = vadd.f32 %v2405_v45, %v2292_v31 }
 0x569   : > { %v2295_v21 = vpop.f32.mrf.mxu0 }
 0x56a   : > { %2463 = vxpose.xlu1.b32.cont [12/16] (narrow) %v2406_v55, 8 }
 0x56f   : > { %v2408_v43 = vpop.f32.mrf.mxu3 }
 0x570   : > { %v2409_v1 = vadd.f32 %v2408_v43, %v2295_v21 }
 0x571   : > { %v2298_v13 = vpop.f32.mrf.mxu0 }
 0x572   : > { %2464 = vxpose.xlu1.b32.cont [13/16] (narrow) %v2409_v1, 8 }
 0x577   : > { %v2411_v54 = vpop.f32.mrf.mxu3 }
 0x578   : > { %v2412_v56 = vadd.f32 %v2411_v54, %v2298_v13 }
 0x579   : > { %v2301_v34 = vpop.f32.mrf.mxu0 }
 0x57a   : > { %2465 = vxpose.xlu1.b32.cont [14/16] (narrow) %v2412_v56, 8 }
 0x57f   : > { %v2414_v28 = vpop.f32.mrf.mxu3 }
 0x580   : > { %v2415_v11 = vadd.f32 %v2414_v28, %v2301_v34 }
 0x581   : > { %v2304_v57 = vpop.f32.mrf.mxu0 }
 0x582   : > { %2466 = vxpose.xlu1.b32.cont [15/16] (narrow) %v2415_v11, 8 }
 0x587   : > { %v2417_v51 = vpop.f32.mrf.mxu3 }
 0x588   : > { %v2418_v7 = vadd.f32 %v2417_v51, %v2304_v57 }
 0x58a   : > { %2467 = vxpose.xlu1.b32.end [16/16] (narrow) %v2418_v7, 8 }
 0x5b6   : > { %v2468_v30 = vpop.trf.xlu1  ;;  %2496 = sbr.rel (%p2842_p11) target bundleno = 1888 (0x760), region = 48 }
 0x5b7   : > { %v2486_v37 = vrot.slane %v2468_v30, 4 }
 0x5b9   : > { %v2487_v32 = vsel %vm444_vm0, %v2436_v29, %v2486_v37 }
 0x5ba   : > { %2492 = vst [vmem:[%s2491_s22] sm:$0xff] %v2487_v32 }
 0x5bb   : > { %v3163_v48 = vmov 839922192   ;;  %v3164_v50 = vmov 0   ;;  %v2560_v31 = vld [vmem:[%s4535_s4] sm:$0xf] }
 0x5bc   : > { %v2527_v47 = vunpack.c.l.s4 %v3163_v48  ;;  %3095 = vset.pattern.permute.xlu2 %v3164_v50  ;;  %3096 = vset.pattern.permute.xlu0 %v3164_v50  ;;  %v2573_v1 = vld [vmem:[%s4536_s5] sm:$0xf] }
 0x5be   : > { %v2528_v9 = vunpack.c.0.s8 %v2527_v47 }
 0x5c1   : > { %v4464_v5 = vld [vmem:[%s4538_s7] sm:$0xff]  ;;  %v4470_v18 = vld [vmem:[%s4538_s7 + $0x8] sm:$0xff] }
 0x5c2   : > { %2499 = vst [vmem:[#allocation1] ss:$2 sm:$0xff] %v4464_v5 }
 0x5c9   : > { %v2500_v49 = vld.sshfl [vmem:[#allocation1] sm:$0xff pattern:$0x75316420]  ;;  %v2501_v60 = vld.sshfl [vmem:[#allocation1 + $0x8] sm:$0xff pattern:$0x75316420] }
 0x5ca   : > { %v2504_v40 = vsel %vm444_vm0, %v2500_v49, 0.0  ;;  %v2505_v12 = vsel %vm444_vm0, %v2501_v60, 0.0  ;;  %2513 = vst [vmem:[#allocation1] ss:$2 sm:$0xff] %v4470_v18 }
 0x5cb   : > { %v2506_v44 = vadd.f32 %v2505_v12, %v2504_v40 }
 0x5cd   : > { %2507 = vadd.xlane.f32.xlu0 %v2506_v44 }
 0x5d1   : > { %v2514_v14 = vld.sshfl [vmem:[#allocation1] sm:$0xff pattern:$0x75316420]  ;;  %v2515_v27 = vld.sshfl [vmem:[#allocation1 + $0x8] sm:$0xff pattern:$0x75316420] }
 0x5d2   : > { %v2518_v25 = vsel %vm444_vm0, %v2514_v14, 0.0  ;;  %v2519_v10 = vsel %vm444_vm0, %v2515_v27, 0.0 }
 0x5d3   : > { %v2520_v63 = vadd.f32 %v2519_v10, %v2518_v25 }
 0x5d5   : > { %2521 = vadd.xlane.f32.xlu0 %v2520_v63 }
 0x640   : > { %v2508_v3 = vpop.xlane.xlu0 %2507 }
 0x648   : > { %v2522_v17 = vpop.xlane.xlu0 %2521 }
 0x649   : > { %v2523_v0 = vadd.f32 %v2522_v17, %v2508_v3 }
 0x64b   : > { %v2524_v52 = vmul.f32 0.001953125, %v2523_v0 }
 0x64d   : > { %v2529_v8 = vperm.slane %v2524_v52, %v2528_v9 }
 0x64f   : > { %v2531_v61 = vsub.f32 %v4464_v5, %v2529_v8  ;;  %v2545_v2 = vsub.f32 %v4470_v18, %v2529_v8 }
 0x651   : > { %v2532_v62 = vmul.f32 %v2531_v61, %v2531_v61  ;;  %v2546_v39 = vmul.f32 %v2545_v2, %v2545_v2 }
 0x653   : > { %2534 = vst [vmem:[#allocation1] ss:$2 sm:$0xff] %v2532_v62 }
 0x65a   : > { %v2535_v24 = vld.sshfl [vmem:[#allocation1] sm:$0xff pattern:$0x75316420]  ;;  %v2536_v23 = vld.sshfl [vmem:[#allocation1 + $0x8] sm:$0xff pattern:$0x75316420] }
 0x65b   : > { %v2539_v20 = vsel %vm444_vm0, %v2535_v24, 0.0  ;;  %v2540_v46 = vsel %vm444_vm0, %v2536_v23, 0.0  ;;  %2548 = vst [vmem:[#allocation1] ss:$2 sm:$0xff] %v2546_v39 }
 0x65c   : > { %v2541_v35 = vadd.f32 %v2540_v46, %v2539_v20 }
 0x65e   : > { %2542 = vadd.xlane.f32.xlu1 %v2541_v35 }
 0x662   : > { %v2549_v41 = vld.sshfl [vmem:[#allocation1] sm:$0xff pattern:$0x75316420]  ;;  %v2550_v59 = vld.sshfl [vmem:[#allocation1 + $0x8] sm:$0xff pattern:$0x75316420] }
 0x663   : > { %v2553_v4 = vsel %vm444_vm0, %v2549_v41, 0.0  ;;  %v2554_v16 = vsel %vm444_vm0, %v2550_v59, 0.0 }
 0x664   : > { %v2555_v19 = vadd.f32 %v2554_v16, %v2553_v4 }
 0x666   : > { %2556 = vadd.xlane.f32.xlu1 %v2555_v19 }
 0x6d1   : > { %v2543_v42 = vpop.xlane.xlu1 %2542 }
 0x6d9   : > { %v2557_v38 = vpop.xlane.xlu1 %2556 }
 0x6da   : > { %v2558_v6 = vadd.f32 %v2557_v38, %v2543_v42 }
 0x6dc   : > { %v2559_v36 = vmul.f32 0.001953125, %v2558_v6 }
 0x6de   : > { %v2561_v26 = vadd.f32 1e-05, %v2559_v36 }
 0x6e0   : > { %3097 = vrsqrt.f32 %v2561_v26  ;;  %vm2568_vm0 = vweird.f32 %v2561_v26 }
 0x6e6   : > { %v3098_v22 = vpop.eup %3097 }
 0x6e7   : > { %v2563_v33 = vmul.f32 %v3098_v22, %v2561_v26  ;;  %vm2569_vm9 = vweird.f32 %v3098_v22 }
 0x6e8   : > { %vm2570_vm10 = vmor %vm2568_vm0, %vm2569_vm9 }
 0x6e9   : > { %v2564_v58 = vmul.f32 %v3098_v22, %v2563_v33 }
 0x6eb   : > { %v2565_v53 = vmul.f32 0.5, %v2564_v58 }
 0x6ed   : > { %v2566_v15 = vsub.f32 1.5, %v2565_v53 }
 0x6ef   : > { %v2567_v45 = vmul.f32 %v3098_v22, %v2566_v15 }
 0x6f1   : > { %v2571_v55 = vsel %vm2570_vm10, %v3098_v22, %v2567_v45 }
 0x6f2   : > { %v2572_v21 = vmul.f32 %v2571_v55, %v2560_v31 }
 0x6f4   : > { %2578 = vperm.xlu2 %3095, %v2572_v21   ;;  %v2574_v43 = vmul.f32 %v2572_v21, %v2524_v52 }
 0x6f6   : > { %v2575_v13 = vsub.f32 %v2573_v1, %v2574_v43 }
 0x6fc   : > { %2588 = vperm.xlu2 %3095, %v2575_v13  }
 0x74e   : > { %v2579_v54 = vpop.permute.xlu2 %2578 }
 0x74f   : > { %v2583_v56 = vperm.slane %v2579_v54, %v2528_v9 }
 0x751   : > { %v2585_v28 = vmul.f32 %v2583_v56, %v4464_v5  ;;  %v2601_v11 = vmul.f32 %v4470_v18, %v2583_v56 }
 0x756   : > { %v2589_v34 = vpop.permute.xlu2 %2588 }
 0x757   : > { %v2593_v57 = vperm.slane %v2589_v34, %v2528_v9 }
 0x759   : > { %v2595_v51 = vadd.f32 %v2593_v57, %v2585_v28  ;;  %v2602_v7 = vadd.f32 %v2601_v11, %v2593_v57 }
 0x75b   : > { %vm2596_vm11 = vcmp.ge.f32.partialorder %v2595_v51, 0.0  ;;  %v2597_v30 = vmul.f32 0.01, %v2595_v51  ;;  %vm2603_vm12 = vcmp.ge.f32.partialorder %v2602_v7, 0.0  ;;  %v2604_v29 = vmul.f32 0.01, %v2602_v7 }
 0x75d   : > { %v2598_v37 = vsel %vm2596_vm11, %v2595_v51, %v2597_v30  ;;  %v2605_v32 = vsel %vm2603_vm12, %v2602_v7, %v2604_v29 }
 0x75e   : > { %2599 = vst [vmem:[%s4538_s7] sm:$0xff] %v2598_v37 }
 0x75f   : > { %2845 = vst [vmem:[%s4538_s7 + $0x8] sm:$0xff] %v2605_v32 }
 0x760 PF: > { %s2853_s23 = sshll.u32 %s3228_s28, 9  ;;  %s2620_s13 = sshll.u32 %s4044_s18, 4  ;;  %s2621_s13 = int_to_ptr.vmem [resolvable:$true] %s2620_s13 }
 0x761   : > { %s2619_s9 = scalar_lea.hbm %s4537_s6, %s2853_s23  ;;  %s2608_s15 = scalar_lea.sflag [#allocation3], %s265_s16 }
 0x762   : > { %s2622_s14 = sshll.u32 %s2619_s9, 4  ;;  %s3119_s28 = scalar_lea.hbm %s4537_s6, 1024  ;;  %s2623_s14 = int_to_ptr.hbm [resolvable:$true] %s2622_s14 }
 0x763   : > { %s3113_s17 = sshra.s32 %s2623_s14, 4  ;;  %s3114_s17 = int_to_ptr.hbm [resolvable:$true] %s3113_s17 }
 0x764   : > { %s3115_s19 = scalar_lea.hbm %s3114_s17, 512  ;;  %p3120_p1 = scmp.lt.s32.totalorder %s3114_s17, %s4537_s6 }
 0x765   : > { %p3116_p12 = scmp.ne.s32.totalorder %s3114_s17, %s3115_s19  ;;  %p3121_p2 = scmp.lt.s32.totalorder %s3119_s28, %s3115_s19 }
 0x767   : > { %p3117_p13 = pnand %p3116_p12, %p3245_p5  ;;  %p3122_p3 = por %p3121_p2, %p3120_p1 }
 0x769   : > { %p3118_p0 = pneg %p3117_p13 }
 0x76b   : > { %p3123_p4 = pnand %p3122_p3, %p3118_p0 }
 0x76d   : > { %3126 = shalt.err (!%p3123_p4)
}
 0x76e   : > { %s3165_s16 = smov 256   ;;  %s3166_s18 = smov 16  }
 0x76f   : > { %2859 = dma.vmem_to_hbm [thread:$0]  (%p3245_p5), %s2621_s13, 8192, %s2623_s14, %s2608_s15, %s3165_s16, %s3165_s16, %s3166_s18  }
 0x770 PF: > { %p2865_p7 = scmp.ge.s32.totalorder %s3161_s27, 2  ;;  %s2643_s23 = sand.u32 1, %s3149_s24  }
 0x771   : > { %s2644_s8 = scalar_lea.sflag [#allocation3], %s2643_s23 }
 0x772   : > { %p2862_p8 = pnand %p2865_p7, %p3249_p6 }
 0x774   : > { %p2863_p9 = pneg %p2862_p8 }
 0x776   : > { %3144 = dma.done.wait (%p2863_p9), %s2644_s8, 8192  }
 0x777   : > { %3146 = vsyncadd (%p2863_p9), %s2644_s8, 4294959104  ;;  %p18_p10 = scmp.ge.s32.totalorder %s3232_s30, 4   ;;  %s4553_s24 = smov %s3153_s25 }
 0x778   : > { %s4554_s25 = smov %s3157_s26  ;;  %s4555_s26 = smov %s3243_s10 }
 0x779   : > { %s4556_s27 = smov %s3232_s30  ;;  %20 = sbr.rel (!%p18_p10) target bundleno = 3 (0x3), region = 93 }
 0x77e   :  { %2650 = vsyncpa [#allocation3], 1 }
 0x77f   :  { %2652 = vsyncpa [#allocation3 + $0x1], 1 }

</bundles_post_ra>
